<compile_context>
chip_gen: v7x
topology: tpu7x:2x2x1
jax: 0.10.0
libtpu: 0.0.40
codegen_flags: <defaults>
</compile_context>

<pallas_src>
import math

import jax
import jax.numpy as jnp
from jax.experimental import pallas as pl
from jax.experimental.pallas import tpu as pltpu

LEAK = 0.01  # nn.LeakyReLU default negative_slope


# ------------------------- conv layer (fused, grid over batch) -------------------------

def _build_taps(x_nhwc):
    """8 parity/shift "tap planes" for a k=4, s=2, p=1 conv (plain-JAX layout glue).

    plane s = ph*4 + pw*2 + dw, shaped (B, (Ho+1)*Wo, C) with
      plane[s][b, row*Wo + col, c] == x_pad[b, 2*row + ph, 2*(col + dw) + pw, c]
    so the im2col block for tap (kh, kw) = (2*dh+ph, 2*dw+pw) is the contiguous
    row window [dh*Wo, dh*Wo + Ho*Wo) of plane s.  Total size ~2x the input
    (vs 16x for a materialized im2col).
    """
    B, H, W, C = x_nhwc.shape
    Ho, Wo = H // 2, W // 2
    xp = jnp.pad(x_nhwc, ((0, 0), (1, 1), (1, 1), (0, 0)))
    planes = []
    for ph in (0, 1):
        for pw in (0, 1):
            par = xp[:, ph::2, pw::2, :]                                  # (B, Ho+1, Wo+1, C)
            for dw in (0, 1):
                planes.append(par[:, :, dw:dw + Wo, :].reshape(B, (Ho + 1) * Wo, C))
    return jnp.stack(planes, axis=1)                                      # (B, 8, (Ho+1)*Wo, C)


def _make_conv_kernel(Wo, M, Cout):
    def kernel(taps_ref, w_ref, b_ref, o_ref):
        # taps_ref: (1, 8, (Ho+1)*Wo, Cin) bf16 ; w_ref: (16, Cin, Cout) bf16 ; b_ref: (1, Cout) f32
        acc = jnp.zeros((M, Cout), jnp.float32)
        for kh in range(4):
            dh, ph = kh // 2, kh % 2
            for kw in range(4):
                dw, pw = kw // 2, kw % 2
                s = ph * 4 + pw * 2 + dw
                patch = taps_ref[0, s, dh * Wo:dh * Wo + M, :]            # (M, Cin) bf16
                acc = acc + jnp.dot(patch, w_ref[kh * 4 + kw],
                                    preferred_element_type=jnp.float32)   # f32 accumulate
        y = acc + b_ref[...]
        o_ref[0, :, :] = jnp.where(y > 0, y, LEAK * y).astype(o_ref.dtype)
    return kernel


def conv4x4_s2_lrelu(x_nhwc, w16, b):
    """Conv2d(k=4, s=2, p=1) + LeakyReLU, fused Pallas kernel, grid over batch."""
    B, H, W, C = x_nhwc.shape
    assert H % 2 == 0 and W % 2 == 0
    Ho, Wo = H // 2, W // 2
    M = Ho * Wo
    Cout = w16.shape[-1]
    R = (Ho + 1) * Wo
    taps = _build_taps(x_nhwc)                                            # bf16, (B, 8, R, C)
    out = pl.pallas_call(
        _make_conv_kernel(Wo, M, Cout),
        out_shape=jax.ShapeDtypeStruct((B, M, Cout), jnp.bfloat16),
        grid=(B,),
        in_specs=[
            pl.BlockSpec((1, 8, R, C), lambda i: (i, 0, 0, 0)),           # per-image tap planes (pipelined)
            pl.BlockSpec((16, C, Cout), lambda i: (0, 0, 0)),             # weights: constant index -> resident
            pl.BlockSpec((1, Cout), lambda i: (0, 0)),
        ],
        out_specs=pl.BlockSpec((1, M, Cout), lambda i: (i, 0, 0)),
        compiler_params=pltpu.CompilerParams(dimension_semantics=("parallel",)),
        cost_estimate=pl.CostEstimate(
            flops=2 * B * M * 16 * C * Cout,
            transcendentals=0,
            bytes_accessed=taps.size * 2 + w16.size * 2 + b.size * 4 + B * M * Cout * 2,
        ),
    )(taps, w16, b.reshape(1, Cout))
    return out.reshape(B, Ho, Wo, Cout)


# ------------------------- MLP head (single fused kernel, K-tiled first Linear) -------------------------

def _head_kernel(x_ref, w1_ref, b1_ref, w2_ref, b2_ref, w3_ref, b3_ref, o_ref, acc_ref):
    k = pl.program_id(0)

    @pl.when(k == 0)
    def _():
        acc_ref[...] = jnp.zeros_like(acc_ref)

    acc_ref[...] += jnp.dot(x_ref[...], w1_ref[...], preferred_element_type=jnp.float32)

    @pl.when(k == pl.num_programs(0) - 1)
    def _():
        h = acc_ref[...] + b1_ref[...]
        h = jnp.where(h > 0, h, LEAK * h)                                 # LeakyReLU
        h = jnp.dot(h.astype(jnp.bfloat16), w2_ref[...],
                    preferred_element_type=jnp.float32) + b2_ref[...]
        h = jnp.where(h > 0, h, LEAK * h)                                 # LeakyReLU
        o_ref[...] = jnp.dot(h.astype(jnp.bfloat16), w3_ref[...],
                             preferred_element_type=jnp.float32) + b3_ref[...]


def _pick_tk(F):
    """Largest K-tile that divides F (F = 256*(img/8)^2 is always a multiple of 256)."""
    if F <= 8192:
        return F
    for tk in (4096, 2048, 1024, 512, 256):
        if F % tk == 0:
            return tk
    return F


def mlp_head(feat, params):
    B, F = feat.shape
    H1 = params["w1"].shape[1]                                            # 256
    NC = params["w3"].shape[1]
    TK = _pick_tk(F)
    return pl.pallas_call(
        _head_kernel,
        out_shape=jax.ShapeDtypeStruct((B, NC), jnp.float32),
        grid=(F // TK,),
        in_specs=[
            pl.BlockSpec((B, TK), lambda k: (0, k)),                      # activations, K-tiled
            pl.BlockSpec((TK, H1), lambda k: (k, 0)),                     # big w1, K-tiled (double-buffered)
            pl.BlockSpec((1, H1), lambda k: (0, 0)),
            pl.BlockSpec((H1, H1), lambda k: (0, 0)),                     # small weights stay resident
            pl.BlockSpec((1, H1), lambda k: (0, 0)),
            pl.BlockSpec((H1, NC), lambda k: (0, 0)),
            pl.BlockSpec((1, NC), lambda k: (0, 0)),
        ],
        out_specs=pl.BlockSpec((B, NC), lambda k: (0, 0)),
        scratch_shapes=[pltpu.VMEM((B, H1), jnp.float32)],                # f32 accumulator
        compiler_params=pltpu.CompilerParams(dimension_semantics=("arbitrary",)),
        cost_estimate=pl.CostEstimate(
            flops=2 * B * (F * H1 + H1 * H1 + H1 * NC),
            transcendentals=0,
            bytes_accessed=(feat.size + F * H1 + H1 * H1 + H1 * NC) * 2 + B * NC * 4,
        ),
    )(feat, params["w1"], params["b1"].reshape(1, H1),
      params["w2"], params["b2"].reshape(1, H1),
      params["w3"], params["b3"].reshape(1, NC))


# ------------------------- params & forward -------------------------

def init_params(key, num_classes=256, img_size=128):
    assert img_size % 8 == 0, "conv path assumes img_size divisible by 8"
    s = img_size // 8
    hw = s * s
    F = 256 * hw
    ks = jax.random.split(key, 6)

    def conv_w(k, cout, cin):
        # kaiming_normal_(mode='fan_out'): std = sqrt(2 / (cout*kh*kw)); bias = 0.
        w = jax.random.normal(k, (cout, cin, 4, 4), jnp.float32) * math.sqrt(2.0 / (cout * 16))
        # torch (Cout, Cin, kh, kw) -> tap-major (kh*4+kw, Cin, Cout), bf16 for the MXU.
        return jnp.transpose(w, (2, 3, 1, 0)).reshape(16, cin, cout).astype(jnp.bfloat16)

    def lin_w(k, cin, cout):
        # nn.Linear weight ~ N(0, 0.01); stored transposed (in, out) for x @ W.
        return jax.random.normal(k, (cin, cout), jnp.float32) * 0.01

    w1 = lin_w(ks[3], F, 256)
    # torch.flatten(NCHW) orders features (c, h, w); our conv path flattens NHWC (h, w, c).
    # Permute w1's rows ONCE at init so the forward needs no feature-map transpose.
    perm = (jnp.arange(256)[None, :] * hw + jnp.arange(hw)[:, None]).reshape(-1)
    w1 = w1[perm]

    return dict(
        cw1=conv_w(ks[0], 64, 3),    cb1=jnp.zeros((64,), jnp.float32),
        cw2=conv_w(ks[1], 128, 64),  cb2=jnp.zeros((128,), jnp.float32),
        cw3=conv_w(ks[2], 256, 128), cb3=jnp.zeros((256,), jnp.float32),
        w1=w1.astype(jnp.bfloat16),  b1=jnp.zeros((256,), jnp.float32),
        w2=lin_w(ks[4], 256, 256).astype(jnp.bfloat16), b2=jnp.zeros((256,), jnp.float32),
        w3=lin_w(ks[5], 256, num_classes).astype(jnp.bfloat16),
        b3=jnp.zeros((num_classes,), jnp.float32),
    )


@jax.jit
def bc_image_only_forward(params, x_nchw):
    # TODO(synk): matmuls run in bf16 with f32 accumulation (per perf review); PyTorch uses f32 end-to-end.
    x = jnp.transpose(x_nchw, (0, 2, 3, 1)).astype(jnp.bfloat16)          # NCHW -> NHWC once at the boundary
    x = conv4x4_s2_lrelu(x, params["cw1"], params["cb1"])                 # (B, H/2, W/2, 64)
    x = conv4x4_s2_lrelu(x, params["cw2"], params["cb2"])                 # (B, H/4, W/4, 128)
    x = conv4x4_s2_lrelu(x, params["cw3"], params["cb3"])                 # (B, H/8, W/8, 256)
    B, Ho, Wo, C = x.shape
    feat = x.reshape(B, Ho * Wo * C)      # NHWC flatten; w1 rows were permuted at init to match
    return mlp_head(feat, params)


if __name__ == "__main__":
    B, IMG, NUM_CLASSES = 2, 16, 32       # small demo: 16x16 image -> 2x2x256 = 1024 features
    key = jax.random.PRNGKey(0)
    kx, kp = jax.random.split(key)

    params = init_params(kp, num_classes=NUM_CLASSES, img_size=IMG)
    x = jax.random.normal(kx, (B, 3, IMG, IMG), jnp.float32)              # NCHW, like PyTorch

    out = bc_image_only_forward(params, x)
    jax.block_until_ready(out)
    assert out.shape == (B, NUM_CLASSES)
    assert bool(jnp.all(jnp.isfinite(out)))
    print("KERNEL_OK")
</pallas_src>

<mosaic_0001>
module attributes {stable_mosaic.version = 11 : i64} {
  func.func @kernel(%arg0: i32, %arg1: memref<1x8x72x3xbf16, #tpu.memory_space<vmem>>, %arg2: memref<16x3x64xbf16, #tpu.memory_space<vmem>>, %arg3: memref<1x64xf32, #tpu.memory_space<vmem>>, %arg4: memref<1x64x64xbf16, #tpu.memory_space<vmem>>) attributes {dimension_semantics = [#tpu.dimension_semantics<parallel>], iteration_bounds = array<i64: 2>, scalar_prefetch = 0 : i64, scratch_operands = 0 : i64, tpu.core_type = #tpu.core_type<tc>, window_params = [{transform_indices = @transform_0, window_bounds = array<i64: 1, 8, 72, 3>}, {pipeline_mode = #tpu.pipeline_mode<synchronous>, transform_indices = @transform_1, window_bounds = array<i64: 16, 3, 64>}, {pipeline_mode = #tpu.pipeline_mode<synchronous>, transform_indices = @transform_2, window_bounds = array<i64: 1, 64>}, {transform_indices = @transform_3, window_bounds = array<i64: 1, 64, 64>}]} {
    %cst = arith.constant 0.000000e+00 : f32
    %0 = vector.broadcast %cst : f32 to vector<64x64xf32>
    %c0 = arith.constant 0 : index
    %c0_0 = arith.constant 0 : index
    %c0_1 = arith.constant 0 : index
    %c0_2 = arith.constant 0 : index
    %1 = vector.load %arg1[%c0, %c0_0, %c0_1, %c0_2] : memref<1x8x72x3xbf16, #tpu.memory_space<vmem>>, vector<1x1x64x3xbf16>
    %2 = vector.shape_cast %1 : vector<1x1x64x3xbf16> to vector<64x3xbf16>
    %c0_3 = arith.constant 0 : index
    %c0_4 = arith.constant 0 : index
    %c0_5 = arith.constant 0 : index
    %3 = vector.load %arg2[%c0_3, %c0_4, %c0_5] : memref<16x3x64xbf16, #tpu.memory_space<vmem>>, vector<1x3x64xbf16>
    %4 = vector.shape_cast %3 : vector<1x3x64xbf16> to vector<3x64xbf16>
    %cst_6 = arith.constant dense<0.000000e+00> : vector<64x64xf32>
    %5 = tpu.matmul %2, %4, %cst_6 {dimension_numbers = #tpu.dot_dimension_numbers<[1], [0], [0], [1], [0, 0, 1, 1], [], []>} : vector<64x3xbf16>, vector<3x64xbf16>, vector<64x64xf32> -> vector<64x64xf32>
    %6 = arith.addf %0, %5 : vector<64x64xf32>
    %c0_7 = arith.constant 0 : index
    %c2 = arith.constant 2 : index
    %c0_8 = arith.constant 0 : index
    %c0_9 = arith.constant 0 : index
    %7 = vector.load %arg1[%c0_7, %c2, %c0_8, %c0_9] : memref<1x8x72x3xbf16, #tpu.memory_space<vmem>>, vector<1x1x64x3xbf16>
    %8 = vector.shape_cast %7 : vector<1x1x64x3xbf16> to vector<64x3xbf16>
    %c1 = arith.constant 1 : index
    %c0_10 = arith.constant 0 : index
    %c0_11 = arith.constant 0 : index
    %9 = vector.load %arg2[%c1, %c0_10, %c0_11] : memref<16x3x64xbf16, #tpu.memory_space<vmem>>, vector<1x3x64xbf16>
    %10 = vector.shape_cast %9 : vector<1x3x64xbf16> to vector<3x64xbf16>
    %cst_12 = arith.constant dense<0.000000e+00> : vector<64x64xf32>
    %11 = tpu.matmul %8, %10, %cst_12 {dimension_numbers = #tpu.dot_dimension_numbers<[1], [0], [0], [1], [0, 0, 1, 1], [], []>} : vector<64x3xbf16>, vector<3x64xbf16>, vector<64x64xf32> -> vector<64x64xf32>
    %12 = arith.addf %6, %11 : vector<64x64xf32>
    %c0_13 = arith.constant 0 : index
    %c1_14 = arith.constant 1 : index
    %c0_15 = arith.constant 0 : index
    %c0_16 = arith.constant 0 : index
    %13 = vector.load %arg1[%c0_13, %c1_14, %c0_15, %c0_16] : memref<1x8x72x3xbf16, #tpu.memory_space<vmem>>, vector<1x1x64x3xbf16>
    %14 = vector.shape_cast %13 : vector<1x1x64x3xbf16> to vector<64x3xbf16>
    %c2_17 = arith.constant 2 : index
    %c0_18 = arith.constant 0 : index
    %c0_19 = arith.constant 0 : index
    %15 = vector.load %arg2[%c2_17, %c0_18, %c0_19] : memref<16x3x64xbf16, #tpu.memory_space<vmem>>, vector<1x3x64xbf16>
    %16 = vector.shape_cast %15 : vector<1x3x64xbf16> to vector<3x64xbf16>
    %cst_20 = arith.constant dense<0.000000e+00> : vector<64x64xf32>
    %17 = tpu.matmul %14, %16, %cst_20 {dimension_numbers = #tpu.dot_dimension_numbers<[1], [0], [0], [1], [0, 0, 1, 1], [], []>} : vector<64x3xbf16>, vector<3x64xbf16>, vector<64x64xf32> -> vector<64x64xf32>
    %18 = arith.addf %12, %17 : vector<64x64xf32>
    %c0_21 = arith.constant 0 : index
    %c3 = arith.constant 3 : index
    %c0_22 = arith.constant 0 : index
    %c0_23 = arith.constant 0 : index
    %19 = vector.load %arg1[%c0_21, %c3, %c0_22, %c0_23] : memref<1x8x72x3xbf16, #tpu.memory_space<vmem>>, vector<1x1x64x3xbf16>
    %20 = vector.shape_cast %19 : vector<1x1x64x3xbf16> to vector<64x3xbf16>
    %c3_24 = arith.constant 3 : index
    %c0_25 = arith.constant 0 : index
    %c0_26 = arith.constant 0 : index
    %21 = vector.load %arg2[%c3_24, %c0_25, %c0_26] : memref<16x3x64xbf16, #tpu.memory_space<vmem>>, vector<1x3x64xbf16>
    %22 = vector.shape_cast %21 : vector<1x3x64xbf16> to vector<3x64xbf16>
    %cst_27 = arith.constant dense<0.000000e+00> : vector<64x64xf32>
    %23 = tpu.matmul %20, %22, %cst_27 {dimension_numbers = #tpu.dot_dimension_numbers<[1], [0], [0], [1], [0, 0, 1, 1], [], []>} : vector<64x3xbf16>, vector<3x64xbf16>, vector<64x64xf32> -> vector<64x64xf32>
    %24 = arith.addf %18, %23 : vector<64x64xf32>
    %c0_28 = arith.constant 0 : index
    %c4 = arith.constant 4 : index
    %c0_29 = arith.constant 0 : index
    %c0_30 = arith.constant 0 : index
    %25 = vector.load %arg1[%c0_28, %c4, %c0_29, %c0_30] : memref<1x8x72x3xbf16, #tpu.memory_space<vmem>>, vector<1x1x64x3xbf16>
    %26 = vector.shape_cast %25 : vector<1x1x64x3xbf16> to vector<64x3xbf16>
    %c4_31 = arith.constant 4 : index
    %c0_32 = arith.constant 0 : index
    %c0_33 = arith.constant 0 : index
    %27 = vector.load %arg2[%c4_31, %c0_32, %c0_33] : memref<16x3x64xbf16, #tpu.memory_space<vmem>>, vector<1x3x64xbf16>
    %28 = vector.shape_cast %27 : vector<1x3x64xbf16> to vector<3x64xbf16>
    %cst_34 = arith.constant dense<0.000000e+00> : vector<64x64xf32>
    %29 = tpu.matmul %26, %28, %cst_34 {dimension_numbers = #tpu.dot_dimension_numbers<[1], [0], [0], [1], [0, 0, 1, 1], [], []>} : vector<64x3xbf16>, vector<3x64xbf16>, vector<64x64xf32> -> vector<64x64xf32>
    %30 = arith.addf %24, %29 : vector<64x64xf32>
    %c0_35 = arith.constant 0 : index
    %c6 = arith.constant 6 : index
    %c0_36 = arith.constant 0 : index
    %c0_37 = arith.constant 0 : index
    %31 = vector.load %arg1[%c0_35, %c6, %c0_36, %c0_37] : memref<1x8x72x3xbf16, #tpu.memory_space<vmem>>, vector<1x1x64x3xbf16>
    %32 = vector.shape_cast %31 : vector<1x1x64x3xbf16> to vector<64x3xbf16>
    %c5 = arith.constant 5 : index
    %c0_38 = arith.constant 0 : index
    %c0_39 = arith.constant 0 : index
    %33 = vector.load %arg2[%c5, %c0_38, %c0_39] : memref<16x3x64xbf16, #tpu.memory_space<vmem>>, vector<1x3x64xbf16>
    %34 = vector.shape_cast %33 : vector<1x3x64xbf16> to vector<3x64xbf16>
    %cst_40 = arith.constant dense<0.000000e+00> : vector<64x64xf32>
    %35 = tpu.matmul %32, %34, %cst_40 {dimension_numbers = #tpu.dot_dimension_numbers<[1], [0], [0], [1], [0, 0, 1, 1], [], []>} : vector<64x3xbf16>, vector<3x64xbf16>, vector<64x64xf32> -> vector<64x64xf32>
    %36 = arith.addf %30, %35 : vector<64x64xf32>
    %c0_41 = arith.constant 0 : index
    %c5_42 = arith.constant 5 : index
    %c0_43 = arith.constant 0 : index
    %c0_44 = arith.constant 0 : index
    %37 = vector.load %arg1[%c0_41, %c5_42, %c0_43, %c0_44] : memref<1x8x72x3xbf16, #tpu.memory_space<vmem>>, vector<1x1x64x3xbf16>
    %38 = vector.shape_cast %37 : vector<1x1x64x3xbf16> to vector<64x3xbf16>
    %c6_45 = arith.constant 6 : index
    %c0_46 = arith.constant 0 : index
    %c0_47 = arith.constant 0 : index
    %39 = vector.load %arg2[%c6_45, %c0_46, %c0_47] : memref<16x3x64xbf16, #tpu.memory_space<vmem>>, vector<1x3x64xbf16>
    %40 = vector.shape_cast %39 : vector<1x3x64xbf16> to vector<3x64xbf16>
    %cst_48 = arith.constant dense<0.000000e+00> : vector<64x64xf32>
    %41 = tpu.matmul %38, %40, %cst_48 {dimension_numbers = #tpu.dot_dimension_numbers<[1], [0], [0], [1], [0, 0, 1, 1], [], []>} : vector<64x3xbf16>, vector<3x64xbf16>, vector<64x64xf32> -> vector<64x64xf32>
    %42 = arith.addf %36, %41 : vector<64x64xf32>
    %c0_49 = arith.constant 0 : index
    %c7 = arith.constant 7 : index
    %c0_50 = arith.constant 0 : index
    %c0_51 = arith.constant 0 : index
    %43 = vector.load %arg1[%c0_49, %c7, %c0_50, %c0_51] : memref<1x8x72x3xbf16, #tpu.memory_space<vmem>>, vector<1x1x64x3xbf16>
    %44 = vector.shape_cast %43 : vector<1x1x64x3xbf16> to vector<64x3xbf16>
    %c7_52 = arith.constant 7 : index
    %c0_53 = arith.constant 0 : index
    %c0_54 = arith.constant 0 : index
    %45 = vector.load %arg2[%c7_52, %c0_53, %c0_54] : memref<16x3x64xbf16, #tpu.memory_space<vmem>>, vector<1x3x64xbf16>
    %46 = vector.shape_cast %45 : vector<1x3x64xbf16> to vector<3x64xbf16>
    %cst_55 = arith.constant dense<0.000000e+00> : vector<64x64xf32>
    %47 = tpu.matmul %44, %46, %cst_55 {dimension_numbers = #tpu.dot_dimension_numbers<[1], [0], [0], [1], [0, 0, 1, 1], [], []>} : vector<64x3xbf16>, vector<3x64xbf16>, vector<64x64xf32> -> vector<64x64xf32>
    %48 = arith.addf %42, %47 : vector<64x64xf32>
    %c0_56 = arith.constant 0 : index
    %c0_57 = arith.constant 0 : index
    %c8 = arith.constant 8 : index
    %c0_58 = arith.constant 0 : index
    %49 = vector.load %arg1[%c0_56, %c0_57, %c8, %c0_58] : memref<1x8x72x3xbf16, #tpu.memory_space<vmem>>, vector<1x1x64x3xbf16>
    %50 = vector.shape_cast %49 : vector<1x1x64x3xbf16> to vector<64x3xbf16>
    %c8_59 = arith.constant 8 : index
    %c0_60 = arith.constant 0 : index
    %c0_61 = arith.constant 0 : index
    %51 = vector.load %arg2[%c8_59, %c0_60, %c0_61] : memref<16x3x64xbf16, #tpu.memory_space<vmem>>, vector<1x3x64xbf16>
    %52 = vector.shape_cast %51 : vector<1x3x64xbf16> to vector<3x64xbf16>
    %cst_62 = arith.constant dense<0.000000e+00> : vector<64x64xf32>
    %53 = tpu.matmul %50, %52, %cst_62 {dimension_numbers = #tpu.dot_dimension_numbers<[1], [0], [0], [1], [0, 0, 1, 1], [], []>} : vector<64x3xbf16>, vector<3x64xbf16>, vector<64x64xf32> -> vector<64x64xf32>
    %54 = arith.addf %48, %53 : vector<64x64xf32>
    %c0_63 = arith.constant 0 : index
    %c2_64 = arith.constant 2 : index
    %c8_65 = arith.constant 8 : index
    %c0_66 = arith.constant 0 : index
    %55 = vector.load %arg1[%c0_63, %c2_64, %c8_65, %c0_66] : memref<1x8x72x3xbf16, #tpu.memory_space<vmem>>, vector<1x1x64x3xbf16>
    %56 = vector.shape_cast %55 : vector<1x1x64x3xbf16> to vector<64x3xbf16>
    %c9 = arith.constant 9 : index
    %c0_67 = arith.constant 0 : index
    %c0_68 = arith.constant 0 : index
    %57 = vector.load %arg2[%c9, %c0_67, %c0_68] : memref<16x3x64xbf16, #tpu.memory_space<vmem>>, vector<1x3x64xbf16>
    %58 = vector.shape_cast %57 : vector<1x3x64xbf16> to vector<3x64xbf16>
    %cst_69 = arith.constant dense<0.000000e+00> : vector<64x64xf32>
    %59 = tpu.matmul %56, %58, %cst_69 {dimension_numbers = #tpu.dot_dimension_numbers<[1], [0], [0], [1], [0, 0, 1, 1], [], []>} : vector<64x3xbf16>, vector<3x64xbf16>, vector<64x64xf32> -> vector<64x64xf32>
    %60 = arith.addf %54, %59 : vector<64x64xf32>
    %c0_70 = arith.constant 0 : index
    %c1_71 = arith.constant 1 : index
    %c8_72 = arith.constant 8 : index
    %c0_73 = arith.constant 0 : index
    %61 = vector.load %arg1[%c0_70, %c1_71, %c8_72, %c0_73] : memref<1x8x72x3xbf16, #tpu.memory_space<vmem>>, vector<1x1x64x3xbf16>
    %62 = vector.shape_cast %61 : vector<1x1x64x3xbf16> to vector<64x3xbf16>
    %c10 = arith.constant 10 : index
    %c0_74 = arith.constant 0 : index
    %c0_75 = arith.constant 0 : index
    %63 = vector.load %arg2[%c10, %c0_74, %c0_75] : memref<16x3x64xbf16, #tpu.memory_space<vmem>>, vector<1x3x64xbf16>
    %64 = vector.shape_cast %63 : vector<1x3x64xbf16> to vector<3x64xbf16>
    %cst_76 = arith.constant dense<0.000000e+00> : vector<64x64xf32>
    %65 = tpu.matmul %62, %64, %cst_76 {dimension_numbers = #tpu.dot_dimension_numbers<[1], [0], [0], [1], [0, 0, 1, 1], [], []>} : vector<64x3xbf16>, vector<3x64xbf16>, vector<64x64xf32> -> vector<64x64xf32>
    %66 = arith.addf %60, %65 : vector<64x64xf32>
    %c0_77 = arith.constant 0 : index
    %c3_78 = arith.constant 3 : index
    %c8_79 = arith.constant 8 : index
    %c0_80 = arith.constant 0 : index
    %67 = vector.load %arg1[%c0_77, %c3_78, %c8_79, %c0_80] : memref<1x8x72x3xbf16, #tpu.memory_space<vmem>>, vector<1x1x64x3xbf16>
    %68 = vector.shape_cast %67 : vector<1x1x64x3xbf16> to vector<64x3xbf16>
    %c11 = arith.constant 11 : index
    %c0_81 = arith.constant 0 : index
    %c0_82 = arith.constant 0 : index
    %69 = vector.load %arg2[%c11, %c0_81, %c0_82] : memref<16x3x64xbf16, #tpu.memory_space<vmem>>, vector<1x3x64xbf16>
    %70 = vector.shape_cast %69 : vector<1x3x64xbf16> to vector<3x64xbf16>
    %cst_83 = arith.constant dense<0.000000e+00> : vector<64x64xf32>
    %71 = tpu.matmul %68, %70, %cst_83 {dimension_numbers = #tpu.dot_dimension_numbers<[1], [0], [0], [1], [0, 0, 1, 1], [], []>} : vector<64x3xbf16>, vector<3x64xbf16>, vector<64x64xf32> -> vector<64x64xf32>
    %72 = arith.addf %66, %71 : vector<64x64xf32>
    %c0_84 = arith.constant 0 : index
    %c4_85 = arith.constant 4 : index
    %c8_86 = arith.constant 8 : index
    %c0_87 = arith.constant 0 : index
    %73 = vector.load %arg1[%c0_84, %c4_85, %c8_86, %c0_87] : memref<1x8x72x3xbf16, #tpu.memory_space<vmem>>, vector<1x1x64x3xbf16>
    %74 = vector.shape_cast %73 : vector<1x1x64x3xbf16> to vector<64x3xbf16>
    %c12 = arith.constant 12 : index
    %c0_88 = arith.constant 0 : index
    %c0_89 = arith.constant 0 : index
    %75 = vector.load %arg2[%c12, %c0_88, %c0_89] : memref<16x3x64xbf16, #tpu.memory_space<vmem>>, vector<1x3x64xbf16>
    %76 = vector.shape_cast %75 : vector<1x3x64xbf16> to vector<3x64xbf16>
    %cst_90 = arith.constant dense<0.000000e+00> : vector<64x64xf32>
    %77 = tpu.matmul %74, %76, %cst_90 {dimension_numbers = #tpu.dot_dimension_numbers<[1], [0], [0], [1], [0, 0, 1, 1], [], []>} : vector<64x3xbf16>, vector<3x64xbf16>, vector<64x64xf32> -> vector<64x64xf32>
    %78 = arith.addf %72, %77 : vector<64x64xf32>
    %c0_91 = arith.constant 0 : index
    %c6_92 = arith.constant 6 : index
    %c8_93 = arith.constant 8 : index
    %c0_94 = arith.constant 0 : index
    %79 = vector.load %arg1[%c0_91, %c6_92, %c8_93, %c0_94] : memref<1x8x72x3xbf16, #tpu.memory_space<vmem>>, vector<1x1x64x3xbf16>
    %80 = vector.shape_cast %79 : vector<1x1x64x3xbf16> to vector<64x3xbf16>
    %c13 = arith.constant 13 : index
    %c0_95 = arith.constant 0 : index
    %c0_96 = arith.constant 0 : index
    %81 = vector.load %arg2[%c13, %c0_95, %c0_96] : memref<16x3x64xbf16, #tpu.memory_space<vmem>>, vector<1x3x64xbf16>
    %82 = vector.shape_cast %81 : vector<1x3x64xbf16> to vector<3x64xbf16>
    %cst_97 = arith.constant dense<0.000000e+00> : vector<64x64xf32>
    %83 = tpu.matmul %80, %82, %cst_97 {dimension_numbers = #tpu.dot_dimension_numbers<[1], [0], [0], [1], [0, 0, 1, 1], [], []>} : vector<64x3xbf16>, vector<3x64xbf16>, vector<64x64xf32> -> vector<64x64xf32>
    %84 = arith.addf %78, %83 : vector<64x64xf32>
    %c0_98 = arith.constant 0 : index
    %c5_99 = arith.constant 5 : index
    %c8_100 = arith.constant 8 : index
    %c0_101 = arith.constant 0 : index
    %85 = vector.load %arg1[%c0_98, %c5_99, %c8_100, %c0_101] : memref<1x8x72x3xbf16, #tpu.memory_space<vmem>>, vector<1x1x64x3xbf16>
    %86 = vector.shape_cast %85 : vector<1x1x64x3xbf16> to vector<64x3xbf16>
    %c14 = arith.constant 14 : index
    %c0_102 = arith.constant 0 : index
    %c0_103 = arith.constant 0 : index
    %87 = vector.load %arg2[%c14, %c0_102, %c0_103] : memref<16x3x64xbf16, #tpu.memory_space<vmem>>, vector<1x3x64xbf16>
    %88 = vector.shape_cast %87 : vector<1x3x64xbf16> to vector<3x64xbf16>
    %cst_104 = arith.constant dense<0.000000e+00> : vector<64x64xf32>
    %89 = tpu.matmul %86, %88, %cst_104 {dimension_numbers = #tpu.dot_dimension_numbers<[1], [0], [0], [1], [0, 0, 1, 1], [], []>} : vector<64x3xbf16>, vector<3x64xbf16>, vector<64x64xf32> -> vector<64x64xf32>
    %90 = arith.addf %84, %89 : vector<64x64xf32>
    %c0_105 = arith.constant 0 : index
    %c7_106 = arith.constant 7 : index
    %c8_107 = arith.constant 8 : index
    %c0_108 = arith.constant 0 : index
    %91 = vector.load %arg1[%c0_105, %c7_106, %c8_107, %c0_108] : memref<1x8x72x3xbf16, #tpu.memory_space<vmem>>, vector<1x1x64x3xbf16>
    %92 = vector.shape_cast %91 : vector<1x1x64x3xbf16> to vector<64x3xbf16>
    %c15 = arith.constant 15 : index
    %c0_109 = arith.constant 0 : index
    %c0_110 = arith.constant 0 : index
    %93 = vector.load %arg2[%c15, %c0_109, %c0_110] : memref<16x3x64xbf16, #tpu.memory_space<vmem>>, vector<1x3x64xbf16>
    %94 = vector.shape_cast %93 : vector<1x3x64xbf16> to vector<3x64xbf16>
    %cst_111 = arith.constant dense<0.000000e+00> : vector<64x64xf32>
    %95 = tpu.matmul %92, %94, %cst_111 {dimension_numbers = #tpu.dot_dimension_numbers<[1], [0], [0], [1], [0, 0, 1, 1], [], []>} : vector<64x3xbf16>, vector<3x64xbf16>, vector<64x64xf32> -> vector<64x64xf32>
    %96 = arith.addf %90, %95 : vector<64x64xf32>
    %c0_112 = arith.constant 0 : index
    %c0_113 = arith.constant 0 : index
    %97 = vector.load %arg3[%c0_112, %c0_113] : memref<1x64xf32, #tpu.memory_space<vmem>>, vector<1x64xf32>
    %98 = vector.broadcast %97 : vector<1x64xf32> to vector<64x64xf32>
    %99 = arith.addf %96, %98 : vector<64x64xf32>
    %cst_114 = arith.constant 0.000000e+00 : f32
    %100 = vector.broadcast %cst_114 : f32 to vector<64x64xf32>
    %101 = arith.cmpf ogt, %99, %100 : vector<64x64xf32>
    %cst_115 = arith.constant 0.00999999977 : f32
    %102 = vector.broadcast %cst_115 : f32 to vector<64x64xf32>
    %103 = arith.mulf %102, %99 : vector<64x64xf32>
    %104 = arith.select %101, %99, %103 : vector<64x64xi1>, vector<64x64xf32>
    %105 = arith.truncf %104 : vector<64x64xf32> to vector<64x64xbf16>
    %c0_116 = arith.constant 0 : index
    %c0_117 = arith.constant 0 : index
    %c0_118 = arith.constant 0 : index
    %106 = vector.load %arg4[%c0_116, %c0_117, %c0_118] : memref<1x64x64xbf16, #tpu.memory_space<vmem>>, vector<1x64x64xbf16>
    %107 = vector.shape_cast %106 : vector<1x64x64xbf16> to vector<64x64xbf16>
    %108 = vector.shape_cast %105 : vector<64x64xbf16> to vector<1x64x64xbf16>
    tpu.vector_store %arg4[%c0_116, %c0_117, %c0_118], %108 {strides = array<i32>} : memref<1x64x64xbf16, #tpu.memory_space<vmem>>, vector<1x64x64xbf16>,
    return
  }
  func.func @transform_0(%arg0: i32) -> (i32, i32, i32, i32) {
    %c0_i32 = arith.constant 0 : i32
    %c0_i32_0 = arith.constant 0 : i32
    %c0_i32_1 = arith.constant 0 : i32
    %c0_i32_2 = arith.constant 0 : i32
    return %arg0, %c0_i32, %c0_i32_0, %c0_i32_1 : i32, i32, i32, i32
  }
  func.func @transform_1(%arg0: i32) -> (i32, i32, i32) {
    %c0_i32 = arith.constant 0 : i32
    %c0_i32_0 = arith.constant 0 : i32
    %c0_i32_1 = arith.constant 0 : i32
    %c0_i32_2 = arith.constant 0 : i32
    return %c0_i32, %c0_i32_0, %c0_i32_1 : i32, i32, i32
  }
  func.func @transform_2(%arg0: i32) -> (i32, i32) {
    %c0_i32 = arith.constant 0 : i32
    %c0_i32_0 = arith.constant 0 : i32
    %c0_i32_1 = arith.constant 0 : i32
    return %c0_i32, %c0_i32_0 : i32, i32
  }
  func.func @transform_3(%arg0: i32) -> (i32, i32, i32) {
    %c0_i32 = arith.constant 0 : i32
    %c0_i32_0 = arith.constant 0 : i32
    %c0_i32_1 = arith.constant 0 : i32
    return %arg0, %c0_i32, %c0_i32_0 : i32, i32, i32
  }
}

module attributes {stable_mosaic.version = 11 : i64} {
  func.func @kernel(%arg0: i32, %arg1: memref<1x8x20x64xbf16, #tpu.memory_space<vmem>>, %arg2: memref<16x64x128xbf16, #tpu.memory_space<vmem>>, %arg3: memref<1x128xf32, #tpu.memory_space<vmem>>, %arg4: memref<1x16x128xbf16, #tpu.memory_space<vmem>>) attributes {dimension_semantics = [#tpu.dimension_semantics<parallel>], iteration_bounds = array<i64: 2>, scalar_prefetch = 0 : i64, scratch_operands = 0 : i64, tpu.core_type = #tpu.core_type<tc>, window_params = [{transform_indices = @transform_0, window_bounds = array<i64: 1, 8, 20, 64>}, {pipeline_mode = #tpu.pipeline_mode<synchronous>, transform_indices = @transform_1, window_bounds = array<i64: 16, 64, 128>}, {pipeline_mode = #tpu.pipeline_mode<synchronous>, transform_indices = @transform_2, window_bounds = array<i64: 1, 128>}, {transform_indices = @transform_3, window_bounds = array<i64: 1, 16, 128>}]} {
    %cst = arith.constant 0.000000e+00 : f32
    %0 = vector.broadcast %cst : f32 to vector<16x128xf32>
    %c0 = arith.constant 0 : index
    %c0_0 = arith.constant 0 : index
    %c0_1 = arith.constant 0 : index
    %c0_2 = arith.constant 0 : index
    %1 = vector.load %arg1[%c0, %c0_0, %c0_1, %c0_2] : memref<1x8x20x64xbf16, #tpu.memory_space<vmem>>, vector<1x1x16x64xbf16>
    %2 = vector.shape_cast %1 : vector<1x1x16x64xbf16> to vector<16x64xbf16>
    %c0_3 = arith.constant 0 : index
    %c0_4 = arith.constant 0 : index
    %c0_5 = arith.constant 0 : index
    %3 = vector.load %arg2[%c0_3, %c0_4, %c0_5] : memref<16x64x128xbf16, #tpu.memory_space<vmem>>, vector<1x64x128xbf16>
    %4 = vector.shape_cast %3 : vector<1x64x128xbf16> to vector<64x128xbf16>
    %cst_6 = arith.constant dense<0.000000e+00> : vector<16x128xf32>
    %5 = tpu.matmul %2, %4, %cst_6 {dimension_numbers = #tpu.dot_dimension_numbers<[1], [0], [0], [1], [0, 0, 1, 1], [], []>} : vector<16x64xbf16>, vector<64x128xbf16>, vector<16x128xf32> -> vector<16x128xf32>
    %6 = arith.addf %0, %5 : vector<16x128xf32>
    %c0_7 = arith.constant 0 : index
    %c2 = arith.constant 2 : index
    %c0_8 = arith.constant 0 : index
    %c0_9 = arith.constant 0 : index
    %7 = vector.load %arg1[%c0_7, %c2, %c0_8, %c0_9] : memref<1x8x20x64xbf16, #tpu.memory_space<vmem>>, vector<1x1x16x64xbf16>
    %8 = vector.shape_cast %7 : vector<1x1x16x64xbf16> to vector<16x64xbf16>
    %c1 = arith.constant 1 : index
    %c0_10 = arith.constant 0 : index
    %c0_11 = arith.constant 0 : index
    %9 = vector.load %arg2[%c1, %c0_10, %c0_11] : memref<16x64x128xbf16, #tpu.memory_space<vmem>>, vector<1x64x128xbf16>
    %10 = vector.shape_cast %9 : vector<1x64x128xbf16> to vector<64x128xbf16>
    %cst_12 = arith.constant dense<0.000000e+00> : vector<16x128xf32>
    %11 = tpu.matmul %8, %10, %cst_12 {dimension_numbers = #tpu.dot_dimension_numbers<[1], [0], [0], [1], [0, 0, 1, 1], [], []>} : vector<16x64xbf16>, vector<64x128xbf16>, vector<16x128xf32> -> vector<16x128xf32>
    %12 = arith.addf %6, %11 : vector<16x128xf32>
    %c0_13 = arith.constant 0 : index
    %c1_14 = arith.constant 1 : index
    %c0_15 = arith.constant 0 : index
    %c0_16 = arith.constant 0 : index
    %13 = vector.load %arg1[%c0_13, %c1_14, %c0_15, %c0_16] : memref<1x8x20x64xbf16, #tpu.memory_space<vmem>>, vector<1x1x16x64xbf16>
    %14 = vector.shape_cast %13 : vector<1x1x16x64xbf16> to vector<16x64xbf16>
    %c2_17 = arith.constant 2 : index
    %c0_18 = arith.constant 0 : index
    %c0_19 = arith.constant 0 : index
    %15 = vector.load %arg2[%c2_17, %c0_18, %c0_19] : memref<16x64x128xbf16, #tpu.memory_space<vmem>>, vector<1x64x128xbf16>
    %16 = vector.shape_cast %15 : vector<1x64x128xbf16> to vector<64x128xbf16>
    %cst_20 = arith.constant dense<0.000000e+00> : vector<16x128xf32>
    %17 = tpu.matmul %14, %16, %cst_20 {dimension_numbers = #tpu.dot_dimension_numbers<[1], [0], [0], [1], [0, 0, 1, 1], [], []>} : vector<16x64xbf16>, vector<64x128xbf16>, vector<16x128xf32> -> vector<16x128xf32>
    %18 = arith.addf %12, %17 : vector<16x128xf32>
    %c0_21 = arith.constant 0 : index
    %c3 = arith.constant 3 : index
    %c0_22 = arith.constant 0 : index
    %c0_23 = arith.constant 0 : index
    %19 = vector.load %arg1[%c0_21, %c3, %c0_22, %c0_23] : memref<1x8x20x64xbf16, #tpu.memory_space<vmem>>, vector<1x1x16x64xbf16>
    %20 = vector.shape_cast %19 : vector<1x1x16x64xbf16> to vector<16x64xbf16>
    %c3_24 = arith.constant 3 : index
    %c0_25 = arith.constant 0 : index
    %c0_26 = arith.constant 0 : index
    %21 = vector.load %arg2[%c3_24, %c0_25, %c0_26] : memref<16x64x128xbf16, #tpu.memory_space<vmem>>, vector<1x64x128xbf16>
    %22 = vector.shape_cast %21 : vector<1x64x128xbf16> to vector<64x128xbf16>
    %cst_27 = arith.constant dense<0.000000e+00> : vector<16x128xf32>
    %23 = tpu.matmul %20, %22, %cst_27 {dimension_numbers = #tpu.dot_dimension_numbers<[1], [0], [0], [1], [0, 0, 1, 1], [], []>} : vector<16x64xbf16>, vector<64x128xbf16>, vector<16x128xf32> -> vector<16x128xf32>
    %24 = arith.addf %18, %23 : vector<16x128xf32>
    %c0_28 = arith.constant 0 : index
    %c4 = arith.constant 4 : index
    %c0_29 = arith.constant 0 : index
    %c0_30 = arith.constant 0 : index
    %25 = vector.load %arg1[%c0_28, %c4, %c0_29, %c0_30] : memref<1x8x20x64xbf16, #tpu.memory_space<vmem>>, vector<1x1x16x64xbf16>
    %26 = vector.shape_cast %25 : vector<1x1x16x64xbf16> to vector<16x64xbf16>
    %c4_31 = arith.constant 4 : index
    %c0_32 = arith.constant 0 : index
    %c0_33 = arith.constant 0 : index
    %27 = vector.load %arg2[%c4_31, %c0_32, %c0_33] : memref<16x64x128xbf16, #tpu.memory_space<vmem>>, vector<1x64x128xbf16>
    %28 = vector.shape_cast %27 : vector<1x64x128xbf16> to vector<64x128xbf16>
    %cst_34 = arith.constant dense<0.000000e+00> : vector<16x128xf32>
    %29 = tpu.matmul %26, %28, %cst_34 {dimension_numbers = #tpu.dot_dimension_numbers<[1], [0], [0], [1], [0, 0, 1, 1], [], []>} : vector<16x64xbf16>, vector<64x128xbf16>, vector<16x128xf32> -> vector<16x128xf32>
    %30 = arith.addf %24, %29 : vector<16x128xf32>
    %c0_35 = arith.constant 0 : index
    %c6 = arith.constant 6 : index
    %c0_36 = arith.constant 0 : index
    %c0_37 = arith.constant 0 : index
    %31 = vector.load %arg1[%c0_35, %c6, %c0_36, %c0_37] : memref<1x8x20x64xbf16, #tpu.memory_space<vmem>>, vector<1x1x16x64xbf16>
    %32 = vector.shape_cast %31 : vector<1x1x16x64xbf16> to vector<16x64xbf16>
    %c5 = arith.constant 5 : index
    %c0_38 = arith.constant 0 : index
    %c0_39 = arith.constant 0 : index
    %33 = vector.load %arg2[%c5, %c0_38, %c0_39] : memref<16x64x128xbf16, #tpu.memory_space<vmem>>, vector<1x64x128xbf16>
    %34 = vector.shape_cast %33 : vector<1x64x128xbf16> to vector<64x128xbf16>
    %cst_40 = arith.constant dense<0.000000e+00> : vector<16x128xf32>
    %35 = tpu.matmul %32, %34, %cst_40 {dimension_numbers = #tpu.dot_dimension_numbers<[1], [0], [0], [1], [0, 0, 1, 1], [], []>} : vector<16x64xbf16>, vector<64x128xbf16>, vector<16x128xf32> -> vector<16x128xf32>
    %36 = arith.addf %30, %35 : vector<16x128xf32>
    %c0_41 = arith.constant 0 : index
    %c5_42 = arith.constant 5 : index
    %c0_43 = arith.constant 0 : index
    %c0_44 = arith.constant 0 : index
    %37 = vector.load %arg1[%c0_41, %c5_42, %c0_43, %c0_44] : memref<1x8x20x64xbf16, #tpu.memory_space<vmem>>, vector<1x1x16x64xbf16>
    %38 = vector.shape_cast %37 : vector<1x1x16x64xbf16> to vector<16x64xbf16>
    %c6_45 = arith.constant 6 : index
    %c0_46 = arith.constant 0 : index
    %c0_47 = arith.constant 0 : index
    %39 = vector.load %arg2[%c6_45, %c0_46, %c0_47] : memref<16x64x128xbf16, #tpu.memory_space<vmem>>, vector<1x64x128xbf16>
    %40 = vector.shape_cast %39 : vector<1x64x128xbf16> to vector<64x128xbf16>
    %cst_48 = arith.constant dense<0.000000e+00> : vector<16x128xf32>
    %41 = tpu.matmul %38, %40, %cst_48 {dimension_numbers = #tpu.dot_dimension_numbers<[1], [0], [0], [1], [0, 0, 1, 1], [], []>} : vector<16x64xbf16>, vector<64x128xbf16>, vector<16x128xf32> -> vector<16x128xf32>
    %42 = arith.addf %36, %41 : vector<16x128xf32>
    %c0_49 = arith.constant 0 : index
    %c7 = arith.constant 7 : index
    %c0_50 = arith.constant 0 : index
    %c0_51 = arith.constant 0 : index
    %43 = vector.load %arg1[%c0_49, %c7, %c0_50, %c0_51] : memref<1x8x20x64xbf16, #tpu.memory_space<vmem>>, vector<1x1x16x64xbf16>
    %44 = vector.shape_cast %43 : vector<1x1x16x64xbf16> to vector<16x64xbf16>
    %c7_52 = arith.constant 7 : index
    %c0_53 = arith.constant 0 : index
    %c0_54 = arith.constant 0 : index
    %45 = vector.load %arg2[%c7_52, %c0_53, %c0_54] : memref<16x64x128xbf16, #tpu.memory_space<vmem>>, vector<1x64x128xbf16>
    %46 = vector.shape_cast %45 : vector<1x64x128xbf16> to vector<64x128xbf16>
    %cst_55 = arith.constant dense<0.000000e+00> : vector<16x128xf32>
    %47 = tpu.matmul %44, %46, %cst_55 {dimension_numbers = #tpu.dot_dimension_numbers<[1], [0], [0], [1], [0, 0, 1, 1], [], []>} : vector<16x64xbf16>, vector<64x128xbf16>, vector<16x128xf32> -> vector<16x128xf32>
    %48 = arith.addf %42, %47 : vector<16x128xf32>
    %c0_56 = arith.constant 0 : index
    %c0_57 = arith.constant 0 : index
    %c4_58 = arith.constant 4 : index
    %c0_59 = arith.constant 0 : index
    %49 = vector.load %arg1[%c0_56, %c0_57, %c4_58, %c0_59] : memref<1x8x20x64xbf16, #tpu.memory_space<vmem>>, vector<1x1x16x64xbf16>
    %50 = vector.shape_cast %49 : vector<1x1x16x64xbf16> to vector<16x64xbf16>
    %c8 = arith.constant 8 : index
    %c0_60 = arith.constant 0 : index
    %c0_61 = arith.constant 0 : index
    %51 = vector.load %arg2[%c8, %c0_60, %c0_61] : memref<16x64x128xbf16, #tpu.memory_space<vmem>>, vector<1x64x128xbf16>
    %52 = vector.shape_cast %51 : vector<1x64x128xbf16> to vector<64x128xbf16>
    %cst_62 = arith.constant dense<0.000000e+00> : vector<16x128xf32>
    %53 = tpu.matmul %50, %52, %cst_62 {dimension_numbers = #tpu.dot_dimension_numbers<[1], [0], [0], [1], [0, 0, 1, 1], [], []>} : vector<16x64xbf16>, vector<64x128xbf16>, vector<16x128xf32> -> vector<16x128xf32>
    %54 = arith.addf %48, %53 : vector<16x128xf32>
    %c0_63 = arith.constant 0 : index
    %c2_64 = arith.constant 2 : index
    %c4_65 = arith.constant 4 : index
    %c0_66 = arith.constant 0 : index
    %55 = vector.load %arg1[%c0_63, %c2_64, %c4_65, %c0_66] : memref<1x8x20x64xbf16, #tpu.memory_space<vmem>>, vector<1x1x16x64xbf16>
    %56 = vector.shape_cast %55 : vector<1x1x16x64xbf16> to vector<16x64xbf16>
    %c9 = arith.constant 9 : index
    %c0_67 = arith.constant 0 : index
    %c0_68 = arith.constant 0 : index
    %57 = vector.load %arg2[%c9, %c0_67, %c0_68] : memref<16x64x128xbf16, #tpu.memory_space<vmem>>, vector<1x64x128xbf16>
    %58 = vector.shape_cast %57 : vector<1x64x128xbf16> to vector<64x128xbf16>
    %cst_69 = arith.constant dense<0.000000e+00> : vector<16x128xf32>
    %59 = tpu.matmul %56, %58, %cst_69 {dimension_numbers = #tpu.dot_dimension_numbers<[1], [0], [0], [1], [0, 0, 1, 1], [], []>} : vector<16x64xbf16>, vector<64x128xbf16>, vector<16x128xf32> -> vector<16x128xf32>
    %60 = arith.addf %54, %59 : vector<16x128xf32>
    %c0_70 = arith.constant 0 : index
    %c1_71 = arith.constant 1 : index
    %c4_72 = arith.constant 4 : index
    %c0_73 = arith.constant 0 : index
    %61 = vector.load %arg1[%c0_70, %c1_71, %c4_72, %c0_73] : memref<1x8x20x64xbf16, #tpu.memory_space<vmem>>, vector<1x1x16x64xbf16>
    %62 = vector.shape_cast %61 : vector<1x1x16x64xbf16> to vector<16x64xbf16>
    %c10 = arith.constant 10 : index
    %c0_74 = arith.constant 0 : index
    %c0_75 = arith.constant 0 : index
    %63 = vector.load %arg2[%c10, %c0_74, %c0_75] : memref<16x64x128xbf16, #tpu.memory_space<vmem>>, vector<1x64x128xbf16>
    %64 = vector.shape_cast %63 : vector<1x64x128xbf16> to vector<64x128xbf16>
    %cst_76 = arith.constant dense<0.000000e+00> : vector<16x128xf32>
    %65 = tpu.matmul %62, %64, %cst_76 {dimension_numbers = #tpu.dot_dimension_numbers<[1], [0], [0], [1], [0, 0, 1, 1], [], []>} : vector<16x64xbf16>, vector<64x128xbf16>, vector<16x128xf32> -> vector<16x128xf32>
    %66 = arith.addf %60, %65 : vector<16x128xf32>
    %c0_77 = arith.constant 0 : index
    %c3_78 = arith.constant 3 : index
    %c4_79 = arith.constant 4 : index
    %c0_80 = arith.constant 0 : index
    %67 = vector.load %arg1[%c0_77, %c3_78, %c4_79, %c0_80] : memref<1x8x20x64xbf16, #tpu.memory_space<vmem>>, vector<1x1x16x64xbf16>
    %68 = vector.shape_cast %67 : vector<1x1x16x64xbf16> to vector<16x64xbf16>
    %c11 = arith.constant 11 : index
    %c0_81 = arith.constant 0 : index
    %c0_82 = arith.constant 0 : index
    %69 = vector.load %arg2[%c11, %c0_81, %c0_82] : memref<16x64x128xbf16, #tpu.memory_space<vmem>>, vector<1x64x128xbf16>
    %70 = vector.shape_cast %69 : vector<1x64x128xbf16> to vector<64x128xbf16>
    %cst_83 = arith.constant dense<0.000000e+00> : vector<16x128xf32>
    %71 = tpu.matmul %68, %70, %cst_83 {dimension_numbers = #tpu.dot_dimension_numbers<[1], [0], [0], [1], [0, 0, 1, 1], [], []>} : vector<16x64xbf16>, vector<64x128xbf16>, vector<16x128xf32> -> vector<16x128xf32>
    %72 = arith.addf %66, %71 : vector<16x128xf32>
    %c0_84 = arith.constant 0 : index
    %c4_85 = arith.constant 4 : index
    %c4_86 = arith.constant 4 : index
    %c0_87 = arith.constant 0 : index
    %73 = vector.load %arg1[%c0_84, %c4_85, %c4_86, %c0_87] : memref<1x8x20x64xbf16, #tpu.memory_space<vmem>>, vector<1x1x16x64xbf16>
    %74 = vector.shape_cast %73 : vector<1x1x16x64xbf16> to vector<16x64xbf16>
    %c12 = arith.constant 12 : index
    %c0_88 = arith.constant 0 : index
    %c0_89 = arith.constant 0 : index
    %75 = vector.load %arg2[%c12, %c0_88, %c0_89] : memref<16x64x128xbf16, #tpu.memory_space<vmem>>, vector<1x64x128xbf16>
    %76 = vector.shape_cast %75 : vector<1x64x128xbf16> to vector<64x128xbf16>
    %cst_90 = arith.constant dense<0.000000e+00> : vector<16x128xf32>
    %77 = tpu.matmul %74, %76, %cst_90 {dimension_numbers = #tpu.dot_dimension_numbers<[1], [0], [0], [1], [0, 0, 1, 1], [], []>} : vector<16x64xbf16>, vector<64x128xbf16>, vector<16x128xf32> -> vector<16x128xf32>
    %78 = arith.addf %72, %77 : vector<16x128xf32>
    %c0_91 = arith.constant 0 : index
    %c6_92 = arith.constant 6 : index
    %c4_93 = arith.constant 4 : index
    %c0_94 = arith.constant 0 : index
    %79 = vector.load %arg1[%c0_91, %c6_92, %c4_93, %c0_94] : memref<1x8x20x64xbf16, #tpu.memory_space<vmem>>, vector<1x1x16x64xbf16>
    %80 = vector.shape_cast %79 : vector<1x1x16x64xbf16> to vector<16x64xbf16>
    %c13 = arith.constant 13 : index
    %c0_95 = arith.constant 0 : index
    %c0_96 = arith.constant 0 : index
    %81 = vector.load %arg2[%c13, %c0_95, %c0_96] : memref<16x64x128xbf16, #tpu.memory_space<vmem>>, vector<1x64x128xbf16>
    %82 = vector.shape_cast %81 : vector<1x64x128xbf16> to vector<64x128xbf16>
    %cst_97 = arith.constant dense<0.000000e+00> : vector<16x128xf32>
    %83 = tpu.matmul %80, %82, %cst_97 {dimension_numbers = #tpu.dot_dimension_numbers<[1], [0], [0], [1], [0, 0, 1, 1], [], []>} : vector<16x64xbf16>, vector<64x128xbf16>, vector<16x128xf32> -> vector<16x128xf32>
    %84 = arith.addf %78, %83 : vector<16x128xf32>
    %c0_98 = arith.constant 0 : index
    %c5_99 = arith.constant 5 : index
    %c4_100 = arith.constant 4 : index
    %c0_101 = arith.constant 0 : index
    %85 = vector.load %arg1[%c0_98, %c5_99, %c4_100, %c0_101] : memref<1x8x20x64xbf16, #tpu.memory_space<vmem>>, vector<1x1x16x64xbf16>
    %86 = vector.shape_cast %85 : vector<1x1x16x64xbf16> to vector<16x64xbf16>
    %c14 = arith.constant 14 : index
    %c0_102 = arith.constant 0 : index
    %c0_103 = arith.constant 0 : index
    %87 = vector.load %arg2[%c14, %c0_102, %c0_103] : memref<16x64x128xbf16, #tpu.memory_space<vmem>>, vector<1x64x128xbf16>
    %88 = vector.shape_cast %87 : vector<1x64x128xbf16> to vector<64x128xbf16>
    %cst_104 = arith.constant dense<0.000000e+00> : vector<16x128xf32>
    %89 = tpu.matmul %86, %88, %cst_104 {dimension_numbers = #tpu.dot_dimension_numbers<[1], [0], [0], [1], [0, 0, 1, 1], [], []>} : vector<16x64xbf16>, vector<64x128xbf16>, vector<16x128xf32> -> vector<16x128xf32>
    %90 = arith.addf %84, %89 : vector<16x128xf32>
    %c0_105 = arith.constant 0 : index
    %c7_106 = arith.constant 7 : index
    %c4_107 = arith.constant 4 : index
    %c0_108 = arith.constant 0 : index
    %91 = vector.load %arg1[%c0_105, %c7_106, %c4_107, %c0_108] : memref<1x8x20x64xbf16, #tpu.memory_space<vmem>>, vector<1x1x16x64xbf16>
    %92 = vector.shape_cast %91 : vector<1x1x16x64xbf16> to vector<16x64xbf16>
    %c15 = arith.constant 15 : index
    %c0_109 = arith.constant 0 : index
    %c0_110 = arith.constant 0 : index
    %93 = vector.load %arg2[%c15, %c0_109, %c0_110] : memref<16x64x128xbf16, #tpu.memory_space<vmem>>, vector<1x64x128xbf16>
    %94 = vector.shape_cast %93 : vector<1x64x128xbf16> to vector<64x128xbf16>
    %cst_111 = arith.constant dense<0.000000e+00> : vector<16x128xf32>
    %95 = tpu.matmul %92, %94, %cst_111 {dimension_numbers = #tpu.dot_dimension_numbers<[1], [0], [0], [1], [0, 0, 1, 1], [], []>} : vector<16x64xbf16>, vector<64x128xbf16>, vector<16x128xf32> -> vector<16x128xf32>
    %96 = arith.addf %90, %95 : vector<16x128xf32>
    %c0_112 = arith.constant 0 : index
    %c0_113 = arith.constant 0 : index
    %97 = vector.load %arg3[%c0_112, %c0_113] : memref<1x128xf32, #tpu.memory_space<vmem>>, vector<1x128xf32>
    %98 = vector.broadcast %97 : vector<1x128xf32> to vector<16x128xf32>
    %99 = arith.addf %96, %98 : vector<16x128xf32>
    %cst_114 = arith.constant 0.000000e+00 : f32
    %100 = vector.broadcast %cst_114 : f32 to vector<16x128xf32>
    %101 = arith.cmpf ogt, %99, %100 : vector<16x128xf32>
    %cst_115 = arith.constant 0.00999999977 : f32
    %102 = vector.broadcast %cst_115 : f32 to vector<16x128xf32>
    %103 = arith.mulf %102, %99 : vector<16x128xf32>
    %104 = arith.select %101, %99, %103 : vector<16x128xi1>, vector<16x128xf32>
    %105 = arith.truncf %104 : vector<16x128xf32> to vector<16x128xbf16>
    %c0_116 = arith.constant 0 : index
    %c0_117 = arith.constant 0 : index
    %c0_118 = arith.constant 0 : index
    %106 = vector.load %arg4[%c0_116, %c0_117, %c0_118] : memref<1x16x128xbf16, #tpu.memory_space<vmem>>, vector<1x16x128xbf16>
    %107 = vector.shape_cast %106 : vector<1x16x128xbf16> to vector<16x128xbf16>
    %108 = vector.shape_cast %105 : vector<16x128xbf16> to vector<1x16x128xbf16>
    tpu.vector_store %arg4[%c0_116, %c0_117, %c0_118], %108 {strides = array<i32>} : memref<1x16x128xbf16, #tpu.memory_space<vmem>>, vector<1x16x128xbf16>,
    return
  }
  func.func @transform_0(%arg0: i32) -> (i32, i32, i32, i32) {
    %c0_i32 = arith.constant 0 : i32
    %c0_i32_0 = arith.constant 0 : i32
    %c0_i32_1 = arith.constant 0 : i32
    %c0_i32_2 = arith.constant 0 : i32
    return %arg0, %c0_i32, %c0_i32_0, %c0_i32_1 : i32, i32, i32, i32
  }
  func.func @transform_1(%arg0: i32) -> (i32, i32, i32) {
    %c0_i32 = arith.constant 0 : i32
    %c0_i32_0 = arith.constant 0 : i32
    %c0_i32_1 = arith.constant 0 : i32
    %c0_i32_2 = arith.constant 0 : i32
    return %c0_i32, %c0_i32_0, %c0_i32_1 : i32, i32, i32
  }
  func.func @transform_2(%arg0: i32) -> (i32, i32) {
    %c0_i32 = arith.constant 0 : i32
    %c0_i32_0 = arith.constant 0 : i32
    %c0_i32_1 = arith.constant 0 : i32
    return %c0_i32, %c0_i32_0 : i32, i32
  }
  func.func @transform_3(%arg0: i32) -> (i32, i32, i32) {
    %c0_i32 = arith.constant 0 : i32
    %c0_i32_0 = arith.constant 0 : i32
    %c0_i32_1 = arith.constant 0 : i32
    return %arg0, %c0_i32, %c0_i32_0 : i32, i32, i32
  }
}

module attributes {stable_mosaic.version = 11 : i64} {
  func.func @kernel(%arg0: i32, %arg1: memref<1x8x6x128xbf16, #tpu.memory_space<vmem>>, %arg2: memref<16x128x256xbf16, #tpu.memory_space<vmem>>, %arg3: memref<1x256xf32, #tpu.memory_space<vmem>>, %arg4: memref<1x4x256xbf16, #tpu.memory_space<vmem>>) attributes {dimension_semantics = [#tpu.dimension_semantics<parallel>], iteration_bounds = array<i64: 2>, scalar_prefetch = 0 : i64, scratch_operands = 0 : i64, tpu.core_type = #tpu.core_type<tc>, window_params = [{transform_indices = @transform_0, window_bounds = array<i64: 1, 8, 6, 128>}, {pipeline_mode = #tpu.pipeline_mode<synchronous>, transform_indices = @transform_1, window_bounds = array<i64: 16, 128, 256>}, {pipeline_mode = #tpu.pipeline_mode<synchronous>, transform_indices = @transform_2, window_bounds = array<i64: 1, 256>}, {transform_indices = @transform_3, window_bounds = array<i64: 1, 4, 256>}]} {
    %cst = arith.constant 0.000000e+00 : f32
    %0 = vector.broadcast %cst : f32 to vector<4x256xf32>
    %c0 = arith.constant 0 : index
    %c0_0 = arith.constant 0 : index
    %c0_1 = arith.constant 0 : index
    %c0_2 = arith.constant 0 : index
    %1 = vector.load %arg1[%c0, %c0_0, %c0_1, %c0_2] : memref<1x8x6x128xbf16, #tpu.memory_space<vmem>>, vector<1x1x4x128xbf16>
    %2 = vector.shape_cast %1 : vector<1x1x4x128xbf16> to vector<4x128xbf16>
    %c0_3 = arith.constant 0 : index
    %c0_4 = arith.constant 0 : index
    %c0_5 = arith.constant 0 : index
    %3 = vector.load %arg2[%c0_3, %c0_4, %c0_5] : memref<16x128x256xbf16, #tpu.memory_space<vmem>>, vector<1x128x256xbf16>
    %4 = vector.shape_cast %3 : vector<1x128x256xbf16> to vector<128x256xbf16>
    %cst_6 = arith.constant dense<0.000000e+00> : vector<4x256xf32>
    %5 = tpu.matmul %2, %4, %cst_6 {dimension_numbers = #tpu.dot_dimension_numbers<[1], [0], [0], [1], [0, 0, 1, 1], [], []>} : vector<4x128xbf16>, vector<128x256xbf16>, vector<4x256xf32> -> vector<4x256xf32>
    %6 = arith.addf %0, %5 : vector<4x256xf32>
    %c0_7 = arith.constant 0 : index
    %c2 = arith.constant 2 : index
    %c0_8 = arith.constant 0 : index
    %c0_9 = arith.constant 0 : index
    %7 = vector.load %arg1[%c0_7, %c2, %c0_8, %c0_9] : memref<1x8x6x128xbf16, #tpu.memory_space<vmem>>, vector<1x1x4x128xbf16>
    %8 = vector.shape_cast %7 : vector<1x1x4x128xbf16> to vector<4x128xbf16>
    %c1 = arith.constant 1 : index
    %c0_10 = arith.constant 0 : index
    %c0_11 = arith.constant 0 : index
    %9 = vector.load %arg2[%c1, %c0_10, %c0_11] : memref<16x128x256xbf16, #tpu.memory_space<vmem>>, vector<1x128x256xbf16>
    %10 = vector.shape_cast %9 : vector<1x128x256xbf16> to vector<128x256xbf16>
    %cst_12 = arith.constant dense<0.000000e+00> : vector<4x256xf32>
    %11 = tpu.matmul %8, %10, %cst_12 {dimension_numbers = #tpu.dot_dimension_numbers<[1], [0], [0], [1], [0, 0, 1, 1], [], []>} : vector<4x128xbf16>, vector<128x256xbf16>, vector<4x256xf32> -> vector<4x256xf32>
    %12 = arith.addf %6, %11 : vector<4x256xf32>
    %c0_13 = arith.constant 0 : index
    %c1_14 = arith.constant 1 : index
    %c0_15 = arith.constant 0 : index
    %c0_16 = arith.constant 0 : index
    %13 = vector.load %arg1[%c0_13, %c1_14, %c0_15, %c0_16] : memref<1x8x6x128xbf16, #tpu.memory_space<vmem>>, vector<1x1x4x128xbf16>
    %14 = vector.shape_cast %13 : vector<1x1x4x128xbf16> to vector<4x128xbf16>
    %c2_17 = arith.constant 2 : index
    %c0_18 = arith.constant 0 : index
    %c0_19 = arith.constant 0 : index
    %15 = vector.load %arg2[%c2_17, %c0_18, %c0_19] : memref<16x128x256xbf16, #tpu.memory_space<vmem>>, vector<1x128x256xbf16>
    %16 = vector.shape_cast %15 : vector<1x128x256xbf16> to vector<128x256xbf16>
    %cst_20 = arith.constant dense<0.000000e+00> : vector<4x256xf32>
    %17 = tpu.matmul %14, %16, %cst_20 {dimension_numbers = #tpu.dot_dimension_numbers<[1], [0], [0], [1], [0, 0, 1, 1], [], []>} : vector<4x128xbf16>, vector<128x256xbf16>, vector<4x256xf32> -> vector<4x256xf32>
    %18 = arith.addf %12, %17 : vector<4x256xf32>
    %c0_21 = arith.constant 0 : index
    %c3 = arith.constant 3 : index
    %c0_22 = arith.constant 0 : index
    %c0_23 = arith.constant 0 : index
    %19 = vector.load %arg1[%c0_21, %c3, %c0_22, %c0_23] : memref<1x8x6x128xbf16, #tpu.memory_space<vmem>>, vector<1x1x4x128xbf16>
    %20 = vector.shape_cast %19 : vector<1x1x4x128xbf16> to vector<4x128xbf16>
    %c3_24 = arith.constant 3 : index
    %c0_25 = arith.constant 0 : index
    %c0_26 = arith.constant 0 : index
    %21 = vector.load %arg2[%c3_24, %c0_25, %c0_26] : memref<16x128x256xbf16, #tpu.memory_space<vmem>>, vector<1x128x256xbf16>
    %22 = vector.shape_cast %21 : vector<1x128x256xbf16> to vector<128x256xbf16>
    %cst_27 = arith.constant dense<0.000000e+00> : vector<4x256xf32>
    %23 = tpu.matmul %20, %22, %cst_27 {dimension_numbers = #tpu.dot_dimension_numbers<[1], [0], [0], [1], [0, 0, 1, 1], [], []>} : vector<4x128xbf16>, vector<128x256xbf16>, vector<4x256xf32> -> vector<4x256xf32>
    %24 = arith.addf %18, %23 : vector<4x256xf32>
    %c0_28 = arith.constant 0 : index
    %c4 = arith.constant 4 : index
    %c0_29 = arith.constant 0 : index
    %c0_30 = arith.constant 0 : index
    %25 = vector.load %arg1[%c0_28, %c4, %c0_29, %c0_30] : memref<1x8x6x128xbf16, #tpu.memory_space<vmem>>, vector<1x1x4x128xbf16>
    %26 = vector.shape_cast %25 : vector<1x1x4x128xbf16> to vector<4x128xbf16>
    %c4_31 = arith.constant 4 : index
    %c0_32 = arith.constant 0 : index
    %c0_33 = arith.constant 0 : index
    %27 = vector.load %arg2[%c4_31, %c0_32, %c0_33] : memref<16x128x256xbf16, #tpu.memory_space<vmem>>, vector<1x128x256xbf16>
    %28 = vector.shape_cast %27 : vector<1x128x256xbf16> to vector<128x256xbf16>
    %cst_34 = arith.constant dense<0.000000e+00> : vector<4x256xf32>
    %29 = tpu.matmul %26, %28, %cst_34 {dimension_numbers = #tpu.dot_dimension_numbers<[1], [0], [0], [1], [0, 0, 1, 1], [], []>} : vector<4x128xbf16>, vector<128x256xbf16>, vector<4x256xf32> -> vector<4x256xf32>
    %30 = arith.addf %24, %29 : vector<4x256xf32>
    %c0_35 = arith.constant 0 : index
    %c6 = arith.constant 6 : index
    %c0_36 = arith.constant 0 : index
    %c0_37 = arith.constant 0 : index
    %31 = vector.load %arg1[%c0_35, %c6, %c0_36, %c0_37] : memref<1x8x6x128xbf16, #tpu.memory_space<vmem>>, vector<1x1x4x128xbf16>
    %32 = vector.shape_cast %31 : vector<1x1x4x128xbf16> to vector<4x128xbf16>
    %c5 = arith.constant 5 : index
    %c0_38 = arith.constant 0 : index
    %c0_39 = arith.constant 0 : index
    %33 = vector.load %arg2[%c5, %c0_38, %c0_39] : memref<16x128x256xbf16, #tpu.memory_space<vmem>>, vector<1x128x256xbf16>
    %34 = vector.shape_cast %33 : vector<1x128x256xbf16> to vector<128x256xbf16>
    %cst_40 = arith.constant dense<0.000000e+00> : vector<4x256xf32>
    %35 = tpu.matmul %32, %34, %cst_40 {dimension_numbers = #tpu.dot_dimension_numbers<[1], [0], [0], [1], [0, 0, 1, 1], [], []>} : vector<4x128xbf16>, vector<128x256xbf16>, vector<4x256xf32> -> vector<4x256xf32>
    %36 = arith.addf %30, %35 : vector<4x256xf32>
    %c0_41 = arith.constant 0 : index
    %c5_42 = arith.constant 5 : index
    %c0_43 = arith.constant 0 : index
    %c0_44 = arith.constant 0 : index
    %37 = vector.load %arg1[%c0_41, %c5_42, %c0_43, %c0_44] : memref<1x8x6x128xbf16, #tpu.memory_space<vmem>>, vector<1x1x4x128xbf16>
    %38 = vector.shape_cast %37 : vector<1x1x4x128xbf16> to vector<4x128xbf16>
    %c6_45 = arith.constant 6 : index
    %c0_46 = arith.constant 0 : index
    %c0_47 = arith.constant 0 : index
    %39 = vector.load %arg2[%c6_45, %c0_46, %c0_47] : memref<16x128x256xbf16, #tpu.memory_space<vmem>>, vector<1x128x256xbf16>
    %40 = vector.shape_cast %39 : vector<1x128x256xbf16> to vector<128x256xbf16>
    %cst_48 = arith.constant dense<0.000000e+00> : vector<4x256xf32>
    %41 = tpu.matmul %38, %40, %cst_48 {dimension_numbers = #tpu.dot_dimension_numbers<[1], [0], [0], [1], [0, 0, 1, 1], [], []>} : vector<4x128xbf16>, vector<128x256xbf16>, vector<4x256xf32> -> vector<4x256xf32>
    %42 = arith.addf %36, %41 : vector<4x256xf32>
    %c0_49 = arith.constant 0 : index
    %c7 = arith.constant 7 : index
    %c0_50 = arith.constant 0 : index
    %c0_51 = arith.constant 0 : index
    %43 = vector.load %arg1[%c0_49, %c7, %c0_50, %c0_51] : memref<1x8x6x128xbf16, #tpu.memory_space<vmem>>, vector<1x1x4x128xbf16>
    %44 = vector.shape_cast %43 : vector<1x1x4x128xbf16> to vector<4x128xbf16>
    %c7_52 = arith.constant 7 : index
    %c0_53 = arith.constant 0 : index
    %c0_54 = arith.constant 0 : index
    %45 = vector.load %arg2[%c7_52, %c0_53, %c0_54] : memref<16x128x256xbf16, #tpu.memory_space<vmem>>, vector<1x128x256xbf16>
    %46 = vector.shape_cast %45 : vector<1x128x256xbf16> to vector<128x256xbf16>
    %cst_55 = arith.constant dense<0.000000e+00> : vector<4x256xf32>
    %47 = tpu.matmul %44, %46, %cst_55 {dimension_numbers = #tpu.dot_dimension_numbers<[1], [0], [0], [1], [0, 0, 1, 1], [], []>} : vector<4x128xbf16>, vector<128x256xbf16>, vector<4x256xf32> -> vector<4x256xf32>
    %48 = arith.addf %42, %47 : vector<4x256xf32>
    %c0_56 = arith.constant 0 : index
    %c0_57 = arith.constant 0 : index
    %c2_58 = arith.constant 2 : index
    %c0_59 = arith.constant 0 : index
    %49 = vector.load %arg1[%c0_56, %c0_57, %c2_58, %c0_59] : memref<1x8x6x128xbf16, #tpu.memory_space<vmem>>, vector<1x1x4x128xbf16>
    %50 = vector.shape_cast %49 : vector<1x1x4x128xbf16> to vector<4x128xbf16>
    %c8 = arith.constant 8 : index
    %c0_60 = arith.constant 0 : index
    %c0_61 = arith.constant 0 : index
    %51 = vector.load %arg2[%c8, %c0_60, %c0_61] : memref<16x128x256xbf16, #tpu.memory_space<vmem>>, vector<1x128x256xbf16>
    %52 = vector.shape_cast %51 : vector<1x128x256xbf16> to vector<128x256xbf16>
    %cst_62 = arith.constant dense<0.000000e+00> : vector<4x256xf32>
    %53 = tpu.matmul %50, %52, %cst_62 {dimension_numbers = #tpu.dot_dimension_numbers<[1], [0], [0], [1], [0, 0, 1, 1], [], []>} : vector<4x128xbf16>, vector<128x256xbf16>, vector<4x256xf32> -> vector<4x256xf32>
    %54 = arith.addf %48, %53 : vector<4x256xf32>
    %c0_63 = arith.constant 0 : index
    %c2_64 = arith.constant 2 : index
    %c2_65 = arith.constant 2 : index
    %c0_66 = arith.constant 0 : index
    %55 = vector.load %arg1[%c0_63, %c2_64, %c2_65, %c0_66] : memref<1x8x6x128xbf16, #tpu.memory_space<vmem>>, vector<1x1x4x128xbf16>
    %56 = vector.shape_cast %55 : vector<1x1x4x128xbf16> to vector<4x128xbf16>
    %c9 = arith.constant 9 : index
    %c0_67 = arith.constant 0 : index
    %c0_68 = arith.constant 0 : index
    %57 = vector.load %arg2[%c9, %c0_67, %c0_68] : memref<16x128x256xbf16, #tpu.memory_space<vmem>>, vector<1x128x256xbf16>
    %58 = vector.shape_cast %57 : vector<1x128x256xbf16> to vector<128x256xbf16>
    %cst_69 = arith.constant dense<0.000000e+00> : vector<4x256xf32>
    %59 = tpu.matmul %56, %58, %cst_69 {dimension_numbers = #tpu.dot_dimension_numbers<[1], [0], [0], [1], [0, 0, 1, 1], [], []>} : vector<4x128xbf16>, vector<128x256xbf16>, vector<4x256xf32> -> vector<4x256xf32>
    %60 = arith.addf %54, %59 : vector<4x256xf32>
    %c0_70 = arith.constant 0 : index
    %c1_71 = arith.constant 1 : index
    %c2_72 = arith.constant 2 : index
    %c0_73 = arith.constant 0 : index
    %61 = vector.load %arg1[%c0_70, %c1_71, %c2_72, %c0_73] : memref<1x8x6x128xbf16, #tpu.memory_space<vmem>>, vector<1x1x4x128xbf16>
    %62 = vector.shape_cast %61 : vector<1x1x4x128xbf16> to vector<4x128xbf16>
    %c10 = arith.constant 10 : index
    %c0_74 = arith.constant 0 : index
    %c0_75 = arith.constant 0 : index
    %63 = vector.load %arg2[%c10, %c0_74, %c0_75] : memref<16x128x256xbf16, #tpu.memory_space<vmem>>, vector<1x128x256xbf16>
    %64 = vector.shape_cast %63 : vector<1x128x256xbf16> to vector<128x256xbf16>
    %cst_76 = arith.constant dense<0.000000e+00> : vector<4x256xf32>
    %65 = tpu.matmul %62, %64, %cst_76 {dimension_numbers = #tpu.dot_dimension_numbers<[1], [0], [0], [1], [0, 0, 1, 1], [], []>} : vector<4x128xbf16>, vector<128x256xbf16>, vector<4x256xf32> -> vector<4x256xf32>
    %66 = arith.addf %60, %65 : vector<4x256xf32>
    %c0_77 = arith.constant 0 : index
    %c3_78 = arith.constant 3 : index
    %c2_79 = arith.constant 2 : index
    %c0_80 = arith.constant 0 : index
    %67 = vector.load %arg1[%c0_77, %c3_78, %c2_79, %c0_80] : memref<1x8x6x128xbf16, #tpu.memory_space<vmem>>, vector<1x1x4x128xbf16>
    %68 = vector.shape_cast %67 : vector<1x1x4x128xbf16> to vector<4x128xbf16>
    %c11 = arith.constant 11 : index
    %c0_81 = arith.constant 0 : index
    %c0_82 = arith.constant 0 : index
    %69 = vector.load %arg2[%c11, %c0_81, %c0_82] : memref<16x128x256xbf16, #tpu.memory_space<vmem>>, vector<1x128x256xbf16>
    %70 = vector.shape_cast %69 : vector<1x128x256xbf16> to vector<128x256xbf16>
    %cst_83 = arith.constant dense<0.000000e+00> : vector<4x256xf32>
    %71 = tpu.matmul %68, %70, %cst_83 {dimension_numbers = #tpu.dot_dimension_numbers<[1], [0], [0], [1], [0, 0, 1, 1], [], []>} : vector<4x128xbf16>, vector<128x256xbf16>, vector<4x256xf32> -> vector<4x256xf32>
    %72 = arith.addf %66, %71 : vector<4x256xf32>
    %c0_84 = arith.constant 0 : index
    %c4_85 = arith.constant 4 : index
    %c2_86 = arith.constant 2 : index
    %c0_87 = arith.constant 0 : index
    %73 = vector.load %arg1[%c0_84, %c4_85, %c2_86, %c0_87] : memref<1x8x6x128xbf16, #tpu.memory_space<vmem>>, vector<1x1x4x128xbf16>
    %74 = vector.shape_cast %73 : vector<1x1x4x128xbf16> to vector<4x128xbf16>
    %c12 = arith.constant 12 : index
    %c0_88 = arith.constant 0 : index
    %c0_89 = arith.constant 0 : index
    %75 = vector.load %arg2[%c12, %c0_88, %c0_89] : memref<16x128x256xbf16, #tpu.memory_space<vmem>>, vector<1x128x256xbf16>
    %76 = vector.shape_cast %75 : vector<1x128x256xbf16> to vector<128x256xbf16>
    %cst_90 = arith.constant dense<0.000000e+00> : vector<4x256xf32>
    %77 = tpu.matmul %74, %76, %cst_90 {dimension_numbers = #tpu.dot_dimension_numbers<[1], [0], [0], [1], [0, 0, 1, 1], [], []>} : vector<4x128xbf16>, vector<128x256xbf16>, vector<4x256xf32> -> vector<4x256xf32>
    %78 = arith.addf %72, %77 : vector<4x256xf32>
    %c0_91 = arith.constant 0 : index
    %c6_92 = arith.constant 6 : index
    %c2_93 = arith.constant 2 : index
    %c0_94 = arith.constant 0 : index
    %79 = vector.load %arg1[%c0_91, %c6_92, %c2_93, %c0_94] : memref<1x8x6x128xbf16, #tpu.memory_space<vmem>>, vector<1x1x4x128xbf16>
    %80 = vector.shape_cast %79 : vector<1x1x4x128xbf16> to vector<4x128xbf16>
    %c13 = arith.constant 13 : index
    %c0_95 = arith.constant 0 : index
    %c0_96 = arith.constant 0 : index
    %81 = vector.load %arg2[%c13, %c0_95, %c0_96] : memref<16x128x256xbf16, #tpu.memory_space<vmem>>, vector<1x128x256xbf16>
    %82 = vector.shape_cast %81 : vector<1x128x256xbf16> to vector<128x256xbf16>
    %cst_97 = arith.constant dense<0.000000e+00> : vector<4x256xf32>
    %83 = tpu.matmul %80, %82, %cst_97 {dimension_numbers = #tpu.dot_dimension_numbers<[1], [0], [0], [1], [0, 0, 1, 1], [], []>} : vector<4x128xbf16>, vector<128x256xbf16>, vector<4x256xf32> -> vector<4x256xf32>
    %84 = arith.addf %78, %83 : vector<4x256xf32>
    %c0_98 = arith.constant 0 : index
    %c5_99 = arith.constant 5 : index
    %c2_100 = arith.constant 2 : index
    %c0_101 = arith.constant 0 : index
    %85 = vector.load %arg1[%c0_98, %c5_99, %c2_100, %c0_101] : memref<1x8x6x128xbf16, #tpu.memory_space<vmem>>, vector<1x1x4x128xbf16>
    %86 = vector.shape_cast %85 : vector<1x1x4x128xbf16> to vector<4x128xbf16>
    %c14 = arith.constant 14 : index
    %c0_102 = arith.constant 0 : index
    %c0_103 = arith.constant 0 : index
    %87 = vector.load %arg2[%c14, %c0_102, %c0_103] : memref<16x128x256xbf16, #tpu.memory_space<vmem>>, vector<1x128x256xbf16>
    %88 = vector.shape_cast %87 : vector<1x128x256xbf16> to vector<128x256xbf16>
    %cst_104 = arith.constant dense<0.000000e+00> : vector<4x256xf32>
    %89 = tpu.matmul %86, %88, %cst_104 {dimension_numbers = #tpu.dot_dimension_numbers<[1], [0], [0], [1], [0, 0, 1, 1], [], []>} : vector<4x128xbf16>, vector<128x256xbf16>, vector<4x256xf32> -> vector<4x256xf32>
    %90 = arith.addf %84, %89 : vector<4x256xf32>
    %c0_105 = arith.constant 0 : index
    %c7_106 = arith.constant 7 : index
    %c2_107 = arith.constant 2 : index
    %c0_108 = arith.constant 0 : index
    %91 = vector.load %arg1[%c0_105, %c7_106, %c2_107, %c0_108] : memref<1x8x6x128xbf16, #tpu.memory_space<vmem>>, vector<1x1x4x128xbf16>
    %92 = vector.shape_cast %91 : vector<1x1x4x128xbf16> to vector<4x128xbf16>
    %c15 = arith.constant 15 : index
    %c0_109 = arith.constant 0 : index
    %c0_110 = arith.constant 0 : index
    %93 = vector.load %arg2[%c15, %c0_109, %c0_110] : memref<16x128x256xbf16, #tpu.memory_space<vmem>>, vector<1x128x256xbf16>
    %94 = vector.shape_cast %93 : vector<1x128x256xbf16> to vector<128x256xbf16>
    %cst_111 = arith.constant dense<0.000000e+00> : vector<4x256xf32>
    %95 = tpu.matmul %92, %94, %cst_111 {dimension_numbers = #tpu.dot_dimension_numbers<[1], [0], [0], [1], [0, 0, 1, 1], [], []>} : vector<4x128xbf16>, vector<128x256xbf16>, vector<4x256xf32> -> vector<4x256xf32>
    %96 = arith.addf %90, %95 : vector<4x256xf32>
    %c0_112 = arith.constant 0 : index
    %c0_113 = arith.constant 0 : index
    %97 = vector.load %arg3[%c0_112, %c0_113] : memref<1x256xf32, #tpu.memory_space<vmem>>, vector<1x256xf32>
    %98 = vector.broadcast %97 : vector<1x256xf32> to vector<4x256xf32>
    %99 = arith.addf %96, %98 : vector<4x256xf32>
    %cst_114 = arith.constant 0.000000e+00 : f32
    %100 = vector.broadcast %cst_114 : f32 to vector<4x256xf32>
    %101 = arith.cmpf ogt, %99, %100 : vector<4x256xf32>
    %cst_115 = arith.constant 0.00999999977 : f32
    %102 = vector.broadcast %cst_115 : f32 to vector<4x256xf32>
    %103 = arith.mulf %102, %99 : vector<4x256xf32>
    %104 = arith.select %101, %99, %103 : vector<4x256xi1>, vector<4x256xf32>
    %105 = arith.truncf %104 : vector<4x256xf32> to vector<4x256xbf16>
    %c0_116 = arith.constant 0 : index
    %c0_117 = arith.constant 0 : index
    %c0_118 = arith.constant 0 : index
    %106 = vector.load %arg4[%c0_116, %c0_117, %c0_118] : memref<1x4x256xbf16, #tpu.memory_space<vmem>>, vector<1x4x256xbf16>
    %107 = vector.shape_cast %106 : vector<1x4x256xbf16> to vector<4x256xbf16>
    %108 = vector.shape_cast %105 : vector<4x256xbf16> to vector<1x4x256xbf16>
    tpu.vector_store %arg4[%c0_116, %c0_117, %c0_118], %108 {strides = array<i32>} : memref<1x4x256xbf16, #tpu.memory_space<vmem>>, vector<1x4x256xbf16>,
    return
  }
  func.func @transform_0(%arg0: i32) -> (i32, i32, i32, i32) {
    %c0_i32 = arith.constant 0 : i32
    %c0_i32_0 = arith.constant 0 : i32
    %c0_i32_1 = arith.constant 0 : i32
    %c0_i32_2 = arith.constant 0 : i32
    return %arg0, %c0_i32, %c0_i32_0, %c0_i32_1 : i32, i32, i32, i32
  }
  func.func @transform_1(%arg0: i32) -> (i32, i32, i32) {
    %c0_i32 = arith.constant 0 : i32
    %c0_i32_0 = arith.constant 0 : i32
    %c0_i32_1 = arith.constant 0 : i32
    %c0_i32_2 = arith.constant 0 : i32
    return %c0_i32, %c0_i32_0, %c0_i32_1 : i32, i32, i32
  }
  func.func @transform_2(%arg0: i32) -> (i32, i32) {
    %c0_i32 = arith.constant 0 : i32
    %c0_i32_0 = arith.constant 0 : i32
    %c0_i32_1 = arith.constant 0 : i32
    return %c0_i32, %c0_i32_0 : i32, i32
  }
  func.func @transform_3(%arg0: i32) -> (i32, i32, i32) {
    %c0_i32 = arith.constant 0 : i32
    %c0_i32_0 = arith.constant 0 : i32
    %c0_i32_1 = arith.constant 0 : i32
    return %arg0, %c0_i32, %c0_i32_0 : i32, i32, i32
  }
}

module attributes {stable_mosaic.version = 11 : i64} {
  func.func @_head_kernel(%arg0: i32, %arg1: memref<2x1024xbf16, #tpu.memory_space<vmem>>, %arg2: memref<1024x256xbf16, #tpu.memory_space<vmem>>, %arg3: memref<1x256xf32, #tpu.memory_space<vmem>>, %arg4: memref<256x256xbf16, #tpu.memory_space<vmem>>, %arg5: memref<1x256xf32, #tpu.memory_space<vmem>>, %arg6: memref<256x32xbf16, #tpu.memory_space<vmem>>, %arg7: memref<1x32xf32, #tpu.memory_space<vmem>>, %arg8: memref<2x32xf32, #tpu.memory_space<vmem>>, %arg9: memref<2x256xf32, #tpu.memory_space<vmem>>) attributes {dimension_semantics = [#tpu.dimension_semantics<arbitrary>], iteration_bounds = array<i64: 1>, scalar_prefetch = 0 : i64, scratch_operands = 1 : i64, tpu.core_type = #tpu.core_type<tc>, window_params = [{transform_indices = @transform_0, window_bounds = array<i64: 2, 1024>}, {transform_indices = @transform_1, window_bounds = array<i64: 1024, 256>}, {pipeline_mode = #tpu.pipeline_mode<synchronous>, transform_indices = @transform_2, window_bounds = array<i64: 1, 256>}, {pipeline_mode = #tpu.pipeline_mode<synchronous>, transform_indices = @transform_3, window_bounds = array<i64: 256, 256>}, {pipeline_mode = #tpu.pipeline_mode<synchronous>, transform_indices = @transform_4, window_bounds = array<i64: 1, 256>}, {pipeline_mode = #tpu.pipeline_mode<synchronous>, transform_indices = @transform_5, window_bounds = array<i64: 256, 32>}, {pipeline_mode = #tpu.pipeline_mode<synchronous>, transform_indices = @transform_6, window_bounds = array<i64: 1, 32>}, {pipeline_mode = #tpu.pipeline_mode<synchronous>, transform_indices = @transform_7, window_bounds = array<i64: 2, 32>}]} {
    %c0_i32 = arith.constant 0 : i32
    %0 = arith.cmpi eq, %arg0, %c0_i32 : i32
    %1 = arith.extui %0 : i1 to i32
    %c0_i32_0 = arith.constant 0 : i32
    %2 = arith.cmpi ne, %1, %c0_i32_0 : i32
    scf.if %2 {
      %cst_10 = arith.constant 0.000000e+00 : f32
      %12 = vector.broadcast %cst_10 : f32 to vector<2x256xf32>
      %c0_11 = arith.constant 0 : index
      %c0_12 = arith.constant 0 : index
      %13 = vector.load %arg9[%c0_11, %c0_12] : memref<2x256xf32, #tpu.memory_space<vmem>>, vector<2x256xf32>
      tpu.vector_store %arg9[%c0_11, %c0_12], %12 {strides = array<i32>} : memref<2x256xf32, #tpu.memory_space<vmem>>, vector<2x256xf32>,
    } else {
    }
    %c0 = arith.constant 0 : index
    %c0_1 = arith.constant 0 : index
    %3 = vector.load %arg9[%c0, %c0_1] : memref<2x256xf32, #tpu.memory_space<vmem>>, vector<2x256xf32>
    %c0_2 = arith.constant 0 : index
    %c0_3 = arith.constant 0 : index
    %4 = vector.load %arg1[%c0_2, %c0_3] : memref<2x1024xbf16, #tpu.memory_space<vmem>>, vector<2x1024xbf16>
    %c0_4 = arith.constant 0 : index
    %c0_5 = arith.constant 0 : index
    %5 = vector.load %arg2[%c0_4, %c0_5] : memref<1024x256xbf16, #tpu.memory_space<vmem>>, vector<1024x256xbf16>
    %cst = arith.constant dense<0.000000e+00> : vector<2x256xf32>
    %6 = tpu.matmul %4, %5, %cst {dimension_numbers = #tpu.dot_dimension_numbers<[1], [0], [0], [1], [0, 0, 1, 1], [], []>} : vector<2x1024xbf16>, vector<1024x256xbf16>, vector<2x256xf32> -> vector<2x256xf32>
    %7 = arith.addf %3, %6 : vector<2x256xf32>
    %c0_6 = arith.constant 0 : index
    %c0_7 = arith.constant 0 : index
    %8 = vector.load %arg9[%c0_6, %c0_7] : memref<2x256xf32, #tpu.memory_space<vmem>>, vector<2x256xf32>
    tpu.vector_store %arg9[%c0_6, %c0_7], %7 {strides = array<i32>} : memref<2x256xf32, #tpu.memory_space<vmem>>, vector<2x256xf32>,
    %c0_i32_8 = arith.constant 0 : i32
    %9 = arith.cmpi eq, %arg0, %c0_i32_8 : i32
    %10 = arith.extui %9 : i1 to i32
    %c0_i32_9 = arith.constant 0 : i32
    %11 = arith.cmpi ne, %10, %c0_i32_9 : i32
    scf.if %11 {
      %c0_10 = arith.constant 0 : index
      %c0_11 = arith.constant 0 : index
      %12 = vector.load %arg9[%c0_10, %c0_11] : memref<2x256xf32, #tpu.memory_space<vmem>>, vector<2x256xf32>
      %c0_12 = arith.constant 0 : index
      %c0_13 = arith.constant 0 : index
      %13 = vector.load %arg3[%c0_12, %c0_13] : memref<1x256xf32, #tpu.memory_space<vmem>>, vector<1x256xf32>
      %14 = vector.broadcast %13 : vector<1x256xf32> to vector<2x256xf32>
      %15 = arith.addf %12, %14 : vector<2x256xf32>
      %cst_14 = arith.constant 0.000000e+00 : f32
      %16 = vector.broadcast %cst_14 : f32 to vector<2x256xf32>
      %17 = arith.cmpf ogt, %15, %16 : vector<2x256xf32>
      %cst_15 = arith.constant 0.00999999977 : f32
      %18 = vector.broadcast %cst_15 : f32 to vector<2x256xf32>
      %19 = arith.mulf %18, %15 : vector<2x256xf32>
      %20 = arith.select %17, %15, %19 : vector<2x256xi1>, vector<2x256xf32>
      %21 = arith.truncf %20 : vector<2x256xf32> to vector<2x256xbf16>
      %c0_16 = arith.constant 0 : index
      %c0_17 = arith.constant 0 : index
      %22 = vector.load %arg4[%c0_16, %c0_17] : memref<256x256xbf16, #tpu.memory_space<vmem>>, vector<256x256xbf16>
      %cst_18 = arith.constant dense<0.000000e+00> : vector<2x256xf32>
      %23 = tpu.matmul %21, %22, %cst_18 {dimension_numbers = #tpu.dot_dimension_numbers<[1], [0], [0], [1], [0, 0, 1, 1], [], []>} : vector<2x256xbf16>, vector<256x256xbf16>, vector<2x256xf32> -> vector<2x256xf32>
      %c0_19 = arith.constant 0 : index
      %c0_20 = arith.constant 0 : index
      %24 = vector.load %arg5[%c0_19, %c0_20] : memref<1x256xf32, #tpu.memory_space<vmem>>, vector<1x256xf32>
      %25 = vector.broadcast %24 : vector<1x256xf32> to vector<2x256xf32>
      %26 = arith.addf %23, %25 : vector<2x256xf32>
      %cst_21 = arith.constant 0.000000e+00 : f32
      %27 = vector.broadcast %cst_21 : f32 to vector<2x256xf32>
      %28 = arith.cmpf ogt, %26, %27 : vector<2x256xf32>
      %cst_22 = arith.constant 0.00999999977 : f32
      %29 = vector.broadcast %cst_22 : f32 to vector<2x256xf32>
      %30 = arith.mulf %29, %26 : vector<2x256xf32>
      %31 = arith.select %28, %26, %30 : vector<2x256xi1>, vector<2x256xf32>
      %32 = arith.truncf %31 : vector<2x256xf32> to vector<2x256xbf16>
      %c0_23 = arith.constant 0 : index
      %c0_24 = arith.constant 0 : index
      %33 = vector.load %arg6[%c0_23, %c0_24] : memref<256x32xbf16, #tpu.memory_space<vmem>>, vector<256x32xbf16>
      %cst_25 = arith.constant dense<0.000000e+00> : vector<2x32xf32>
      %34 = tpu.matmul %32, %33, %cst_25 {dimension_numbers = #tpu.dot_dimension_numbers<[1], [0], [0], [1], [0, 0, 1, 1], [], []>} : vector<2x256xbf16>, vector<256x32xbf16>, vector<2x32xf32> -> vector<2x32xf32>
      %c0_26 = arith.constant 0 : index
      %c0_27 = arith.constant 0 : index
      %35 = vector.load %arg7[%c0_26, %c0_27] : memref<1x32xf32, #tpu.memory_space<vmem>>, vector<1x32xf32>
      %36 = vector.broadcast %35 : vector<1x32xf32> to vector<2x32xf32>
      %37 = arith.addf %34, %36 : vector<2x32xf32>
      %c0_28 = arith.constant 0 : index
      %c0_29 = arith.constant 0 : index
      %38 = vector.load %arg8[%c0_28, %c0_29] : memref<2x32xf32, #tpu.memory_space<vmem>>, vector<2x32xf32>
      tpu.vector_store %arg8[%c0_28, %c0_29], %37 {strides = array<i32>} : memref<2x32xf32, #tpu.memory_space<vmem>>, vector<2x32xf32>,
    } else {
    }
    return
  }
  func.func @transform_0(%arg0: i32) -> (i32, i32) {
    %c0_i32 = arith.constant 0 : i32
    %c0_i32_0 = arith.constant 0 : i32
    return %c0_i32, %arg0 : i32, i32
  }
  func.func @transform_1(%arg0: i32) -> (i32, i32) {
    %c0_i32 = arith.constant 0 : i32
    %c0_i32_0 = arith.constant 0 : i32
    return %arg0, %c0_i32 : i32, i32
  }
  func.func @transform_2(%arg0: i32) -> (i32, i32) {
    %c0_i32 = arith.constant 0 : i32
    %c0_i32_0 = arith.constant 0 : i32
    %c0_i32_1 = arith.constant 0 : i32
    return %c0_i32, %c0_i32_0 : i32, i32
  }
  func.func @transform_3(%arg0: i32) -> (i32, i32) {
    %c0_i32 = arith.constant 0 : i32
    %c0_i32_0 = arith.constant 0 : i32
    %c0_i32_1 = arith.constant 0 : i32
    return %c0_i32, %c0_i32_0 : i32, i32
  }
  func.func @transform_4(%arg0: i32) -> (i32, i32) {
    %c0_i32 = arith.constant 0 : i32
    %c0_i32_0 = arith.constant 0 : i32
    %c0_i32_1 = arith.constant 0 : i32
    return %c0_i32, %c0_i32_0 : i32, i32
  }
  func.func @transform_5(%arg0: i32) -> (i32, i32) {
    %c0_i32 = arith.constant 0 : i32
    %c0_i32_0 = arith.constant 0 : i32
    %c0_i32_1 = arith.constant 0 : i32
    return %c0_i32, %c0_i32_0 : i32, i32
  }
  func.func @transform_6(%arg0: i32) -> (i32, i32) {
    %c0_i32 = arith.constant 0 : i32
    %c0_i32_0 = arith.constant 0 : i32
    %c0_i32_1 = arith.constant 0 : i32
    return %c0_i32, %c0_i32_0 : i32, i32
  }
  func.func @transform_7(%arg0: i32) -> (i32, i32) {
    %c0_i32 = arith.constant 0 : i32
    %c0_i32_0 = arith.constant 0 : i32
    %c0_i32_1 = arith.constant 0 : i32
    return %c0_i32, %c0_i32_0 : i32, i32
  }
}

</mosaic_0001>

<bundles_post_ra>
// kernel: bc_image_only_forward.4
= control target key start
LH: loop header
LB: loop body
LE: loop exit
PB: predicated region body
PF: predicated region fallthrough
CT: control target
= control target key end

     0   :  { %s2936_s12 = smov 0   ;;  %s3174_s0 = inlined_call_operand.vmem [shape: bf16[2,8,72,3], index: 0, kind: input, shape index: {}]   ;;  %s3175_s1 = inlined_call_operand.vmem [shape: bf16[16,3,64], index: 1, kind: input, shape index: {}]   ;;  %s3176_s2 = inlined_call_operand.vmem [shape: f32[1,64], index: 2, kind: input, shape index: {}]   ;;  %s3177_s3 = inlined_call_operand.vmem [shape: bf16[2,64,64], index: 3, kind: output, shape index: {}]  }
   0x1 LB: > { %s2190_s13 = sadd.s32 4294967295, %s2913_s12   ;;  %p2194_p0 = scmp.ge.s32.totalorder %s2913_s12, 1  ;;  %s2913_s12 = sphi %s2936_s12, %s13_s12  }
   0x2   : > { %p137_p1 = scmp.lt.s32.totalorder %s2913_s12, 3 }
   0x4   : > { %p138_p2 = pnand %p2194_p0, %p137_p1 }
   0x5   : > { %v2206_v0 = vld [vmem:[%s3175_s1 + $0x2] sm:$0x3] (!%p138_p2)  ;;  %vm225_vm0 = vcmask (!%p138_p2), 1040384   ;;  %vm226_vm1 = vcmask (!%p138_p2), 1041408   ;;  %p161_p3 = scmp.lt.s32.totalorder (!%p138_p2), %s2190_s13, 1  ;;  %v2915_v1 = vmov (!%p138_p2), 65535  }
   0x6   : > { %141 = sbr.rel (%p138_p2) target bundleno = 365 (0x16d), region = 32  ;;  %v227_v2 = vsel (!%p138_p2), %vm225_vm0, 4294967295, %v2915_v1  ;;  %v2325_v3 = vld [vmem:[%s3175_s1 + $0x10] sm:$0x3] (!%p138_p2)  ;;  %v180_v4 = vld [vmem:[%s3175_s1] sm:$0x3] (!%p138_p2) }
   0x7   : > { %v2953_v5 = vsel (!%p138_p2), %vm226_vm1, %v227_v2, 0  ;;  %v2342_v6 = vld [vmem:[%s3175_s1 + $0x12] sm:$0x3] (!%p138_p2)  ;;  %vm212_vm2 = vcmask (!%p138_p2), 23552   ;;  %v2231_v11 = vld [vmem:[%s3175_s1 + $0x4] sm:$0x3] (!%p138_p2) }
   0x8   : > { %v230_v7 = vand.u32 (!%p138_p2), %v2206_v0, %v2953_v5  ;;  %v1154_v8 = vand.u32 (!%p138_p2), %v2325_v3, %v2953_v5  ;;  %v330_v9 = vand.u32 (!%p138_p2), %v2953_v5, %v180_v4  ;;  %v1272_v10 = vand.u32 (!%p138_p2), %v2342_v6, %v2953_v5  ;;  %v2359_v12 = vld [vmem:[%s3175_s1 + $0x14] sm:$0x3] (!%p138_p2)  ;;  %v2248_v25 = vld [vmem:[%s3175_s1 + $0x6] sm:$0x3] (!%p138_p2)  ;;  %v2376_v26 = vld [vmem:[%s3175_s1 + $0x16] sm:$0x3] (!%p138_p2) }
   0x9   : > { %v441_v17 = vand.u32 (!%p138_p2), %v2231_v11, %v2953_v5  ;;  %v1390_v19 = vand.u32 (!%p138_p2), %v2359_v12, %v2953_v5  ;;  %v560_v31 = vand.u32 (!%p138_p2), %v2248_v25, %v2953_v5  ;;  %v1508_v32 = vand.u32 (!%p138_p2), %v2376_v26, %v2953_v5  ;;  %v2265_v37 = vld [vmem:[%s3175_s1 + $0x8] sm:$0x3] (!%p138_p2)  ;;  %v2393_v38 = vld [vmem:[%s3175_s1 + $0x18] sm:$0x3] (!%p138_p2)  ;;  %v2282_v49 = vld [vmem:[%s3175_s1 + $0xa] sm:$0x3] (!%p138_p2) }
   0xa   : > { %2553 = vmatprep.subr.bf16.mxu1 (!%p138_p2), %v230_v7  ;;  %2633 = vmatprep.subr.bf16.mxu0 (!%p138_p2), %v1154_v8  ;;  %v679_v43 = vand.u32 (!%p138_p2), %v2265_v37, %v2953_v5  ;;  %v1626_v44 = vand.u32 (!%p138_p2), %v2393_v38, %v2953_v5  ;;  %v2410_v50 = vld [vmem:[%s3175_s1 + $0x1a] sm:$0x3] (!%p138_p2)  ;;  %v798_v55 = vand.u32 (!%p138_p2), %v2282_v49, %v2953_v5  ;;  %v2299_v62 = vld [vmem:[%s3175_s1 + $0xc] sm:$0x3] (!%p138_p2)  ;;  %v2427_v0 = vld [vmem:[%s3175_s1 + $0x1c] sm:$0x3] (!%p138_p2) }
   0xb   : > { %2554 = vmatpush3.bf16.msra.mxu1 (!%p138_p2), %v230_v7  ;;  %2634 = vmatpush3.bf16.msra.mxu0 (!%p138_p2), %v1154_v8  ;;  %v1744_v56 = vand.u32 (!%p138_p2), %v2410_v50, %v2953_v5  ;;  %v917_v3 = vand.u32 (!%p138_p2), %v2299_v62, %v2953_v5  ;;  %v1862_v4 = vand.u32 (!%p138_p2), %v2427_v0, %v2953_v5  ;;  %v2316_v11 = vld [vmem:[%s3175_s1 + $0xe] sm:$0x3] (!%p138_p2)  ;;  %v2453_v37 = vld [vmem:[%s3176_s2] ss:$0 sm:$0xff] (!%p138_p2)  ;;  %vm2126_vm5 = vcmask (!%p138_p2), 519168  }
   0xc   : > { %2563 = vmatprep.subr.bf16.mxu1 (!%p138_p2), %v330_v9  ;;  %2643 = vmatprep.subr.bf16.mxu0 (!%p138_p2), %v1272_v10 }
   0xd   : > { %s3179_s13 = smov (!%p161_p3, %s2190_s13), 1 }
   0xe   : > { %s2833_s22 = smul.u32 288, %s3179_s13 }
  0x10   : > { %s2968_s25 = scalar_lea.vmem %s3174_s0, %s2833_s22 }
  0x11   : > { %v2843_v13 = vld [vmem:[%s2968_s25 + $0x48] sm:$0xff]   ;;  %v2845_v15 = vld [vmem:[%s2968_s25 + $0x50] sm:$0xff]   ;;  %v2847_v18 = vld [vmem:[%s2968_s25 + $0x58] sm:$0xff]  }
  0x12   : > { %v2844_v14 = vld [vmem:[%s2968_s25 + $0x4] sm:$0xff]   ;;  %2555 = vmatprep.mubr.msk.bf16.mxu1 %vm212_vm2, %v2843_v13  ;;  %v2846_v16 = vld [vmem:[%s2968_s25 + $0xc] sm:$0xff]   ;;  %v2848_v20 = vld [vmem:[%s2968_s25 + $0x14] sm:$0xff]  }
  0x13   : > { %2635 = vmatprep.mubr.msk.bf16.mxu0 %vm212_vm2, %v2844_v14  ;;  %2556 = vmatmul.mubr.msk.bf16.vlgmr.msra.gmra.mrb[0].mxu1 %vm212_vm2, %v2845_v15  ;;  %v2849_v21 = vld [vmem:[%s2968_s25 + $0x60] sm:$0xff]   ;;  %v2852_v24 = vld [vmem:[%s2968_s25 + $0x4c] sm:$0xff]   ;;  %v2854_v28 = vld [vmem:[%s2968_s25 + $0x54] sm:$0xff]  }
  0x14   : > { %2564 = vmatpush3.bf16.msra.mxu1 %v330_v9  ;;  %2636 = vmatmul.mubr.msk.bf16.vlgmr.msra.gmra.mrb[0].mxu0 %vm212_vm2, %v2846_v16  ;;  %v2850_v22 = vld [vmem:[%s2968_s25 + $0x1c] sm:$0xff]   ;;  %v2853_v27 = vld [vmem:[%s2968_s25 + $0x8] sm:$0xff]   ;;  %v2855_v29 = vld [vmem:[%s2968_s25 + $0x10] sm:$0xff]   ;;  %v1036_v16 = vand.u32 %v2316_v11, %v2953_v5 }
  0x15   : > { %2644 = vmatpush3.bf16.msra.mxu0 %v1272_v10  ;;  %2559 = vmatprep.mubr.msk.bf16.mxu1 %vm212_vm2, %v2847_v18  ;;  %v2851_v23 = vld [vmem:[%s2968_s25] sm:$0xff]   ;;  %v2857_v33 = vld [vmem:[%s2968_s25 + $0x18] sm:$0xff]   ;;  %v2860_v36 = vld [vmem:[%s2968_s25 + $0x28] sm:$0xff]  }
  0x16   : > { %2639 = vmatprep.mubr.msk.bf16.mxu0 %vm212_vm2, %v2848_v20  ;;  %2573 = vmatprep.subr.bf16.mxu1 %v441_v17  ;;  %v2856_v30 = vld [vmem:[%s2968_s25 + $0x5c] sm:$0xff]   ;;  %v2858_v34 = vld [vmem:[%s2968_s25 + $0x64] sm:$0xff]   ;;  %v2861_v39 = vld [vmem:[%s2968_s25 + $0x2c] sm:$0xff]  }
  0x17   : > { %2653 = vmatprep.subr.bf16.mxu0 %v1390_v19  ;;  %v2859_v35 = vld [vmem:[%s2968_s25 + $0x24] sm:$0xff]   ;;  %v2862_v40 = vld [vmem:[%s2968_s25 + $0x30] sm:$0xff]   ;;  %v2864_v42 = vld [vmem:[%s2968_s25 + $0x38] sm:$0xff]  }
  0x18   : > { %v2863_v41 = vld [vmem:[%s2968_s25 + $0x34] sm:$0xff]   ;;  %v2865_v45 = vld [vmem:[%s2968_s25 + $0x3c] sm:$0xff]   ;;  %v2867_v47 = vld [vmem:[%s2968_s25 + $0x6c] sm:$0xff]  }
  0x19   : > { %v2866_v46 = vld [vmem:[%s2968_s25 + $0x40] sm:$0xff]   ;;  %v2868_v48 = vld [vmem:[%s2968_s25 + $0x70] sm:$0xff]   ;;  %v2870_v52 = vld [vmem:[%s2968_s25 + $0x78] sm:$0xff]  }
  0x1a   : > { %v2869_v51 = vld [vmem:[%s2968_s25 + $0x74] sm:$0xff]   ;;  %v2871_v53 = vld [vmem:[%s2968_s25 + $0x7c] sm:$0xff]   ;;  %v2873_v57 = vld [vmem:[%s2968_s25 + $0x84] sm:$0xff]  }
  0x1b   : > { %2560 = vmatmul.mubr.msk.bf16.gmra.mrb[4].mxu1 %vm212_vm2, %v2849_v21  ;;  %v2872_v54 = vld [vmem:[%s2968_s25 + $0x80] sm:$0xff]   ;;  %v2874_v58 = vld [vmem:[%s2968_s25 + $0x88] sm:$0xff]   ;;  %v2875_v59 = vld [vmem:[%s2968_s25 + $0x90] sm:$0xff]  }
  0x1c   : > { %2640 = vmatmul.mubr.msk.bf16.gmra.mrb[4].mxu0 %vm212_vm2, %v2850_v22  ;;  %2565 = vmatprep.mubr.msk.bf16.mxu1 %vm212_vm2, %v2851_v23  ;;  %v2876_v60 = vld [vmem:[%s2968_s25 + $0x94] sm:$0xff]   ;;  %v2878_v63 = vld [vmem:[%s2968_s25 + $0x9c] sm:$0xff]   ;;  %v2880_v2 = vld [vmem:[%s2968_s25 + $0xa4] sm:$0xff]  }
  0x1d   : > { %2645 = vmatprep.mubr.msk.bf16.mxu0 %vm212_vm2, %v2852_v24  ;;  %v2877_v61 = vld [vmem:[%s2968_s25 + $0x98] sm:$0xff]   ;;  %v2879_v1 = vld [vmem:[%s2968_s25 + $0xa0] sm:$0xff]   ;;  %v2881_v6 = vld [vmem:[%s2968_s25 + $0xa8] sm:$0xff]  }
  0x1e   : > { %v2882_v7 = vld [vmem:[%s2968_s25 + $0xac] sm:$0xff]   ;;  %v2883_v8 = vld [vmem:[%s2968_s25 + $0xd8] sm:$0xff]   ;;  %v2885_v10 = vld [vmem:[%s2968_s25 + $0xe0] sm:$0xff]  }
  0x1f   : > { %v2884_v9 = vld [vmem:[%s2968_s25 + $0xdc] sm:$0xff]   ;;  %v2886_v12 = vld [vmem:[%s2968_s25 + $0xe4] sm:$0xff]   ;;  %v2888_v15 = vld [vmem:[%s2968_s25 + $0xec] sm:$0xff]  }
  0x20   : > { %v2444_v13 = vld [vmem:[%s3175_s1 + $0x1e] sm:$0x3]  ;;  %v2887_v14 = vld [vmem:[%s2968_s25 + $0xe8] sm:$0xff]   ;;  %v2889_v18 = vld [vmem:[%s2968_s25 + $0xf0] sm:$0xff]  }
  0x21   : > { %v2891_v20 = vld [vmem:[%s2968_s25 + $0xb4] sm:$0xff]   ;;  %v2894_v22 = vld [vmem:[%s2968_s25 + $0xc0] sm:$0xff]   ;;  %v2896_v24 = vld [vmem:[%s2968_s25 + $0xc8] sm:$0xff]  }
  0x22   : > { %v2892_v21 = vld [vmem:[%s2968_s25 + $0xb8] sm:$0xff]   ;;  %v2895_v23 = vld [vmem:[%s2968_s25 + $0xc4] sm:$0xff]   ;;  %v2897_v25 = vld [vmem:[%s2968_s25 + $0xcc] sm:$0xff]  }
  0x23   : > { %2566 = vmatmul.mubr.msk.bf16.vlgmr.msra.gmra.mrb[0].mxu1 %vm212_vm2, %v2853_v27  ;;  %v2898_v26 = vld [vmem:[%s2968_s25 + $0xd0] sm:$0xff]   ;;  %v2899_v27 = vld [vmem:[%s2968_s25 + $0xfc] sm:$0xff]  }
  0x24   : > { %2574 = vmatpush3.bf16.msra.mxu1 %v441_v17  ;;  %2646 = vmatmul.mubr.msk.bf16.vlgmr.msra.gmra.mrb[0].mxu0 %vm212_vm2, %v2854_v28  ;;  %v1980_v17 = vand.u32 %v2444_v13, %v2953_v5  ;;  %v2893_v5 = vld [vmem:[%s2968_s25 + $0xbc] sm:$0xff]  }
  0x25   : > { %2654 = vmatpush3.bf16.msra.mxu0 %v1390_v19  ;;  %2569 = vmatprep.mubr.msk.bf16.mxu1 %vm212_vm2, %v2855_v29  ;;  %v2890_v19 = vld [vmem:[%s2968_s25 + $0xf4] sm:$0xff]   ;;  %v2900_v28 = vld [vmem:[%s2968_s25 + $0x100] sm:$0xff]  }
  0x26   : > { %2649 = vmatprep.mubr.msk.bf16.mxu0 %vm212_vm2, %v2856_v30  ;;  %2583 = vmatprep.subr.bf16.mxu1 %v560_v31  ;;  %v2901_v29 = vld [vmem:[%s2968_s25 + $0x104] sm:$0xff]  }
  0x27   : > { %2663 = vmatprep.subr.bf16.mxu0 %v1508_v32  ;;  %v2902_v30 = vld [vmem:[%s2968_s25 + $0x108] sm:$0xff]  }
  0x2b   : > { %2570 = vmatmul.mubr.msk.bf16.gmra.mrb[4].mxu1 %vm212_vm2, %v2857_v33  ;;  %v2905_v33 = vld [vmem:[%s2968_s25 + $0x114] sm:$0xff]  }
  0x2c   : > { %2650 = vmatmul.mubr.msk.bf16.gmra.mrb[4].mxu0 %vm212_vm2, %v2858_v34  ;;  %2575 = vmatprep.mubr.msk.bf16.mxu1 %vm212_vm2, %v2859_v35  ;;  %v2906_v34 = vld [vmem:[%s2968_s25 + $0x118] sm:$0xff]  }
  0x2d   : > { %2655 = vmatprep.mubr.msk.bf16.mxu0 %vm212_vm2, %v2860_v36 }
  0x33   : > { %2576 = vmatmul.mubr.msk.bf16.vlgmr.msra.gmra.mrb[0].mxu1 %vm212_vm2, %v2861_v39 }
  0x34   : > { %2584 = vmatpush3.bf16.msra.mxu1 %v560_v31  ;;  %2656 = vmatmul.mubr.msk.bf16.vlgmr.msra.gmra.mrb[0].mxu0 %vm212_vm2, %v2862_v40  ;;  %v2903_v31 = vld [vmem:[%s2968_s25 + $0x10c] sm:$0xff]  }
  0x35   : > { %2664 = vmatpush3.bf16.msra.mxu0 %v1508_v32  ;;  %2579 = vmatprep.mubr.msk.bf16.mxu1 %vm212_vm2, %v2863_v41  ;;  %v2904_v32 = vld [vmem:[%s2968_s25 + $0x110] sm:$0xff]   ;;  %s2464_s25 = sshll.u32 %s3179_s13, 5 }
  0x36   : > { %2659 = vmatprep.mubr.msk.bf16.mxu0 %vm212_vm2, %v2864_v42  ;;  %2593 = vmatprep.subr.bf16.mxu1 %v679_v43  ;;  %s3153_s30 = scalar_lea.vmem %s3177_s3, %s2464_s25 }
  0x37   : > { %2673 = vmatprep.subr.bf16.mxu0 %v1626_v44 }
  0x3b   : > { %2580 = vmatmul.mubr.msk.bf16.gmra.mrb[4].mxu1 %vm212_vm2, %v2865_v45 }
  0x3c   : > { %2660 = vmatmul.mubr.msk.bf16.gmra.mrb[4].mxu0 %vm212_vm2, %v2866_v46  ;;  %2585 = vmatprep.mubr.msk.bf16.mxu1 %vm212_vm2, %v2867_v47 }
  0x3d   : > { %2665 = vmatprep.mubr.msk.bf16.mxu0 %vm212_vm2, %v2868_v48 }
  0x43   : > { %2586 = vmatmul.mubr.msk.bf16.vlgmr.msra.gmra.mrb[0].mxu1 %vm212_vm2, %v2869_v51 }
  0x44   : > { %2594 = vmatpush3.bf16.msra.mxu1 %v679_v43  ;;  %2666 = vmatmul.mubr.msk.bf16.vlgmr.msra.gmra.mrb[0].mxu0 %vm212_vm2, %v2870_v52 }
  0x45   : > { %2674 = vmatpush3.bf16.msra.mxu0 %v1626_v44  ;;  %2589 = vmatprep.mubr.msk.bf16.mxu1 %vm212_vm2, %v2871_v53 }
  0x46   : > { %2669 = vmatprep.mubr.msk.bf16.mxu0 %vm212_vm2, %v2872_v54  ;;  %2603 = vmatprep.subr.bf16.mxu1 %v798_v55 }
  0x47   : > { %2683 = vmatprep.subr.bf16.mxu0 %v1744_v56 }
  0x4b   : > { %2590 = vmatmul.mubr.msk.bf16.gmra.mrb[4].mxu1 %vm212_vm2, %v2873_v57 }
  0x4c   : > { %2670 = vmatmul.mubr.msk.bf16.gmra.mrb[4].mxu0 %vm212_vm2, %v2874_v58  ;;  %2595 = vmatprep.mubr.msk.bf16.mxu1 %vm212_vm2, %v2875_v59 }
  0x4d   : > { %2675 = vmatprep.mubr.msk.bf16.mxu0 %vm212_vm2, %v2876_v60 }
  0x53   : > { %2596 = vmatmul.mubr.msk.bf16.vlgmr.msra.gmra.mrb[0].mxu1 %vm212_vm2, %v2877_v61 }
  0x54   : > { %2604 = vmatpush3.bf16.msra.mxu1 %v798_v55  ;;  %2676 = vmatmul.mubr.msk.bf16.vlgmr.msra.gmra.mrb[0].mxu0 %vm212_vm2, %v2878_v63 }
  0x55   : > { %2684 = vmatpush3.bf16.msra.mxu0 %v1744_v56  ;;  %2599 = vmatprep.mubr.msk.bf16.mxu1 %vm212_vm2, %v2879_v1 }
  0x56   : > { %2679 = vmatprep.mubr.msk.bf16.mxu0 %vm212_vm2, %v2880_v2  ;;  %2613 = vmatprep.subr.bf16.mxu1 %v917_v3 }
  0x57   : > { %2693 = vmatprep.subr.bf16.mxu0 %v1862_v4 }
  0x5b   : > { %2600 = vmatmul.mubr.msk.bf16.gmra.mrb[4].mxu1 %vm212_vm2, %v2881_v6 }
  0x5c   : > { %2680 = vmatmul.mubr.msk.bf16.gmra.mrb[4].mxu0 %vm212_vm2, %v2882_v7  ;;  %2605 = vmatprep.mubr.msk.bf16.mxu1 %vm212_vm2, %v2883_v8 }
  0x5d   : > { %2685 = vmatprep.mubr.msk.bf16.mxu0 %vm212_vm2, %v2884_v9 }
  0x63   : > { %2606 = vmatmul.mubr.msk.bf16.vlgmr.msra.gmra.mrb[0].mxu1 %vm212_vm2, %v2885_v10 }
  0x64   : > { %2614 = vmatpush3.bf16.msra.mxu1 %v917_v3  ;;  %2686 = vmatmul.mubr.msk.bf16.vlgmr.msra.gmra.mrb[0].mxu0 %vm212_vm2, %v2886_v12 }
  0x65   : > { %2694 = vmatpush3.bf16.msra.mxu0 %v1862_v4  ;;  %2609 = vmatprep.mubr.msk.bf16.mxu1 %vm212_vm2, %v2887_v14 }
  0x66   : > { %2689 = vmatprep.mubr.msk.bf16.mxu0 %vm212_vm2, %v2888_v15  ;;  %2623 = vmatprep.subr.bf16.mxu1 %v1036_v16 }
  0x67   : > { %2703 = vmatprep.subr.bf16.mxu0 %v1980_v17 }
  0x6b   : > { %2610 = vmatmul.mubr.msk.bf16.gmra.mrb[4].mxu1 %vm212_vm2, %v2889_v18 }
  0x6c   : > { %2690 = vmatmul.mubr.msk.bf16.gmra.mrb[4].mxu0 %vm212_vm2, %v2890_v19  ;;  %2615 = vmatprep.mubr.msk.bf16.mxu1 %vm212_vm2, %v2891_v20 }
  0x6d   : > { %2695 = vmatprep.mubr.msk.bf16.mxu0 %vm212_vm2, %v2892_v21 }
  0x73   : > { %2616 = vmatmul.mubr.msk.bf16.vlgmr.msra.gmra.mrb[0].mxu1 %vm212_vm2, %v2893_v5 }
  0x74   : > { %2624 = vmatpush3.bf16.msra.mxu1 %v1036_v16  ;;  %2696 = vmatmul.mubr.msk.bf16.vlgmr.msra.gmra.mrb[0].mxu0 %vm212_vm2, %v2894_v22 }
  0x75   : > { %2704 = vmatpush3.bf16.msra.mxu0 %v1980_v17  ;;  %2619 = vmatprep.mubr.msk.bf16.mxu1 %vm212_vm2, %v2895_v23 }
  0x76   : > { %2699 = vmatprep.mubr.msk.bf16.mxu0 %vm212_vm2, %v2896_v24 }
  0x7b   : > { %2620 = vmatmul.mubr.msk.bf16.gmra.mrb[4].mxu1 %vm212_vm2, %v2897_v25 }
  0x7c   : > { %2700 = vmatmul.mubr.msk.bf16.gmra.mrb[4].mxu0 %vm212_vm2, %v2898_v26  ;;  %2625 = vmatprep.mubr.msk.bf16.mxu1 %vm212_vm2, %v2899_v27 }
  0x7d   : > { %2705 = vmatprep.mubr.msk.bf16.mxu0 %vm212_vm2, %v2900_v28 }
  0x83   : > { %2626 = vmatmul.mubr.msk.bf16.vlgmr.msra.gmra.mrb[0].mxu1 %vm212_vm2, %v2901_v29 }
  0x84   : > { %2706 = vmatmul.mubr.msk.bf16.vlgmr.msra.gmra.mrb[0].mxu0 %vm212_vm2, %v2902_v30  ;;  %2629 = vmatprep.mubr.msk.bf16.mxu1 %vm212_vm2, %v2903_v31 }
  0x85   : > { %2709 = vmatprep.mubr.msk.bf16.mxu0 %vm212_vm2, %v2904_v32 }
  0x8b   : > { %2630 = vmatmul.mubr.msk.bf16.gmra.mrb[4].mxu1 %vm212_vm2, %v2905_v33 }
  0x8c   : > { %2710 = vmatmul.mubr.msk.bf16.gmra.mrb[4].mxu0 %vm212_vm2, %v2906_v34 }
 0x156   : > { %v2627_v35 = vpop.f32.mrb[0].mxu1 }
 0x157   : > { %v2707_v36 = vpop.f32.mrb[0].mxu0  ;;  %v1072_v38 = vpop.f32.mrb[1].mxu1 }
 0x158   : > { %v2713_v39 = vadd.f32 %v2707_v36, %v2627_v35  ;;  %v2016_v40 = vpop.f32.mrb[1].mxu0  ;;  %v2628_v41 = vpop.f32.mrb[2].mxu1 }
 0x159   : > { %v2714_v42 = vadd.f32 %v2016_v40, %v1072_v38  ;;  %v2708_v43 = vpop.f32.mrb[2].mxu0  ;;  %v1075_v44 = vpop.f32.mrb[3].mxu1 }
 0x15a   : > { %v2064_v45 = vadd.f32 %v2713_v39, %v2453_v37  ;;  %v2715_v46 = vadd.f32 %v2708_v43, %v2628_v41  ;;  %v2019_v47 = vpop.f32.mrb[3].mxu0 }
 0x15b   : > { %v2062_v48 = vadd.f32 %v2714_v42, %v2453_v37  ;;  %v2716_v49 = vadd.f32 %v2019_v47, %v1075_v44 }
 0x15c   : > { %vm2072_vm3 = vcmp.gt.f32.partialorder %v2064_v45, 0.0  ;;  %v2080_v50 = vmul.f32 0.01, %v2064_v45  ;;  %v2065_v51 = vadd.f32 %v2715_v46, %v2453_v37 }
 0x15d   : > { %vm2070_vm4 = vcmp.gt.f32.partialorder %v2062_v48, 0.0  ;;  %v2078_v52 = vmul.f32 0.01, %v2062_v48  ;;  %v2063_v53 = vadd.f32 %v2716_v49, %v2453_v37 }
 0x15e   : > { %v2088_v54 = vsel %vm2072_vm3, %v2064_v45, %v2080_v50  ;;  %vm2073_vm6 = vcmp.gt.f32.partialorder %v2065_v51, 0.0  ;;  %v2081_v55 = vmul.f32 0.01, %v2065_v51  ;;  %v2631_v56 = vpop.f32.mrb[4].mxu1 }
 0x15f   : > { %v2467_v57 = vpack.c.bf16 %v2088_v54, %v2088_v54  ;;  %v2086_v58 = vsel %vm2070_vm4, %v2062_v48, %v2078_v52  ;;  %vm2071_vm7 = vcmp.gt.f32.partialorder %v2063_v53, 0.0  ;;  %v2079_v59 = vmul.f32 0.01, %v2063_v53  ;;  %v2711_v60 = vpop.f32.mrb[4].mxu0  ;;  %v1088_v61 = vpop.f32.mrb[5].mxu1 }
 0x160   : > { %v2465_v62 = vpack.c.bf16 %v2086_v58, %v2086_v58  ;;  %v2089_v63 = vsel %vm2073_vm6, %v2065_v51, %v2081_v55  ;;  %v2717_v0 = vadd.f32 %v2711_v60, %v2631_v56  ;;  %v2032_v1 = vpop.f32.mrb[5].mxu0  ;;  %v2632_v2 = vpop.f32.mrb[6].mxu1 }
 0x161   : > { %2129 = vst.msk [vmem:[%s3153_s30 + $0x8] sm:$0xf] %vm2126_vm5, %v2467_v57  ;;  %v2468_v3 = vpack.c.bf16 %v2089_v63, %v2089_v63  ;;  %v2087_v4 = vsel %vm2071_vm7, %v2063_v53, %v2079_v59  ;;  %v2718_v6 = vadd.f32 %v2032_v1, %v1088_v61  ;;  %v2712_v7 = vpop.f32.mrb[6].mxu0  ;;  %v1091_v8 = vpop.f32.mrb[7].mxu1 }
 0x162   : > { %2127 = vst.msk [vmem:[%s3153_s30] sm:$0xf] %vm2126_vm5, %v2465_v62  ;;  %v2466_v9 = vpack.c.bf16 %v2087_v4, %v2087_v4  ;;  %v2068_v10 = vadd.f32 %v2717_v0, %v2453_v37  ;;  %v2719_v11 = vadd.f32 %v2712_v7, %v2632_v2  ;;  %v2035_v12 = vpop.f32.mrb[7].mxu0 }
 0x163   : > { %2130 = vst.msk [vmem:[%s3153_s30 + $0xc] sm:$0xf] %vm2126_vm5, %v2468_v3  ;;  %v2066_v13 = vadd.f32 %v2718_v6, %v2453_v37  ;;  %v2720_v14 = vadd.f32 %v2035_v12, %v1091_v8 }
 0x164   : > { %2128 = vst.msk [vmem:[%s3153_s30 + $0x4] sm:$0xf] %vm2126_vm5, %v2466_v9  ;;  %vm2076_vm8 = vcmp.gt.f32.partialorder %v2068_v10, 0.0  ;;  %v2084_v15 = vmul.f32 0.01, %v2068_v10  ;;  %v2069_v16 = vadd.f32 %v2719_v11, %v2453_v37 }
 0x165   : > { %vm2074_vm9 = vcmp.gt.f32.partialorder %v2066_v13, 0.0  ;;  %v2082_v17 = vmul.f32 0.01, %v2066_v13  ;;  %v2067_v18 = vadd.f32 %v2720_v14, %v2453_v37 }
 0x166   : > { %v2092_v19 = vsel %vm2076_vm8, %v2068_v10, %v2084_v15  ;;  %vm2077_vm10 = vcmp.gt.f32.partialorder %v2069_v16, 0.0  ;;  %v2085_v20 = vmul.f32 0.01, %v2069_v16 }
 0x167   : > { %v2471_v21 = vpack.c.bf16 %v2092_v19, %v2092_v19  ;;  %v2090_v5 = vsel %vm2074_vm9, %v2066_v13, %v2082_v17  ;;  %vm2075_vm11 = vcmp.gt.f32.partialorder %v2067_v18, 0.0  ;;  %v2083_v22 = vmul.f32 0.01, %v2067_v18 }
 0x168   : > { %v2469_v23 = vpack.c.bf16 %v2090_v5, %v2090_v5  ;;  %v2093_v24 = vsel %vm2077_vm10, %v2069_v16, %v2085_v20 }
 0x169   : > { %2133 = vst.msk [vmem:[%s3153_s30 + $0x18] sm:$0xf] %vm2126_vm5, %v2471_v21  ;;  %v2472_v25 = vpack.c.bf16 %v2093_v24, %v2093_v24  ;;  %v2091_v26 = vsel %vm2075_vm11, %v2067_v18, %v2083_v22 }
 0x16a   : > { %2131 = vst.msk [vmem:[%s3153_s30 + $0x10] sm:$0xf] %vm2126_vm5, %v2469_v23  ;;  %v2470_v27 = vpack.c.bf16 %v2091_v26, %v2091_v26 }
 0x16b   : > { %2134 = vst.msk [vmem:[%s3153_s30 + $0x1c] sm:$0xf] %vm2126_vm5, %v2472_v25 }
 0x16c   : > { %2132 = vst.msk [vmem:[%s3153_s30 + $0x14] sm:$0xf] %vm2126_vm5, %v2470_v27 }
 0x16d PF: > { %s13_s12 = sadd.s32 1, %s2913_s12  }
 0x16e   : > { %p10_p4 = scmp.ge.s32.totalorder %s13_s12, 4  }
 0x170   :  { %12 = sbr.rel (!%p10_p4) target bundleno = 1 (0x1), region = 84 }

// kernel: bc_image_only_forward.5
= control target key start
LH: loop header
LB: loop body
LE: loop exit
PB: predicated region body
PF: predicated region fallthrough
CT: control target
= control target key end

     0   :  { %s2369_s12 = smov 0   ;;  %s2731_s0 = inlined_call_operand.vmem [shape: bf16[2,8,20,64], index: 0, kind: input, shape index: {}]   ;;  %s2732_s1 = inlined_call_operand.vmem [shape: bf16[16,64,128], index: 1, kind: input, shape index: {}]   ;;  %s2733_s2 = inlined_call_operand.vmem [shape: f32[1,128], index: 2, kind: input, shape index: {}]   ;;  %s2734_s3 = inlined_call_operand.vmem [shape: bf16[2,16,128], index: 3, kind: output, shape index: {}]  }
   0x1 LB: > { %s1688_s13 = sadd.s32 4294967295, %s2345_s12   ;;  %p1692_p0 = scmp.ge.s32.totalorder %s2345_s12, 1  ;;  %s2345_s12 = sphi %s2369_s12, %s13_s12  }
   0x2   : > { %p137_p1 = scmp.lt.s32.totalorder %s2345_s12, 3 }
   0x4   : > { %p138_p2 = pnand %p1692_p0, %p137_p1 }
   0x5   : > { %v2251_v0 = vld [vmem:[%s2732_s1 + $0x20] sm:$0xff] (!%p138_p2)   ;;  %v2347_v1 = vmov (!%p138_p2), 0.0   ;;  %v2253_v3 = vld [vmem:[%s2732_s1 + $0x28] sm:$0xff] (!%p138_p2)   ;;  %vm2348_vm0 = vmmov (!%p138_p2), 0   ;;  %p161_p3 = scmp.lt.s32.totalorder (!%p138_p2), %s1688_s13, 1  ;;  %v2255_v5 = vld [vmem:[%s2732_s1 + $0x30] sm:$0xff] (!%p138_p2)  }
   0x6   : > { %141 = sbr.rel (%p138_p2) target bundleno = 360 (0x168), region = 32  ;;  %2048 = vmatprep.subr.bf16.mxu0 (!%p138_p2), %v2347_v1  ;;  %2060 = vmatprep.subr.bf16.mxu1 (!%p138_p2), %v2347_v1  ;;  %v2252_v2 = vld [vmem:[%s2732_s1] sm:$0xff] (!%p138_p2)   ;;  %v2254_v4 = vld [vmem:[%s2732_s1 + $0x8] sm:$0xff] (!%p138_p2)   ;;  %v2256_v6 = vld [vmem:[%s2732_s1 + $0x10] sm:$0xff] (!%p138_p2)   ;;  %vm223_vm1 = vcmask (!%p138_p2), 523264   ;;  %vm883_vm2 = vcmask (!%p138_p2), 1045504  }
   0x7   : > { %2049 = vmatpush3.bf16.msra.mxu0 (!%p138_p2), %v2251_v0  ;;  %2056 = vmatprep.mubr.msk.bf16.mxu0 (!%p138_p2), %vm2348_vm0, %v2347_v1  ;;  %v2257_v7 = vld [vmem:[%s2732_s1 + $0x38] sm:$0xff] (!%p138_p2)   ;;  %v2261_v9 = vld [vmem:[%s2732_s1 + $0x40] sm:$0xff] (!%p138_p2)   ;;  %v2263_v13 = vld [vmem:[%s2732_s1 + $0x48] sm:$0xff] (!%p138_p2)  }
   0x8   : > { %2061 = vmatpush3.bf16.msra.mxu1 (!%p138_p2), %v2252_v2  ;;  %2050 = vmatprep.subr.bf16.mxu0 (!%p138_p2), %v2347_v1  ;;  %v2258_v8 = vld [vmem:[%s2732_s1 + $0x18] sm:$0xff] (!%p138_p2)   ;;  %v2262_v12 = vld [vmem:[%s2732_s1 + $0x60] sm:$0xff] (!%p138_p2)   ;;  %v2264_v14 = vld [vmem:[%s2732_s1 + $0x68] sm:$0xff] (!%p138_p2)  }
   0x9   : > { %2062 = vmatprep.subr.bf16.mxu1 (!%p138_p2), %v2347_v1  ;;  %2068 = vmatprep.mubr.msk.bf16.mxu1 (!%p138_p2), %vm2348_vm0, %v2347_v1  ;;  %v2265_v15 = vld [vmem:[%s2732_s1 + $0x50] sm:$0xff] (!%p138_p2)   ;;  %v2267_v17 = vld [vmem:[%s2732_s1 + $0x58] sm:$0xff] (!%p138_p2)   ;;  %v2271_v21 = vld [vmem:[%s2732_s1 + $0x80] sm:$0xff] (!%p138_p2)  }
   0xa   : > { %v2266_v16 = vld [vmem:[%s2732_s1 + $0x70] sm:$0xff] (!%p138_p2)   ;;  %v2268_v18 = vld [vmem:[%s2732_s1 + $0x78] sm:$0xff] (!%p138_p2)   ;;  %v2272_v22 = vld [vmem:[%s2732_s1 + $0xa0] sm:$0xff] (!%p138_p2)  }
   0xb   : > { %2051 = vmatpush3.bf16.msra.mxu0 (!%p138_p2), %v2253_v3  ;;  %v2273_v23 = vld [vmem:[%s2732_s1 + $0x88] sm:$0xff] (!%p138_p2)   ;;  %v2275_v25 = vld [vmem:[%s2732_s1 + $0x90] sm:$0xff] (!%p138_p2)   ;;  %v2277_v27 = vld [vmem:[%s2732_s1 + $0x98] sm:$0xff] (!%p138_p2)  }
   0xc   : > { %2063 = vmatpush3.bf16.msra.mxu1 (!%p138_p2), %v2254_v4  ;;  %2052 = vmatprep.subr.bf16.mxu0 (!%p138_p2), %v2347_v1  ;;  %v2274_v24 = vld [vmem:[%s2732_s1 + $0xa8] sm:$0xff] (!%p138_p2)   ;;  %v2276_v26 = vld [vmem:[%s2732_s1 + $0xb0] sm:$0xff] (!%p138_p2)   ;;  %v2278_v28 = vld [vmem:[%s2732_s1 + $0xb8] sm:$0xff] (!%p138_p2)  }
   0xd   : > { %s2736_s13 = smov (!%p161_p3, %s1688_s13), 1  ;;  %2064 = vmatprep.subr.bf16.mxu1 %v2347_v1  ;;  %v2281_v31 = vld [vmem:[%s2732_s1 + $0xc0] sm:$0xff]   ;;  %v2283_v33 = vld [vmem:[%s2732_s1 + $0xc8] sm:$0xff]   ;;  %v2285_v35 = vld [vmem:[%s2732_s1 + $0xd0] sm:$0xff]  }
   0xe   : > { %s2240_s24 = smul.u32 96, %s2736_s13  ;;  %v2282_v32 = vld [vmem:[%s2732_s1 + $0xe0] sm:$0xff]   ;;  %v2284_v34 = vld [vmem:[%s2732_s1 + $0xe8] sm:$0xff]   ;;  %v2286_v36 = vld [vmem:[%s2732_s1 + $0xf0] sm:$0xff]   ;;  %s1960_s26 = sshll.u32 %s2736_s13, 3 }
   0xf   : > { %2053 = vmatpush3.bf16.msra.mxu0 %v2255_v5  ;;  %v2287_v37 = vld [vmem:[%s2732_s1 + $0xd8] sm:$0xff]   ;;  %v2291_v41 = vld [vmem:[%s2732_s1 + $0x100] sm:$0xff]   ;;  %v2293_v43 = vld [vmem:[%s2732_s1 + $0x108] sm:$0xff]   ;;  %s170_s30 = scalar_lea.vmem %s2734_s3, %s1960_s26 }
  0x10   : > { %s2411_s29 = scalar_lea.vmem %s2731_s0, %s2240_s24  ;;  %2065 = vmatpush3.bf16.msra.mxu1 %v2256_v6  ;;  %2054 = vmatprep.subr.bf16.mxu0 %v2347_v1  ;;  %v2288_v38 = vld [vmem:[%s2732_s1 + $0xf8] sm:$0xff]   ;;  %v2292_v42 = vld [vmem:[%s2732_s1 + $0x120] sm:$0xff]   ;;  %v2294_v44 = vld [vmem:[%s2732_s1 + $0x128] sm:$0xff]  }
  0x11   : > { %2066 = vmatprep.subr.bf16.mxu1 %v2347_v1  ;;  %v2259_v10 = vld [vmem:[%s2411_s29 + $0x18] sm:$0xff]   ;;  %v2260_v11 = vld [vmem:[%s2411_s29] sm:$0xff]   ;;  %v2269_v19 = vld [vmem:[%s2411_s29 + $0xc] sm:$0xff]  }
  0x12   : > { %v2270_v20 = vld [vmem:[%s2411_s29 + $0x24] sm:$0xff]   ;;  %v2279_v29 = vld [vmem:[%s2411_s29 + $0x30] sm:$0xff]   ;;  %v2289_v39 = vld [vmem:[%s2411_s29 + $0x3c] sm:$0xff]  }
  0x13   : > { %2055 = vmatpush3.bf16.msra.mxu0 %v2257_v7  ;;  %v2280_v30 = vld [vmem:[%s2411_s29 + $0x48] sm:$0xff]   ;;  %v2290_v40 = vld [vmem:[%s2411_s29 + $0x54] sm:$0xff]   ;;  %v2302_v48 = vld [vmem:[%s2411_s29 + $0x20] ss:$0 sps:$4 sm:$0x33]  }
  0x14   : > { %2067 = vmatpush3.bf16.msra.mxu1 %v2258_v8  ;;  %2072 = vmatprep.subr.bf16.mxu0 %v2347_v1  ;;  %v2295_v45 = vld [vmem:[%s2732_s1 + $0x110] sm:$0xff]   ;;  %v2300_v46 = vld [vmem:[%s2411_s29 + $0x8] ss:$0 sps:$4 sm:$0x33]   ;;  %v2299_v49 = vld [vmem:[%s2411_s29] sm:$0xfc]  }
  0x15   : > { %2084 = vmatprep.subr.bf16.mxu1 %v2347_v1  ;;  %v2296_v47 = vld [vmem:[%s2732_s1 + $0x130] sm:$0xff]   ;;  %v2301_v50 = vld [vmem:[%s2411_s29 + $0x18] sm:$0xfc]   ;;  %v884_v52 = vrot.slane %v2299_v49, 2  ;;  %v885_v53 = vrot.slane %v2300_v46, 2  ;;  %v978_v56 = vrot.slane %v2302_v48, 2 }
  0x16   : > { %2057 = vmatmul.mubr.msk.bf16.vlgmr.msra.gmra.mrb[0].mxu0 %vm223_vm1, %v2259_v10  ;;  %v2297_v51 = vld [vmem:[%s2732_s1 + $0x118] sm:$0xff]   ;;  %v977_v55 = vrot.slane %v2301_v50, 2  ;;  %v2303_v58 = vld [vmem:[%s2732_s1 + $0x140] sm:$0xff]   ;;  %v2305_v61 = vld [vmem:[%s2732_s1 + $0x148] sm:$0xff]  }
  0x17   : > { %2069 = vmatmul.mubr.msk.bf16.vlgmr.msra.gmra.mrb[0].mxu1 %vm223_vm1, %v2260_v11  ;;  %2073 = vmatpush3.bf16.msra.mxu0 %v2261_v9  ;;  %v2298_v54 = vld [vmem:[%s2732_s1 + $0x138] sm:$0xff]   ;;  %v886_v57 = vsel %vm883_vm2, %v884_v52, %v885_v53  ;;  %v2304_v60 = vld [vmem:[%s2732_s1 + $0x160] sm:$0xff]   ;;  %v2306_v62 = vld [vmem:[%s2732_s1 + $0x168] sm:$0xff]  }
  0x18   : > { %2085 = vmatpush3.bf16.msra.mxu1 %v2262_v12  ;;  %2074 = vmatprep.subr.bf16.mxu0 %v2347_v1  ;;  %v979_v59 = vsel %vm883_vm2, %v977_v55, %v978_v56  ;;  %v2307_v63 = vld [vmem:[%s2732_s1 + $0x150] sm:$0xff]   ;;  %v2313_v4 = vld [vmem:[%s2411_s29 + $0x24] sm:$0xfc]   ;;  %v2314_v5 = vld [vmem:[%s2411_s29 + $0x2c] ss:$0 sps:$4 sm:$0x33]  }
  0x19   : > { %2086 = vmatprep.subr.bf16.mxu1 %v2347_v1  ;;  %2080 = vmatprep.mubr.msk.bf16.mxu0 %vm2348_vm0, %v2347_v1  ;;  %v2312_v0 = vld [vmem:[%s2411_s29 + $0x14] ss:$0 sps:$4 sm:$0x33]   ;;  %v2311_v2 = vld [vmem:[%s2411_s29 + $0xc] sm:$0xfc]   ;;  %v2309_v6 = vld [vmem:[%s2732_s1 + $0x158] sm:$0xff]  }
  0x1a   : > { %2092 = vmatprep.mubr.msk.bf16.mxu1 %vm2348_vm0, %v2347_v1  ;;  %v2308_v3 = vld [vmem:[%s2732_s1 + $0x170] sm:$0xff]   ;;  %v1070_v7 = vrot.slane %v2311_v2, 2  ;;  %v1071_v8 = vrot.slane %v2312_v0, 2  ;;  %v2310_v9 = vld [vmem:[%s2732_s1 + $0x178] sm:$0xff]   ;;  %v1163_v10 = vrot.slane %v2313_v4, 2  ;;  %v1164_v11 = vrot.slane %v2314_v5, 2 }
  0x1b   : > { %2075 = vmatpush3.bf16.msra.mxu0 %v2263_v13  ;;  %v2315_v13 = vld [vmem:[%s2732_s1 + $0x180] sm:$0xff]  }
  0x1c   : > { %2087 = vmatpush3.bf16.msra.mxu1 %v2264_v14  ;;  %2076 = vmatprep.subr.bf16.mxu0 %v2347_v1  ;;  %v1072_v12 = vsel %vm883_vm2, %v1070_v7, %v1071_v8  ;;  %v1165_v14 = vsel %vm883_vm2, %v1163_v10, %v1164_v11 }
  0x1d   : > { %2088 = vmatprep.subr.bf16.mxu1 %v2347_v1 }
  0x1f   : > { %2077 = vmatpush3.bf16.msra.mxu0 %v2265_v15  ;;  %v2316_v15 = vld [vmem:[%s2732_s1 + $0x1a0] sm:$0xff]  }
  0x20   : > { %2089 = vmatpush3.bf16.msra.mxu1 %v2266_v16  ;;  %2078 = vmatprep.subr.bf16.mxu0 %v2347_v1  ;;  %v2317_v16 = vld [vmem:[%s2732_s1 + $0x188] sm:$0xff]  }
  0x21   : > { %2090 = vmatprep.subr.bf16.mxu1 %v2347_v1 }
  0x23   : > { %2079 = vmatpush3.bf16.msra.mxu0 %v2267_v17  ;;  %v2318_v17 = vld [vmem:[%s2732_s1 + $0x1a8] sm:$0xff]  }
  0x24   : > { %2091 = vmatpush3.bf16.msra.mxu1 %v2268_v18  ;;  %2096 = vmatprep.subr.bf16.mxu0 %v2347_v1  ;;  %v2319_v18 = vld [vmem:[%s2732_s1 + $0x190] sm:$0xff]  }
  0x25   : > { %2108 = vmatprep.subr.bf16.mxu1 %v2347_v1 }
  0x26   : > { %2081 = vmatmul.mubr.msk.bf16.vlgmr.msra.gmra.mrb[4].mxu0 %vm223_vm1, %v2269_v19  ;;  %v2323_v19 = vld [vmem:[%s2411_s29 + $0x30] sm:$0xfc]  }
  0x27   : > { %2093 = vmatmul.mubr.msk.bf16.vlgmr.msra.gmra.mrb[4].mxu1 %vm223_vm1, %v2270_v20  ;;  %2097 = vmatpush3.bf16.msra.mxu0 %v2271_v21  ;;  %v2324_v20 = vld [vmem:[%s2411_s29 + $0x38] ss:$0 sps:$4 sm:$0x33]   ;;  %v2320_v21 = vld [vmem:[%s2732_s1 + $0x1b0] sm:$0xff]  }
  0x28   : > { %2109 = vmatpush3.bf16.msra.mxu1 %v2272_v22  ;;  %2098 = vmatprep.subr.bf16.mxu0 %v2347_v1  ;;  %v2325_v22 = vld [vmem:[%s2411_s29 + $0x48] sm:$0xfc]  }
  0x29   : > { %2110 = vmatprep.subr.bf16.mxu1 %v2347_v1  ;;  %2104 = vmatprep.mubr.msk.bf16.mxu0 %vm2348_vm0, %v2347_v1 }
  0x2a   : > { %2116 = vmatprep.mubr.msk.bf16.mxu1 %vm2348_vm0, %v2347_v1 }
  0x2b   : > { %2099 = vmatpush3.bf16.msra.mxu0 %v2273_v23  ;;  %v2326_v23 = vld [vmem:[%s2411_s29 + $0x50] ss:$0 sps:$4 sm:$0x33]  }
  0x2c   : > { %2111 = vmatpush3.bf16.msra.mxu1 %v2274_v24  ;;  %2100 = vmatprep.subr.bf16.mxu0 %v2347_v1  ;;  %v2321_v24 = vld [vmem:[%s2732_s1 + $0x198] sm:$0xff]  }
  0x2d   : > { %2112 = vmatprep.subr.bf16.mxu1 %v2347_v1 }
  0x2f   : > { %2101 = vmatpush3.bf16.msra.mxu0 %v2275_v25  ;;  %v1256_v25 = vrot.slane %v2323_v19, 2 }
  0x30   : > { %2113 = vmatpush3.bf16.msra.mxu1 %v2276_v26  ;;  %2102 = vmatprep.subr.bf16.mxu0 %v2347_v1  ;;  %v1257_v26 = vrot.slane %v2324_v20, 2 }
  0x31   : > { %2114 = vmatprep.subr.bf16.mxu1 %v2347_v1 }
  0x33   : > { %2103 = vmatpush3.bf16.msra.mxu0 %v2277_v27  ;;  %v2322_v27 = vld [vmem:[%s2732_s1 + $0x1b8] sm:$0xff]  }
  0x34   : > { %2115 = vmatpush3.bf16.msra.mxu1 %v2278_v28  ;;  %2120 = vmatprep.subr.bf16.mxu0 %v2347_v1  ;;  %v1349_v28 = vrot.slane %v2325_v22, 2 }
  0x35   : > { %2132 = vmatprep.subr.bf16.mxu1 %v2347_v1 }
  0x36   : > { %2105 = vmatmul.mubr.msk.bf16.vlgmr.msra.gmra.mrb[8].mxu0 %vm223_vm1, %v2279_v29  ;;  %v1350_v29 = vrot.slane %v2326_v23, 2 }
  0x37   : > { %2117 = vmatmul.mubr.msk.bf16.vlgmr.msra.gmra.mrb[8].mxu1 %vm223_vm1, %v2280_v30  ;;  %2121 = vmatpush3.bf16.msra.mxu0 %v2281_v31  ;;  %v1258_v30 = vsel %vm883_vm2, %v1256_v25, %v1257_v26  ;;  %v2327_v31 = vld [vmem:[%s2732_s1 + $0x1c0] sm:$0xff]  }
  0x38   : > { %2133 = vmatpush3.bf16.msra.mxu1 %v2282_v32  ;;  %2122 = vmatprep.subr.bf16.mxu0 %v2347_v1  ;;  %v1351_v32 = vsel %vm883_vm2, %v1349_v28, %v1350_v29 }
  0x39   : > { %2134 = vmatprep.subr.bf16.mxu1 %v2347_v1  ;;  %2128 = vmatprep.mubr.msk.bf16.mxu0 %vm2348_vm0, %v2347_v1 }
  0x3a   : > { %2140 = vmatprep.mubr.msk.bf16.mxu1 %vm2348_vm0, %v2347_v1 }
  0x3b   : > { %2123 = vmatpush3.bf16.msra.mxu0 %v2283_v33  ;;  %v2328_v33 = vld [vmem:[%s2732_s1 + $0x1e0] sm:$0xff]  }
  0x3c   : > { %2135 = vmatpush3.bf16.msra.mxu1 %v2284_v34  ;;  %2124 = vmatprep.subr.bf16.mxu0 %v2347_v1  ;;  %v2329_v34 = vld [vmem:[%s2732_s1 + $0x1c8] sm:$0xff]  }
  0x3d   : > { %2136 = vmatprep.subr.bf16.mxu1 %v2347_v1 }
  0x3f   : > { %2125 = vmatpush3.bf16.msra.mxu0 %v2285_v35  ;;  %v2330_v35 = vld [vmem:[%s2732_s1 + $0x1e8] sm:$0xff]  }
  0x40   : > { %2137 = vmatpush3.bf16.msra.mxu1 %v2286_v36  ;;  %2126 = vmatprep.subr.bf16.mxu0 %v2347_v1  ;;  %v2331_v36 = vld [vmem:[%s2732_s1 + $0x1d0] sm:$0xff]  }
  0x41   : > { %2138 = vmatprep.subr.bf16.mxu1 %v2347_v1 }
  0x43   : > { %2127 = vmatpush3.bf16.msra.mxu0 %v2287_v37  ;;  %v2335_v37 = vld [vmem:[%s2411_s29 + $0x3c] sm:$0xfc]  }
  0x44   : > { %2139 = vmatpush3.bf16.msra.mxu1 %v2288_v38  ;;  %2144 = vmatprep.subr.bf16.mxu0 %v2347_v1  ;;  %v2336_v38 = vld [vmem:[%s2411_s29 + $0x44] ss:$0 sps:$4 sm:$0x33]  }
  0x45   : > { %2156 = vmatprep.subr.bf16.mxu1 %v2347_v1 }
  0x46   : > { %2129 = vmatmul.mubr.msk.bf16.vlgmr.msra.gmra.mrb[12].mxu0 %vm223_vm1, %v2289_v39  ;;  %v2332_v39 = vld [vmem:[%s2732_s1 + $0x1f0] sm:$0xff]  }
  0x47   : > { %2141 = vmatmul.mubr.msk.bf16.vlgmr.msra.gmra.mrb[12].mxu1 %vm223_vm1, %v2290_v40  ;;  %2145 = vmatpush3.bf16.msra.mxu0 %v2291_v41  ;;  %v2337_v40 = vld [vmem:[%s2411_s29 + $0x54] sm:$0xfc]   ;;  %v2338_v41 = vld [vmem:[%s2411_s29 + $0x5c] ss:$0 sps:$4 sm:$0x33]  }
  0x48   : > { %2157 = vmatpush3.bf16.msra.mxu1 %v2292_v42  ;;  %2146 = vmatprep.subr.bf16.mxu0 %v2347_v1  ;;  %v2333_v42 = vld [vmem:[%s2732_s1 + $0x1d8] sm:$0xff]   ;;  %v1535_v46 = vrot.slane %v2337_v40, 2 }
  0x49   : > { %2158 = vmatprep.subr.bf16.mxu1 %v2347_v1  ;;  %2152 = vmatprep.mubr.msk.bf16.mxu0 %vm2348_vm0, %v2347_v1 }
  0x4a   : > { %2164 = vmatprep.mubr.msk.bf16.mxu1 %vm2348_vm0, %v2347_v1 }
  0x4b   : > { %2147 = vmatpush3.bf16.msra.mxu0 %v2293_v43  ;;  %v1442_v43 = vrot.slane %v2335_v37, 2 }
  0x4c   : > { %2159 = vmatpush3.bf16.msra.mxu1 %v2294_v44  ;;  %2148 = vmatprep.subr.bf16.mxu0 %v2347_v1  ;;  %v1443_v44 = vrot.slane %v2336_v38, 2 }
  0x4d   : > { %2160 = vmatprep.subr.bf16.mxu1 %v2347_v1 }
  0x4e   : > { %v1444_v48 = vsel %vm883_vm2, %v1442_v43, %v1443_v44 }
  0x4f   : > { %2149 = vmatpush3.bf16.msra.mxu0 %v2295_v45  ;;  %v2334_v45 = vld [vmem:[%s2732_s1 + $0x1f8] sm:$0xff]  }
  0x50   : > { %2161 = vmatpush3.bf16.msra.mxu1 %v2296_v47  ;;  %2150 = vmatprep.subr.bf16.mxu0 %v2347_v1  ;;  %v1536_v47 = vrot.slane %v2338_v41, 2 }
  0x51   : > { %2162 = vmatprep.subr.bf16.mxu1 %v2347_v1 }
  0x52   : > { %v1537_v49 = vsel %vm883_vm2, %v1535_v46, %v1536_v47 }
  0x53   : > { %2151 = vmatpush3.bf16.msra.mxu0 %v2297_v51 }
  0x54   : > { %2163 = vmatpush3.bf16.msra.mxu1 %v2298_v54  ;;  %2168 = vmatprep.subr.bf16.mxu0 %v2347_v1 }
  0x55   : > { %2180 = vmatprep.subr.bf16.mxu1 %v2347_v1 }
  0x56   : > { %2153 = vmatmul.mubr.msk.bf16.vlgmr.msra.gmra.mrb[16].mxu0 %vm223_vm1, %v886_v57 }
  0x57   : > { %2165 = vmatmul.mubr.msk.bf16.vlgmr.msra.gmra.mrb[16].mxu1 %vm223_vm1, %v979_v59  ;;  %2169 = vmatpush3.bf16.msra.mxu0 %v2303_v58 }
  0x58   : > { %2181 = vmatpush3.bf16.msra.mxu1 %v2304_v60  ;;  %2170 = vmatprep.subr.bf16.mxu0 %v2347_v1 }
  0x59   : > { %2182 = vmatprep.subr.bf16.mxu1 %v2347_v1  ;;  %2176 = vmatprep.mubr.msk.bf16.mxu0 %vm2348_vm0, %v2347_v1 }
  0x5a   : > { %2188 = vmatprep.mubr.msk.bf16.mxu1 %vm2348_vm0, %v2347_v1 }
  0x5b   : > { %2171 = vmatpush3.bf16.msra.mxu0 %v2305_v61 }
  0x5c   : > { %2183 = vmatpush3.bf16.msra.mxu1 %v2306_v62  ;;  %2172 = vmatprep.subr.bf16.mxu0 %v2347_v1 }
  0x5d   : > { %2184 = vmatprep.subr.bf16.mxu1 %v2347_v1 }
  0x5f   : > { %2173 = vmatpush3.bf16.msra.mxu0 %v2307_v63 }
  0x60   : > { %2185 = vmatpush3.bf16.msra.mxu1 %v2308_v3  ;;  %2174 = vmatprep.subr.bf16.mxu0 %v2347_v1 }
  0x61   : > { %2186 = vmatprep.subr.bf16.mxu1 %v2347_v1 }
  0x63   : > { %2175 = vmatpush3.bf16.msra.mxu0 %v2309_v6 }
  0x64   : > { %2187 = vmatpush3.bf16.msra.mxu1 %v2310_v9  ;;  %2192 = vmatprep.subr.bf16.mxu0 %v2347_v1 }
  0x65   : > { %2204 = vmatprep.subr.bf16.mxu1 %v2347_v1 }
  0x66   : > { %2177 = vmatmul.mubr.msk.bf16.vlgmr.msra.gmra.mrb[20].mxu0 %vm223_vm1, %v1072_v12 }
  0x67   : > { %2189 = vmatmul.mubr.msk.bf16.vlgmr.msra.gmra.mrb[20].mxu1 %vm223_vm1, %v1165_v14  ;;  %2193 = vmatpush3.bf16.msra.mxu0 %v2315_v13 }
  0x68   : > { %2205 = vmatpush3.bf16.msra.mxu1 %v2316_v15  ;;  %2194 = vmatprep.subr.bf16.mxu0 %v2347_v1 }
  0x69   : > { %2206 = vmatprep.subr.bf16.mxu1 %v2347_v1  ;;  %2200 = vmatprep.mubr.msk.bf16.mxu0 %vm2348_vm0, %v2347_v1 }
  0x6a   : > { %2212 = vmatprep.mubr.msk.bf16.mxu1 %vm2348_vm0, %v2347_v1 }
  0x6b   : > { %2195 = vmatpush3.bf16.msra.mxu0 %v2317_v16 }
  0x6c   : > { %2207 = vmatpush3.bf16.msra.mxu1 %v2318_v17  ;;  %2196 = vmatprep.subr.bf16.mxu0 %v2347_v1 }
  0x6d   : > { %2208 = vmatprep.subr.bf16.mxu1 %v2347_v1 }
  0x6f   : > { %2197 = vmatpush3.bf16.msra.mxu0 %v2319_v18 }
  0x70   : > { %2209 = vmatpush3.bf16.msra.mxu1 %v2320_v21  ;;  %2198 = vmatprep.subr.bf16.mxu0 %v2347_v1 }
  0x71   : > { %2210 = vmatprep.subr.bf16.mxu1 %v2347_v1 }
  0x73   : > { %2199 = vmatpush3.bf16.msra.mxu0 %v2321_v24 }
  0x74   : > { %2211 = vmatpush3.bf16.msra.mxu1 %v2322_v27  ;;  %2216 = vmatprep.subr.bf16.mxu0 %v2347_v1 }
  0x75   : > { %2228 = vmatprep.subr.bf16.mxu1 %v2347_v1 }
  0x76   : > { %2201 = vmatmul.mubr.msk.bf16.vlgmr.msra.gmra.mrb[24].mxu0 %vm223_vm1, %v1258_v30 }
  0x77   : > { %2213 = vmatmul.mubr.msk.bf16.vlgmr.msra.gmra.mrb[24].mxu1 %vm223_vm1, %v1351_v32  ;;  %2217 = vmatpush3.bf16.msra.mxu0 %v2327_v31 }
  0x78   : > { %2229 = vmatpush3.bf16.msra.mxu1 %v2328_v33  ;;  %2218 = vmatprep.subr.bf16.mxu0 %v2347_v1 }
  0x79   : > { %2230 = vmatprep.subr.bf16.mxu1 %v2347_v1  ;;  %2224 = vmatprep.mubr.msk.bf16.mxu0 %vm2348_vm0, %v2347_v1 }
  0x7a   : > { %2236 = vmatprep.mubr.msk.bf16.mxu1 %vm2348_vm0, %v2347_v1 }
  0x7b   : > { %2219 = vmatpush3.bf16.msra.mxu0 %v2329_v34 }
  0x7c   : > { %2231 = vmatpush3.bf16.msra.mxu1 %v2330_v35  ;;  %2220 = vmatprep.subr.bf16.mxu0 %v2347_v1 }
  0x7d   : > { %2232 = vmatprep.subr.bf16.mxu1 %v2347_v1 }
  0x7f   : > { %2221 = vmatpush3.bf16.msra.mxu0 %v2331_v36 }
  0x80   : > { %2233 = vmatpush3.bf16.msra.mxu1 %v2332_v39  ;;  %2222 = vmatprep.subr.bf16.mxu0 %v2347_v1 }
  0x81   : > { %2234 = vmatprep.subr.bf16.mxu1 %v2347_v1 }
  0x83   : > { %2223 = vmatpush3.bf16.msra.mxu0 %v2333_v42 }
  0x84   : > { %2235 = vmatpush3.bf16.msra.mxu1 %v2334_v45 }
  0x86   : > { %2225 = vmatmul.mubr.msk.bf16.vlgmr.msra.gmra.mrb[28].mxu0 %vm223_vm1, %v1444_v48 }
  0x87   : > { %2237 = vmatmul.mubr.msk.bf16.vlgmr.msra.gmra.mrb[28].mxu1 %vm223_vm1, %v1537_v49 }
  0xe9   : > { %v261_v50 = vpop.f32.mrb[0].mxu0 }
  0xea   : > { %v334_v51 = vpop.f32.mrb[0].mxu1  ;;  %v2058_v52 = vpop.f32.mrb[1].mxu0 }
  0xeb   : > { %v335_v53 = vadd.f32 %v334_v51, %v261_v50  ;;  %v2070_v54 = vpop.f32.mrb[1].mxu1  ;;  %v264_v55 = vpop.f32.mrb[2].mxu0 }
  0xec   : > { %v337_v56 = vpop.f32.mrb[2].mxu1  ;;  %v2059_v57 = vpop.f32.mrb[3].mxu0 }
  0xed   : > { %v338_v58 = vadd.f32 %v337_v56, %v264_v55  ;;  %v2071_v1 = vpop.f32.mrb[3].mxu1 }
  0xf9   : > { %v419_v59 = vpop.f32.mrb[4].mxu0 }
  0xfa   : > { %v426_v60 = vadd.f32 %v419_v59, %v335_v53  ;;  %v506_v61 = vpop.f32.mrb[4].mxu1  ;;  %v2082_v62 = vpop.f32.mrb[5].mxu0 }
  0xfb   : > { %v2094_v63 = vpop.f32.mrb[5].mxu1  ;;  %v422_v0 = vpop.f32.mrb[6].mxu0 }
  0xfc   : > { %v513_v2 = vadd.f32 %v506_v61, %v426_v60  ;;  %v427_v3 = vadd.f32 %v422_v0, %v338_v58  ;;  %v509_v4 = vpop.f32.mrb[6].mxu1  ;;  %v2083_v5 = vpop.f32.mrb[7].mxu0 }
  0xfd   : > { %v2095_v6 = vpop.f32.mrb[7].mxu1 }
  0xfe   : > { %v514_v7 = vadd.f32 %v509_v4, %v427_v3 }
 0x109   : > { %v593_v8 = vpop.f32.mrb[8].mxu0 }
 0x10a   : > { %v600_v9 = vadd.f32 %v593_v8, %v513_v2  ;;  %v680_v10 = vpop.f32.mrb[8].mxu1  ;;  %v2106_v11 = vpop.f32.mrb[9].mxu0  ;;  %v1955_v8 = vld [vmem:[%s2733_s2] ss:$0 sm:$0xff] }
 0x10b   : > { %v2118_v12 = vpop.f32.mrb[9].mxu1  ;;  %v596_v13 = vpop.f32.mrb[10].mxu0 }
 0x10c   : > { %v687_v14 = vadd.f32 %v680_v10, %v600_v9  ;;  %v601_v15 = vadd.f32 %v596_v13, %v514_v7  ;;  %v683_v16 = vpop.f32.mrb[10].mxu1  ;;  %v2107_v17 = vpop.f32.mrb[11].mxu0 }
 0x10d   : > { %v2119_v18 = vpop.f32.mrb[11].mxu1 }
 0x10e   : > { %v688_v19 = vadd.f32 %v683_v16, %v601_v15 }
 0x119   : > { %v767_v20 = vpop.f32.mrb[12].mxu0 }
 0x11a   : > { %v774_v21 = vadd.f32 %v767_v20, %v687_v14  ;;  %v854_v22 = vpop.f32.mrb[12].mxu1  ;;  %v2130_v23 = vpop.f32.mrb[13].mxu0 }
 0x11b   : > { %v2142_v24 = vpop.f32.mrb[13].mxu1  ;;  %v770_v25 = vpop.f32.mrb[14].mxu0 }
 0x11c   : > { %v861_v26 = vadd.f32 %v854_v22, %v774_v21  ;;  %v775_v27 = vadd.f32 %v770_v25, %v688_v19  ;;  %v857_v28 = vpop.f32.mrb[14].mxu1  ;;  %v2131_v29 = vpop.f32.mrb[15].mxu0 }
 0x11d   : > { %v2143_v30 = vpop.f32.mrb[15].mxu1 }
 0x11e   : > { %v862_v31 = vadd.f32 %v857_v28, %v775_v27 }
 0x129   : > { %v948_v32 = vpop.f32.mrb[16].mxu0 }
 0x12a   : > { %v955_v33 = vadd.f32 %v948_v32, %v861_v26  ;;  %v1041_v34 = vpop.f32.mrb[16].mxu1  ;;  %v2154_v35 = vpop.f32.mrb[17].mxu0 }
 0x12b   : > { %v2166_v36 = vpop.f32.mrb[17].mxu1  ;;  %v951_v37 = vpop.f32.mrb[18].mxu0 }
 0x12c   : > { %v1048_v38 = vadd.f32 %v1041_v34, %v955_v33  ;;  %v956_v39 = vadd.f32 %v951_v37, %v862_v31  ;;  %v1044_v40 = vpop.f32.mrb[18].mxu1  ;;  %v2155_v41 = vpop.f32.mrb[19].mxu0 }
 0x12d   : > { %v2167_v42 = vpop.f32.mrb[19].mxu1 }
 0x12e   : > { %v1049_v43 = vadd.f32 %v1044_v40, %v956_v39 }
 0x139   : > { %v1134_v44 = vpop.f32.mrb[20].mxu0 }
 0x13a   : > { %v1141_v45 = vadd.f32 %v1134_v44, %v1048_v38  ;;  %v1227_v46 = vpop.f32.mrb[20].mxu1  ;;  %v2178_v47 = vpop.f32.mrb[21].mxu0 }
 0x13b   : > { %v2190_v48 = vpop.f32.mrb[21].mxu1  ;;  %v1137_v49 = vpop.f32.mrb[22].mxu0 }
 0x13c   : > { %v1234_v50 = vadd.f32 %v1227_v46, %v1141_v45  ;;  %v1142_v51 = vadd.f32 %v1137_v49, %v1049_v43  ;;  %v1230_v52 = vpop.f32.mrb[22].mxu1  ;;  %v2179_v53 = vpop.f32.mrb[23].mxu0 }
 0x13d   : > { %v2191_v54 = vpop.f32.mrb[23].mxu1 }
 0x13e   : > { %v1235_v55 = vadd.f32 %v1230_v52, %v1142_v51 }
 0x149   : > { %v1320_v56 = vpop.f32.mrb[24].mxu0 }
 0x14a   : > { %v1327_v57 = vadd.f32 %v1320_v56, %v1234_v50  ;;  %v1413_v58 = vpop.f32.mrb[24].mxu1  ;;  %v2202_v1 = vpop.f32.mrb[25].mxu0 }
 0x14b   : > { %v2214_v59 = vpop.f32.mrb[25].mxu1  ;;  %v1323_v60 = vpop.f32.mrb[26].mxu0 }
 0x14c   : > { %v1420_v61 = vadd.f32 %v1413_v58, %v1327_v57  ;;  %v1328_v62 = vadd.f32 %v1323_v60, %v1235_v55  ;;  %v1416_v63 = vpop.f32.mrb[26].mxu1  ;;  %v2203_v0 = vpop.f32.mrb[27].mxu0 }
 0x14d   : > { %v2215_v2 = vpop.f32.mrb[27].mxu1 }
 0x14e   : > { %v1421_v3 = vadd.f32 %v1416_v63, %v1328_v62 }
 0x159   : > { %v1506_v4 = vpop.f32.mrb[28].mxu0 }
 0x15a   : > { %v1513_v5 = vadd.f32 %v1506_v4, %v1420_v61  ;;  %v1599_v6 = vpop.f32.mrb[28].mxu1  ;;  %v2226_v7 = vpop.f32.mrb[29].mxu0 }
 0x15b   : > { %v2238_v9 = vpop.f32.mrb[29].mxu1  ;;  %v1509_v10 = vpop.f32.mrb[30].mxu0 }
 0x15c   : > { %v1606_v11 = vadd.f32 %v1599_v6, %v1513_v5  ;;  %v1514_v12 = vadd.f32 %v1509_v10, %v1421_v3  ;;  %v1602_v13 = vpop.f32.mrb[30].mxu1  ;;  %v2227_v14 = vpop.f32.mrb[31].mxu0 }
 0x15d   : > { %v2239_v15 = vpop.f32.mrb[31].mxu1 }
 0x15e   : > { %v1615_v16 = vadd.f32 %v1955_v8, %v1606_v11  ;;  %v1607_v17 = vadd.f32 %v1602_v13, %v1514_v12 }
 0x160   : > { %v1619_v18 = vmul.f32 0.01, %v1615_v16  ;;  %v1616_v19 = vadd.f32 %v1955_v8, %v1607_v17  ;;  %vm1617_vm3 = vcmp.gt.f32.partialorder %v1615_v16, 0.0 }
 0x162   : > { %vm1618_vm4 = vcmp.gt.f32.partialorder %v1616_v19, 0.0  ;;  %v1620_v20 = vmul.f32 0.01, %v1616_v19  ;;  %v1621_v21 = vsel %vm1617_vm3, %v1615_v16, %v1619_v18 }
 0x164   : > { %v1622_v22 = vsel %vm1618_vm4, %v1616_v19, %v1620_v20 }
 0x165   : > { %v1966_v23 = vpack.c.bf16 %v1622_v22, %v1621_v21 }
 0x167   : > { %1967 = vst [vmem:[%s170_s30] sm:$0xff] %v1966_v23  }
 0x168 PF: > { %s13_s12 = sadd.s32 1, %s2345_s12  }
 0x169   : > { %p10_p4 = scmp.ge.s32.totalorder %s13_s12, 4  }
 0x16b   :  { %12 = sbr.rel (!%p10_p4) target bundleno = 1 (0x1), region = 84 }

// kernel: bc_image_only_forward.7
= control target key start
LH: loop header
LB: loop body
LE: loop exit
PB: predicated region body
PF: predicated region fallthrough
CT: control target
= control target key end

     0   :  { %v2016_v7 = vmov 1966171168   ;;  %v168_v9 = vlaneseq  ;;  %s2646_s0 = inlined_call_operand.vmem [shape: bf16[2,1024], index: 0, kind: input, shape index: {}]   ;;  %s2647_s1 = inlined_call_operand.vmem [shape: bf16[1024,256], index: 1, kind: input, shape index: {}]   ;;  %s2648_s2 = inlined_call_operand.vmem [shape: f32[1,256], index: 2, kind: input, shape index: {}]   ;;  %s2649_s3 = inlined_call_operand.vmem [shape: bf16[256,256], index: 3, kind: input, shape index: {}]   ;;  %s2650_s4 = inlined_call_operand.vmem [shape: f32[1,256], index: 4, kind: input, shape index: {}]   ;;  %s2651_s5 = inlined_call_operand.vmem [shape: bf16[256,32], index: 5, kind: input, shape index: {}]   ;;  %s2652_s6 = inlined_call_operand.vmem [shape: f32[1,32], index: 6, kind: input, shape index: {}]   ;;  %s2653_s7 = inlined_call_operand.hbm [shape: f32[2,32], index: 7, kind: output, shape index: {}]  }
   0x1   :  { %v1735_v0 = vld [vmem:[%s2647_s1 + $0x104] ss:$8 sps:$4 sm:$0xff]   ;;  %v1737_v1 = vld [vmem:[%s2647_s1 + $0x100] ss:$8 sps:$4 sm:$0xff]   ;;  %v1738_v2 = vld [vmem:[%s2647_s1 + $0x114] ss:$8 sps:$4 sm:$0xff]   ;;  %v166_v8 = vunpack.c.l.s4 %v2016_v7 }
   0x2   :  { %902 = vmatprep.subr.bf16.mxu0 %v1735_v0  ;;  %v1740_v3 = vld [vmem:[%s2647_s1 + $0x110] ss:$8 sps:$4 sm:$0xff]   ;;  %v1741_v4 = vld [vmem:[%s2647_s1 + $0x124] ss:$8 sps:$4 sm:$0xff]   ;;  %v1743_v5 = vld [vmem:[%s2647_s1 + $0x120] ss:$8 sps:$4 sm:$0xff]  }
   0x3   :  { %903 = vmatpush1.bf16.msra.mxu0 %v1737_v1  ;;  %v1744_v6 = vld [vmem:[%s2647_s1 + $0x134] ss:$8 sps:$4 sm:$0xff]   ;;  %v1746_v10 = vld [vmem:[%s2647_s1 + $0x130] ss:$8 sps:$4 sm:$0xff]   ;;  %v1747_v11 = vld [vmem:[%s2647_s1 + $0x144] ss:$8 sps:$4 sm:$0xff]   ;;  %v167_v12 = vunpack.c.0.s8 %v166_v8 }
   0x4   :  { %904 = vmatprep.subr.bf16.mxu0 %v1738_v2  ;;  %v2087_v13 = vshrl.u32 %v168_v9, 7  ;;  %v1749_v14 = vld [vmem:[%s2647_s1 + $0x140] ss:$8 sps:$4 sm:$0xff]   ;;  %v1750_v15 = vld [vmem:[%s2647_s1 + $0x154] ss:$8 sps:$4 sm:$0xff]  }
   0x5   :  { %v1752_v17 = vld [vmem:[%s2647_s1 + $0x150] ss:$8 sps:$4 sm:$0xff]   ;;  %v1753_v18 = vld [vmem:[%s2647_s1 + $0x164] ss:$8 sps:$4 sm:$0xff]   ;;  %v1755_v22 = vld [vmem:[%s2647_s1 + $0x160] ss:$8 sps:$4 sm:$0xff]  }
   0x6   :  { %v2096_v16 = vsub.s32 %v167_v12, %v2087_v13  ;;  %v34_v19 = vld [vmem:[%s2646_s0] sm:$0xff]  ;;  %v1756_v23 = vld [vmem:[%s2647_s1 + $0x174] ss:$8 sps:$4 sm:$0xff]   ;;  %v1758_v28 = vld [vmem:[%s2647_s1 + $0x170] ss:$8 sps:$4 sm:$0xff]  }
   0x7   :  { %905 = vmatpush1.bf16.msra.mxu0 %v1740_v3  ;;  %v164_v20 = vcombine.high %v34_v19, %v34_v19  ;;  %v1759_v29 = vld [vmem:[%s2647_s1 + $0x184] ss:$8 sps:$4 sm:$0xff]   ;;  %v1761_v31 = vld [vmem:[%s2647_s1 + $0x180] ss:$8 sps:$4 sm:$0xff]   ;;  %v1762_v32 = vld [vmem:[%s2647_s1 + $0x194] ss:$8 sps:$4 sm:$0xff]  }
   0x8   :  { %906 = vmatprep.subr.bf16.mxu0 %v1741_v4  ;;  %v171_v21 = vrot.slane %v34_v19, %v2096_v16  ;;  %v1764_v33 = vld [vmem:[%s2647_s1 + $0x190] ss:$8 sps:$4 sm:$0xff]   ;;  %v1765_v34 = vld [vmem:[%s2647_s1 + $0x1a4] ss:$8 sps:$4 sm:$0xff]   ;;  %v1767_v35 = vld [vmem:[%s2647_s1 + $0x1a0] ss:$8 sps:$4 sm:$0xff]  }
   0x9   :  { %v2115_v25 = vrot.slane %v164_v20, %v2096_v16  ;;  %v1768_v36 = vld [vmem:[%s2647_s1 + $0x1b4] ss:$8 sps:$4 sm:$0xff]   ;;  %v1770_v37 = vld [vmem:[%s2647_s1 + $0x1b0] ss:$8 sps:$4 sm:$0xff]   ;;  %v1771_v38 = vld [vmem:[%s2647_s1 + $0x1c4] ss:$8 sps:$4 sm:$0xff]  }
   0xa   :  { %v179_v24 = vcombine.high %v171_v21, %v171_v21  ;;  %v1832_v39 = vld [vmem:[%s2647_s1 + $0x4] ss:$8 sps:$4 sm:$0xff]   ;;  %v1834_v40 = vld [vmem:[%s2647_s1] ss:$8 sps:$4 sm:$0xff]   ;;  %v1838_v41 = vld [vmem:[%s2647_s1 + $0x14] ss:$8 sps:$4 sm:$0xff]   ;;  %v2201_v55 = vrot.slane %v171_v21, %v2096_v16 }
   0xb   :  { %907 = vmatpush1.bf16.msra.mxu0 %v1743_v5  ;;  %v2120_v27 = vrot.slane %v2115_v25, %v2096_v16  ;;  %861 = vmatprep.subr.bf16.mxu1 %v1832_v39  ;;  %v1840_v42 = vld [vmem:[%s2647_s1 + $0x10] ss:$8 sps:$4 sm:$0xff]   ;;  %v1773_v43 = vld [vmem:[%s2647_s1 + $0x1c0] ss:$8 sps:$4 sm:$0xff]   ;;  %v1774_v44 = vld [vmem:[%s2647_s1 + $0x1d4] ss:$8 sps:$4 sm:$0xff]   ;;  %v180_v57 = vcombine.high %v2115_v25, %v2115_v25 }
   0xc   :  { %908 = vmatprep.subr.bf16.mxu0 %v1744_v6  ;;  %v201_v26 = vrot.slane %v179_v24, %v2096_v16  ;;  %862 = vmatpush1.bf16.msra.mxu1 %v1834_v40  ;;  %v1844_v45 = vld [vmem:[%s2647_s1 + $0x24] ss:$8 sps:$4 sm:$0xff]   ;;  %v1776_v46 = vld [vmem:[%s2647_s1 + $0x1d0] ss:$8 sps:$4 sm:$0xff]   ;;  %v1846_v47 = vld [vmem:[%s2647_s1 + $0x20] ss:$8 sps:$4 sm:$0xff]   ;;  %v209_v61 = vcombine.high %v2201_v55, %v2201_v55 }
   0xd   :  { %863 = vmatprep.subr.bf16.mxu1 %v1838_v41  ;;  %v1850_v48 = vld [vmem:[%s2647_s1 + $0x34] ss:$8 sps:$4 sm:$0xff]   ;;  %v1777_v49 = vld [vmem:[%s2647_s1 + $0x1e4] ss:$8 sps:$4 sm:$0xff]   ;;  %v1779_v50 = vld [vmem:[%s2647_s1 + $0x1e0] ss:$8 sps:$4 sm:$0xff]   ;;  %v2226_v0 = vrot.slane %v180_v57, %v2096_v16 }
   0xe   :  { %v211_v30 = vcombine.high %v201_v26, %v201_v26  ;;  %893 = vmatprep.mubr.bf16.mxu1 %v201_v26  ;;  %v1852_v51 = vld [vmem:[%s2647_s1 + $0x30] ss:$8 sps:$4 sm:$0xff]   ;;  %v1856_v52 = vld [vmem:[%s2647_s1 + $0x44] ss:$8 sps:$4 sm:$0xff]   ;;  %v1780_v53 = vld [vmem:[%s2647_s1 + $0x1f4] ss:$8 sps:$4 sm:$0xff]  }
   0xf   :  { %909 = vmatpush1.bf16.msra.mxu0 %v1746_v10  ;;  %v1782_v54 = vld [vmem:[%s2647_s1 + $0x1f0] ss:$8 sps:$4 sm:$0xff]   ;;  %v1858_v56 = vld [vmem:[%s2647_s1 + $0x40] ss:$8 sps:$4 sm:$0xff]   ;;  %v1862_v58 = vld [vmem:[%s2647_s1 + $0x54] ss:$8 sps:$4 sm:$0xff]  }
  0x10   :  { %910 = vmatprep.subr.bf16.mxu0 %v1747_v11  ;;  %934 = vmatprep.mubr.bf16.mxu0 %v211_v30  ;;  %v1786_v59 = vld [vmem:[%s2647_s1 + $0x204] ss:$8 sps:$4 sm:$0xff]   ;;  %v1784_v60 = vld [vmem:[%s2647_s1 + $0x200] ss:$8 sps:$4 sm:$0xff]   ;;  %v1864_v62 = vld [vmem:[%s2647_s1 + $0x50] ss:$8 sps:$4 sm:$0xff]  }
  0x11   :  { %864 = vmatpush1.bf16.msra.mxu1 %v1840_v42  ;;  %v1789_v63 = vld [vmem:[%s2647_s1 + $0x214] ss:$8 sps:$4 sm:$0xff]   ;;  %v1868_v1 = vld [vmem:[%s2647_s1 + $0x64] ss:$8 sps:$4 sm:$0xff]   ;;  %v1787_v2 = vld [vmem:[%s2647_s1 + $0x210] ss:$8 sps:$4 sm:$0xff]  }
  0x12   :  { %865 = vmatprep.subr.bf16.mxu1 %v1844_v45  ;;  %v1870_v3 = vld [vmem:[%s2647_s1 + $0x60] ss:$8 sps:$4 sm:$0xff]   ;;  %v1874_v4 = vld [vmem:[%s2647_s1 + $0x74] ss:$8 sps:$4 sm:$0xff]   ;;  %v1792_v5 = vld [vmem:[%s2647_s1 + $0x224] ss:$8 sps:$4 sm:$0xff]  }
  0x13   :  { %911 = vmatpush1.bf16.msra.mxu0 %v1749_v14  ;;  %v1790_v6 = vld [vmem:[%s2647_s1 + $0x220] ss:$8 sps:$4 sm:$0xff]   ;;  %v1876_v7 = vld [vmem:[%s2647_s1 + $0x70] ss:$8 sps:$4 sm:$0xff]   ;;  %v1880_v8 = vld [vmem:[%s2647_s1 + $0x84] ss:$8 sps:$4 sm:$0xff]  }
  0x14   :  { %912 = vmatprep.subr.bf16.mxu0 %v1750_v15  ;;  %v1795_v9 = vld [vmem:[%s2647_s1 + $0x234] ss:$8 sps:$4 sm:$0xff]   ;;  %v1793_v10 = vld [vmem:[%s2647_s1 + $0x230] ss:$8 sps:$4 sm:$0xff]   ;;  %v1882_v11 = vld [vmem:[%s2647_s1 + $0x80] ss:$8 sps:$4 sm:$0xff]  }
  0x15   :  { %866 = vmatpush1.bf16.msra.mxu1 %v1846_v47  ;;  %v1886_v12 = vld [vmem:[%s2647_s1 + $0x94] ss:$8 sps:$4 sm:$0xff]   ;;  %v1798_v14 = vld [vmem:[%s2647_s1 + $0x244] ss:$8 sps:$4 sm:$0xff]   ;;  %v1796_v15 = vld [vmem:[%s2647_s1 + $0x240] ss:$8 sps:$4 sm:$0xff]  }
  0x16   :  { %867 = vmatprep.subr.bf16.mxu1 %v1850_v48  ;;  %v1888_v16 = vld [vmem:[%s2647_s1 + $0x90] ss:$8 sps:$4 sm:$0xff]   ;;  %v1894_v20 = vld [vmem:[%s2647_s1 + $0xa0] ss:$8 sps:$4 sm:$0xff]   ;;  %v1898_v21 = vld [vmem:[%s2647_s1 + $0xb4] ss:$8 sps:$4 sm:$0xff]  }
  0x17   :  { %913 = vmatpush1.bf16.msra.mxu0 %v1752_v17  ;;  %v1892_v17 = vld [vmem:[%s2647_s1 + $0xa4] ss:$8 sps:$4 sm:$0xff]   ;;  %v1799_v19 = vld [vmem:[%s2647_s1 + $0x250] ss:$8 sps:$4 sm:$0xff]   ;;  %v1807_v26 = vld [vmem:[%s2647_s1 + $0x274] ss:$8 sps:$4 sm:$0xff]  }
  0x18   :  { %914 = vmatprep.subr.bf16.mxu0 %v1753_v18  ;;  %v1801_v18 = vld [vmem:[%s2647_s1 + $0x254] ss:$8 sps:$4 sm:$0xff]   ;;  %v1900_v24 = vld [vmem:[%s2647_s1 + $0xb0] ss:$8 sps:$4 sm:$0xff]   ;;  %v1904_v25 = vld [vmem:[%s2647_s1 + $0xc4] ss:$8 sps:$4 sm:$0xff]  }
  0x19   :  { %868 = vmatpush1.bf16.msra.mxu1 %v1852_v51  ;;  %v1910_v30 = vld [vmem:[%s2647_s1 + $0xd4] ss:$8 sps:$4 sm:$0xff]   ;;  %v1816_v39 = vld [vmem:[%s2647_s1 + $0x2a4] ss:$8 sps:$4 sm:$0xff]   ;;  %v1924_v40 = vld [vmem:[%s2647_s1 + $0xf0] ss:$8 sps:$4 sm:$0xff]  }
  0x1a   :  { %869 = vmatprep.subr.bf16.mxu1 %v1856_v52  ;;  %v1814_v41 = vld [vmem:[%s2647_s1 + $0x2a0] ss:$8 sps:$4 sm:$0xff]   ;;  %v1930_v42 = vld [vmem:[%s2649_s3 + $0x4] ss:$8 sps:$4 sm:$0xff]   ;;  %v1817_v45 = vld [vmem:[%s2647_s1 + $0x2b0] ss:$8 sps:$4 sm:$0xff]  }
  0x1b   :  { %915 = vmatpush1.bf16.msra.mxu0 %v1755_v22  ;;  %v1804_v22 = vld [vmem:[%s2647_s1 + $0x264] ss:$8 sps:$4 sm:$0xff]   ;;  %v1931_v48 = vld [vmem:[%s2649_s3 + $0x10] ss:$8 sps:$4 sm:$0xff]   ;;  %v1825_v51 = vld [vmem:[%s2647_s1 + $0x2d4] ss:$8 sps:$4 sm:$0xff]  }
  0x1c   :  { %916 = vmatprep.subr.bf16.mxu0 %v1756_v23  ;;  %v1802_v23 = vld [vmem:[%s2647_s1 + $0x260] ss:$8 sps:$4 sm:$0xff]   ;;  %v1822_v47 = vld [vmem:[%s2647_s1 + $0x2c4] ss:$8 sps:$4 sm:$0xff]  }
  0x1d   :  { %870 = vmatpush1.bf16.msra.mxu1 %v1858_v56 }
  0x1e   :  { %871 = vmatprep.subr.bf16.mxu1 %v1862_v58 }
  0x1f   :  { %917 = vmatpush1.bf16.msra.mxu0 %v1758_v28  ;;  %v1805_v28 = vld [vmem:[%s2647_s1 + $0x270] ss:$8 sps:$4 sm:$0xff]  }
  0x20   :  { %918 = vmatprep.subr.bf16.mxu0 %v1759_v29  ;;  %v1906_v29 = vld [vmem:[%s2647_s1 + $0xc0] ss:$8 sps:$4 sm:$0xff]  }
  0x21   :  { %872 = vmatpush1.bf16.msra.mxu1 %v1864_v62 }
  0x22   :  { %873 = vmatprep.subr.bf16.mxu1 %v1868_v1 }
  0x23   :  { %919 = vmatpush1.bf16.msra.mxu0 %v1761_v31  ;;  %v1810_v31 = vld [vmem:[%s2647_s1 + $0x284] ss:$8 sps:$4 sm:$0xff]  }
  0x24   :  { %920 = vmatprep.subr.bf16.mxu0 %v1762_v32  ;;  %v1808_v32 = vld [vmem:[%s2647_s1 + $0x280] ss:$8 sps:$4 sm:$0xff]  }
  0x25   :  { %874 = vmatpush1.bf16.msra.mxu1 %v1870_v3 }
  0x26   :  { %875 = vmatprep.subr.bf16.mxu1 %v1874_v4 }
  0x27   :  { %921 = vmatpush1.bf16.msra.mxu0 %v1764_v33  ;;  %v1813_v33 = vld [vmem:[%s2647_s1 + $0x294] ss:$8 sps:$4 sm:$0xff]  }
  0x28   :  { %922 = vmatprep.subr.bf16.mxu0 %v1765_v34  ;;  %v1912_v34 = vld [vmem:[%s2647_s1 + $0xd0] ss:$8 sps:$4 sm:$0xff]  }
  0x29   :  { %876 = vmatpush1.bf16.msra.mxu1 %v1876_v7 }
  0x2a   :  { %877 = vmatprep.subr.bf16.mxu1 %v1880_v8 }
  0x2b   :  { %923 = vmatpush1.bf16.msra.mxu0 %v1767_v35  ;;  %v1916_v35 = vld [vmem:[%s2647_s1 + $0xe4] ss:$8 sps:$4 sm:$0xff]  }
  0x2c   :  { %924 = vmatprep.subr.bf16.mxu0 %v1768_v36  ;;  %v1918_v36 = vld [vmem:[%s2647_s1 + $0xe0] ss:$8 sps:$4 sm:$0xff]  }
  0x2d   :  { %878 = vmatpush1.bf16.msra.mxu1 %v1882_v11 }
  0x2e   :  { %879 = vmatprep.subr.bf16.mxu1 %v1886_v12 }
  0x2f   :  { %925 = vmatpush1.bf16.msra.mxu0 %v1770_v37  ;;  %v1811_v37 = vld [vmem:[%s2647_s1 + $0x290] ss:$8 sps:$4 sm:$0xff]  }
  0x30   :  { %926 = vmatprep.subr.bf16.mxu0 %v1771_v38  ;;  %v1922_v38 = vld [vmem:[%s2647_s1 + $0xf4] ss:$8 sps:$4 sm:$0xff]  }
  0x31   :  { %880 = vmatpush1.bf16.msra.mxu1 %v1888_v16 }
  0x32   :  { %881 = vmatprep.subr.bf16.mxu1 %v1892_v17 }
  0x33   :  { %927 = vmatpush1.bf16.msra.mxu0 %v1773_v43  ;;  %v1819_v43 = vld [vmem:[%s2647_s1 + $0x2b4] ss:$8 sps:$4 sm:$0xff]  }
  0x34   :  { %928 = vmatprep.subr.bf16.mxu0 %v1774_v44  ;;  %v1928_v44 = vld [vmem:[%s2649_s3] ss:$8 sps:$4 sm:$0xff]  }
  0x35   :  { %882 = vmatpush1.bf16.msra.mxu1 %v1894_v20 }
  0x36   :  { %883 = vmatprep.subr.bf16.mxu1 %v1898_v21 }
  0x37   :  { %929 = vmatpush1.bf16.msra.mxu0 %v1776_v46  ;;  %v1933_v46 = vld [vmem:[%s2649_s3 + $0x14] ss:$8 sps:$4 sm:$0xff]  }
  0x38   :  { %930 = vmatprep.subr.bf16.mxu0 %v1777_v49  ;;  %v1820_v49 = vld [vmem:[%s2647_s1 + $0x2c0] ss:$8 sps:$4 sm:$0xff]  }
  0x39   :  { %884 = vmatpush1.bf16.msra.mxu1 %v1900_v24 }
  0x3a   :  { %885 = vmatprep.subr.bf16.mxu1 %v1904_v25 }
  0x3b   :  { %931 = vmatpush1.bf16.msra.mxu0 %v1779_v50  ;;  %v1936_v50 = vld [vmem:[%s2649_s3 + $0x24] ss:$8 sps:$4 sm:$0xff]  }
  0x3c   :  { %932 = vmatprep.subr.bf16.mxu0 %v1780_v53 }
  0x3d   :  { %886 = vmatpush1.bf16.msra.mxu1 %v1906_v29 }
  0x3e   :  { %887 = vmatprep.subr.bf16.mxu1 %v1910_v30 }
  0x3f   :  { %933 = vmatpush1.bf16.msra.mxu0 %v1782_v54 }
  0x40   :  { %943 = vmatprep.subr.bf16.mxu0 %v1786_v59 }
  0x41   :  { %888 = vmatpush1.bf16.msra.mxu1 %v1912_v34 }
  0x42   :  { %935 = vmatmul.mubr.bf16.vlgmr.msra.gmra.mrb[0].mxu0 %v209_v61  ;;  %889 = vmatprep.subr.bf16.mxu1 %v1916_v35 }
  0x43   :  { %944 = vmatpush1.bf16.msra.mxu0 %v1784_v60  ;;  %975 = vmatprep.mubr.bf16.mxu0 %v2226_v0 }
  0x44   :  { %945 = vmatprep.subr.bf16.mxu0 %v1789_v63 }
  0x45   :  { %890 = vmatpush1.bf16.msra.mxu1 %v1918_v36 }
  0x46   :  { %891 = vmatprep.subr.bf16.mxu1 %v1922_v38 }
  0x47   :  { %946 = vmatpush1.bf16.msra.mxu0 %v1787_v2 }
  0x48   :  { %947 = vmatprep.subr.bf16.mxu0 %v1792_v5 }
  0x49   :  { %892 = vmatpush1.bf16.msra.mxu1 %v1924_v40 }
  0x4a   :  { %1282 = vmatprep.subr.bf16.mxu1 %v1930_v42 }
  0x4b   :  { %948 = vmatpush1.bf16.msra.mxu0 %v1790_v6 }
  0x4c   :  { %949 = vmatprep.subr.bf16.mxu0 %v1795_v9  ;;  %894 = vmatmul.mubr.bf16.vlgmr.msra.gmra.mrb[0].mxu1 %v2201_v55 }
  0x4d   :  { %1283 = vmatpush1.bf16.msra.mxu1 %v1928_v44 }
  0x4e   :  { %1284 = vmatprep.subr.bf16.mxu1 %v1933_v46 }
  0x4f   :  { %950 = vmatpush1.bf16.msra.mxu0 %v1793_v10 }
  0x50   :  { %951 = vmatprep.subr.bf16.mxu0 %v1798_v14 }
  0x53   :  { %952 = vmatpush1.bf16.msra.mxu0 %v1796_v15 }
  0x54   :  { %953 = vmatprep.subr.bf16.mxu0 %v1801_v18 }
  0x57   :  { %954 = vmatpush1.bf16.msra.mxu0 %v1799_v19 }
  0x58   :  { %955 = vmatprep.subr.bf16.mxu0 %v1804_v22 }
  0x5b   :  { %956 = vmatpush1.bf16.msra.mxu0 %v1802_v23 }
  0x5c   :  { %957 = vmatprep.subr.bf16.mxu0 %v1807_v26 }
  0x5f   :  { %958 = vmatpush1.bf16.msra.mxu0 %v1805_v28 }
  0x60   :  { %959 = vmatprep.subr.bf16.mxu0 %v1810_v31 }
  0x63   :  { %960 = vmatpush1.bf16.msra.mxu0 %v1808_v32 }
  0x64   :  { %961 = vmatprep.subr.bf16.mxu0 %v1813_v33 }
  0x67   :  { %962 = vmatpush1.bf16.msra.mxu0 %v1811_v37 }
  0x68   :  { %963 = vmatprep.subr.bf16.mxu0 %v1816_v39 }
  0x6b   :  { %964 = vmatpush1.bf16.msra.mxu0 %v1814_v41 }
  0x6c   :  { %965 = vmatprep.subr.bf16.mxu0 %v1819_v43 }
  0x6f   :  { %966 = vmatpush1.bf16.msra.mxu0 %v1817_v45 }
  0x70   :  { %967 = vmatprep.subr.bf16.mxu0 %v1822_v47 }
  0x71   :  { %12 = vsyncpa [#allocation4], 0  ;;  %1285 = vmatpush1.bf16.msra.mxu1 %v1931_v48  ;;  %v1934_v52 = vld [vmem:[%s2649_s3 + $0x20] ss:$8 sps:$4 sm:$0xff]   ;;  %v1823_v53 = vld [vmem:[%s2647_s1 + $0x2d0] ss:$8 sps:$4 sm:$0xff]   ;;  %v212_v3 = vcombine.high %v2226_v0, %v2226_v0  ;;  %v210_v39 = vcombine.high %v2120_v27, %v2120_v27 }
  0x72   :  { %1286 = vmatprep.subr.bf16.mxu1 %v1936_v50  ;;  %v1939_v54 = vld [vmem:[%s2649_s3 + $0x34] ss:$8 sps:$4 sm:$0xff]   ;;  %v1828_v55 = vld [vmem:[%s2647_s1 + $0x2e4] ss:$8 sps:$4 sm:$0xff]   ;;  %v1937_v56 = vld [vmem:[%s2649_s3 + $0x30] ss:$8 sps:$4 sm:$0xff]  }
  0x73   :  { %968 = vmatpush1.bf16.msra.mxu0 %v1820_v49  ;;  %v1826_v57 = vld [vmem:[%s2647_s1 + $0x2e0] ss:$8 sps:$4 sm:$0xff]   ;;  %v1942_v58 = vld [vmem:[%s2649_s3 + $0x44] ss:$8 sps:$4 sm:$0xff]   ;;  %v1831_v59 = vld [vmem:[%s2647_s1 + $0x2f4] ss:$8 sps:$4 sm:$0xff]  }
  0x74   :  { %969 = vmatprep.subr.bf16.mxu0 %v1825_v51  ;;  %v1940_v60 = vld [vmem:[%s2649_s3 + $0x40] ss:$8 sps:$4 sm:$0xff]   ;;  %v1829_v61 = vld [vmem:[%s2647_s1 + $0x2f0] ss:$8 sps:$4 sm:$0xff]   ;;  %v1945_v62 = vld [vmem:[%s2649_s3 + $0x54] ss:$8 sps:$4 sm:$0xff]  }
  0x75   :  { %1287 = vmatpush1.bf16.msra.mxu1 %v1934_v52  ;;  %v1837_v63 = vld [vmem:[%s2647_s1 + $0x304] ss:$8 sps:$4 sm:$0xff]   ;;  %v1943_v1 = vld [vmem:[%s2649_s3 + $0x50] ss:$8 sps:$4 sm:$0xff]   ;;  %v1835_v2 = vld [vmem:[%s2647_s1 + $0x300] ss:$8 sps:$4 sm:$0xff]  }
  0x76   :  { %1288 = vmatprep.subr.bf16.mxu1 %v1939_v54  ;;  %v1843_v4 = vld [vmem:[%s2647_s1 + $0x314] ss:$8 sps:$4 sm:$0xff]   ;;  %v1948_v5 = vld [vmem:[%s2649_s3 + $0x64] ss:$8 sps:$4 sm:$0xff]   ;;  %v1946_v6 = vld [vmem:[%s2649_s3 + $0x60] ss:$8 sps:$4 sm:$0xff]  }
  0x77   :  { %970 = vmatpush1.bf16.msra.mxu0 %v1823_v53  ;;  %v1841_v0 = vld [vmem:[%s2647_s1 + $0x310] ss:$8 sps:$4 sm:$0xff]   ;;  %v1951_v7 = vld [vmem:[%s2649_s3 + $0x74] ss:$8 sps:$4 sm:$0xff]   ;;  %v1849_v8 = vld [vmem:[%s2647_s1 + $0x324] ss:$8 sps:$4 sm:$0xff]  }
  0x78   :  { %971 = vmatprep.subr.bf16.mxu0 %v1828_v55  ;;  %v1949_v9 = vld [vmem:[%s2649_s3 + $0x70] ss:$8 sps:$4 sm:$0xff]   ;;  %v1847_v10 = vld [vmem:[%s2647_s1 + $0x320] ss:$8 sps:$4 sm:$0xff]   ;;  %v1855_v11 = vld [vmem:[%s2647_s1 + $0x334] ss:$8 sps:$4 sm:$0xff]  }
  0x79   :  { %1289 = vmatpush1.bf16.msra.mxu1 %v1937_v56  ;;  %v1853_v12 = vld [vmem:[%s2647_s1 + $0x330] ss:$8 sps:$4 sm:$0xff]   ;;  %v1861_v14 = vld [vmem:[%s2647_s1 + $0x344] ss:$8 sps:$4 sm:$0xff]   ;;  %v1859_v15 = vld [vmem:[%s2647_s1 + $0x340] ss:$8 sps:$4 sm:$0xff]  }
  0x7a   :  { %1290 = vmatprep.subr.bf16.mxu1 %v1942_v58  ;;  %v1867_v16 = vld [vmem:[%s2647_s1 + $0x354] ss:$8 sps:$4 sm:$0xff]   ;;  %v1865_v17 = vld [vmem:[%s2647_s1 + $0x350] ss:$8 sps:$4 sm:$0xff]   ;;  %v1873_v18 = vld [vmem:[%s2647_s1 + $0x364] ss:$8 sps:$4 sm:$0xff]  }
  0x7b   :  { %972 = vmatpush1.bf16.msra.mxu0 %v1826_v57  ;;  %v1871_v19 = vld [vmem:[%s2647_s1 + $0x360] ss:$8 sps:$4 sm:$0xff]   ;;  %v1879_v20 = vld [vmem:[%s2647_s1 + $0x374] ss:$8 sps:$4 sm:$0xff]   ;;  %v1877_v21 = vld [vmem:[%s2647_s1 + $0x370] ss:$8 sps:$4 sm:$0xff]  }
  0x7c   :  { %973 = vmatprep.subr.bf16.mxu0 %v1831_v59  ;;  %v1885_v22 = vld [vmem:[%s2647_s1 + $0x384] ss:$8 sps:$4 sm:$0xff]   ;;  %v1883_v23 = vld [vmem:[%s2647_s1 + $0x380] ss:$8 sps:$4 sm:$0xff]   ;;  %v1891_v24 = vld [vmem:[%s2647_s1 + $0x394] ss:$8 sps:$4 sm:$0xff]  }
  0x7d   :  { %1291 = vmatpush1.bf16.msra.mxu1 %v1940_v60  ;;  %v1889_v25 = vld [vmem:[%s2647_s1 + $0x390] ss:$8 sps:$4 sm:$0xff]   ;;  %v1897_v26 = vld [vmem:[%s2647_s1 + $0x3a4] ss:$8 sps:$4 sm:$0xff]   ;;  %v1895_v28 = vld [vmem:[%s2647_s1 + $0x3a0] ss:$8 sps:$4 sm:$0xff]  }
  0x7e   :  { %1292 = vmatprep.subr.bf16.mxu1 %v1945_v62  ;;  %v1903_v29 = vld [vmem:[%s2647_s1 + $0x3b4] ss:$8 sps:$4 sm:$0xff]   ;;  %v1901_v30 = vld [vmem:[%s2647_s1 + $0x3b0] ss:$8 sps:$4 sm:$0xff]   ;;  %v1909_v31 = vld [vmem:[%s2647_s1 + $0x3c4] ss:$8 sps:$4 sm:$0xff]  }
  0x7f   :  { %974 = vmatpush1.bf16.msra.mxu0 %v1829_v61  ;;  %v1907_v32 = vld [vmem:[%s2647_s1 + $0x3c0] ss:$8 sps:$4 sm:$0xff]   ;;  %v1915_v33 = vld [vmem:[%s2647_s1 + $0x3d4] ss:$8 sps:$4 sm:$0xff]   ;;  %v1913_v34 = vld [vmem:[%s2647_s1 + $0x3d0] ss:$8 sps:$4 sm:$0xff]  }
  0x80   :  { %984 = vmatprep.subr.bf16.mxu0 %v1837_v63  ;;  %v1921_v35 = vld [vmem:[%s2647_s1 + $0x3e4] ss:$8 sps:$4 sm:$0xff]   ;;  %v1919_v36 = vld [vmem:[%s2647_s1 + $0x3e0] ss:$8 sps:$4 sm:$0xff]   ;;  %v1927_v37 = vld [vmem:[%s2647_s1 + $0x3f4] ss:$8 sps:$4 sm:$0xff]  }
  0x81   :  { %1293 = vmatpush1.bf16.msra.mxu1 %v1943_v1  ;;  %v1925_v38 = vld [vmem:[%s2647_s1 + $0x3f0] ss:$8 sps:$4 sm:$0xff]   ;;  %v1952_v40 = vld [vmem:[%s2649_s3 + $0x80] ss:$8 sps:$4 sm:$0xff]   ;;  %v1954_v41 = vld [vmem:[%s2649_s3 + $0x84] ss:$8 sps:$4 sm:$0xff]  }
  0x82   :  { %976 = vmatmul.mubr.bf16.vlgmr.msra.gmra.mrb[0].mxu0 %v2120_v27  ;;  %1294 = vmatprep.subr.bf16.mxu1 %v1948_v5  ;;  %v2017_v42 = vmov 0.0   ;;  %v1957_v43 = vld [vmem:[%s2649_s3 + $0x94] ss:$8 sps:$4 sm:$0xff]   ;;  %v1955_v27 = vld [vmem:[%s2649_s3 + $0x90] ss:$8 sps:$4 sm:$0xff]   ;;  %v1976_v56 = vld [vmem:[%s2651_s5 + $0x40] sm:$0xff]  }
  0x83   :  { %985 = vmatpush1.bf16.msra.mxu0 %v1835_v2  ;;  %1016 = vmatprep.mubr.bf16.mxu0 %v212_v3  ;;  %32 = vst [vmem:[#allocation2] sm:$0xf] %v2017_v42  ;;  %v1960_v44 = vld [vmem:[%s2649_s3 + $0xa4] ss:$8 sps:$4 sm:$0xff]   ;;  %v1958_v45 = vld [vmem:[%s2649_s3 + $0xa0] ss:$8 sps:$4 sm:$0xff]  }
  0x84   :  { %986 = vmatprep.subr.bf16.mxu0 %v1843_v4  ;;  %v1963_v46 = vld [vmem:[%s2649_s3 + $0xb4] ss:$8 sps:$4 sm:$0xff]   ;;  %v1961_v47 = vld [vmem:[%s2649_s3 + $0xb0] ss:$8 sps:$4 sm:$0xff]   ;;  %v1964_v48 = vld [vmem:[%s2649_s3 + $0xc0] ss:$8 sps:$4 sm:$0xff]  }
  0x85   :  { %1295 = vmatpush1.bf16.msra.mxu1 %v1946_v6  ;;  %v1966_v49 = vld [vmem:[%s2649_s3 + $0xc4] ss:$8 sps:$4 sm:$0xff]   ;;  %v1969_v50 = vld [vmem:[%s2649_s3 + $0xd4] ss:$8 sps:$4 sm:$0xff]   ;;  %v1967_v51 = vld [vmem:[%s2649_s3 + $0xd0] ss:$8 sps:$4 sm:$0xff]  }
  0x86   :  { %1296 = vmatprep.subr.bf16.mxu1 %v1951_v7  ;;  %v1972_v52 = vld [vmem:[%s2649_s3 + $0xe4] ss:$8 sps:$4 sm:$0xff]   ;;  %v1970_v53 = vld [vmem:[%s2649_s3 + $0xe0] ss:$8 sps:$4 sm:$0xff]   ;;  %v1975_v54 = vld [vmem:[%s2649_s3 + $0xf4] ss:$8 sps:$4 sm:$0xff]  }
  0x87   :  { %987 = vmatpush1.bf16.msra.mxu0 %v1841_v0  ;;  %v1973_v55 = vld [vmem:[%s2649_s3 + $0xf0] ss:$8 sps:$4 sm:$0xff]   ;;  %v2018_v61 = vmov 1983009808   ;;  %v1046_v6 = vsub.s32 0, %v2087_v13  ;;  %v1050_v0 = vsub.s32 1, %v2087_v13 }
  0x88   :  { %988 = vmatprep.subr.bf16.mxu0 %v1849_v8  ;;  %v1029_v62 = vunpack.c.l.s4 %v2018_v61  ;;  %v1042_v8 = vld [vmem:[%s2648_s2] sm:$0x3]  ;;  %s2019_s16 = smov [#allocation3]   ;;  %vm1506_vm3 = vcmask 254976  }
  0x89   :  { %1297 = vmatpush1.bf16.msra.mxu1 %v1949_v9  ;;  %v1110_v42 = vld [vmem:[%s2650_s4] sm:$0x3]  ;;  %s1514_s17 = sshll.u32 %s2019_s16, 4  ;;  %s1515_s17 = int_to_ptr.vmem [resolvable:$true] %s1514_s17 }
  0x8a   :  { %1298 = vmatprep.subr.bf16.mxu1 %v1954_v41  ;;  %v1030_v63 = vunpack.c.0.s8 %v1029_v62  ;;  %v1991_v41 = vld [vmem:[%s2651_s5 + $0x38] sm:$0xff]   ;;  %s1992_s18 = scalar_lea.vmem %s1515_s17, 32  ;;  %p1997_p1 = scmp.lt.s32.totalorder %s1515_s17, %s1515_s17 }
  0x8b   :  { %989 = vmatpush1.bf16.msra.mxu0 %v1847_v10  ;;  %p1993_p0 = scmp.ne.s32.totalorder %s1515_s17, %s1992_s18  ;;  %p1998_p2 = scmp.lt.s32.totalorder %s1992_s18, %s1992_s18 }
  0x8c   :  { %990 = vmatprep.subr.bf16.mxu0 %v1855_v11  ;;  %v1033_v5 = vsub.s32 %v1030_v63, %v2087_v13  ;;  %v33_v11 = vld [vmem:[#allocation2] sm:$0xf] }
  0x8d   :  { %1299 = vmatpush1.bf16.msra.mxu1 %v1952_v40  ;;  %v1990_v40 = vld [vmem:[%s2651_s5 + $0x78] sm:$0xff]   ;;  %p1999_p3 = por %p1998_p2, %p1997_p1 }
  0x8e   :  { %1300 = vmatprep.subr.bf16.mxu1 %v1957_v43  ;;  %v1115_v43 = vrot.slane %v1110_v42, %v1046_v6 }
  0x8f   :  { %991 = vmatpush1.bf16.msra.mxu0 %v1853_v12  ;;  %p2000_p4 = pnand %p1999_p3, %p1993_p0 }
  0x90   :  { %992 = vmatprep.subr.bf16.mxu0 %v1861_v14  ;;  %v1047_v14 = vrot.slane %v1042_v8, %v1046_v6 }
  0x91   :  { %1301 = vmatpush1.bf16.msra.mxu1 %v1955_v27  ;;  %v1119_v27 = vrot.slane %v1110_v42, %v1050_v0 }
  0x92   :  { %1302 = vmatprep.subr.bf16.mxu1 %v1960_v44 }
  0x93   :  { %993 = vmatpush1.bf16.msra.mxu0 %v1859_v15  ;;  %v1051_v15 = vrot.slane %v1042_v8, %v1050_v0 }
  0x94   :  { %994 = vmatprep.subr.bf16.mxu0 %v1867_v16 }
  0x95   :  { %1303 = vmatpush1.bf16.msra.mxu1 %v1958_v45 }
  0x96   :  { %1304 = vmatprep.subr.bf16.mxu1 %v1963_v46 }
  0x97   :  { %995 = vmatpush1.bf16.msra.mxu0 %v1865_v17  ;;  %v1052_v17 = vcombine.low %v1047_v14, %v1051_v15 }
  0x98   :  { %996 = vmatprep.subr.bf16.mxu0 %v1873_v18 }
  0x99   :  { %1305 = vmatpush1.bf16.msra.mxu1 %v1961_v47  ;;  %v1059_v18 = vrot.slane %v1052_v17, %v1033_v5 }
  0x9a   :  { %1306 = vmatprep.subr.bf16.mxu1 %v1966_v49 }
  0x9b   :  { %997 = vmatpush1.bf16.msra.mxu0 %v1871_v19 }
  0x9c   :  { %998 = vmatprep.subr.bf16.mxu0 %v1879_v20 }
  0x9d   :  { %1307 = vmatpush1.bf16.msra.mxu1 %v1964_v48 }
  0x9e   :  { %1308 = vmatprep.subr.bf16.mxu1 %v1969_v50 }
  0x9f   :  { %999 = vmatpush1.bf16.msra.mxu0 %v1877_v21 }
  0xa0   :  { %1000 = vmatprep.subr.bf16.mxu0 %v1885_v22 }
  0xa1   :  { %1309 = vmatpush1.bf16.msra.mxu1 %v1967_v51 }
  0xa2   :  { %1310 = vmatprep.subr.bf16.mxu1 %v1972_v52 }
  0xa3   :  { %1001 = vmatpush1.bf16.msra.mxu0 %v1883_v23 }
  0xa4   :  { %1002 = vmatprep.subr.bf16.mxu0 %v1891_v24 }
  0xa5   :  { %1311 = vmatpush1.bf16.msra.mxu1 %v1970_v53 }
  0xa6   :  { %1312 = vmatprep.subr.bf16.mxu1 %v1975_v54 }
  0xa7   :  { %1003 = vmatpush1.bf16.msra.mxu0 %v1889_v25  ;;  %v1977_v25 = vld [vmem:[%s2651_s5] sm:$0xff]  }
  0xa8   :  { %1004 = vmatprep.subr.bf16.mxu0 %v1897_v26 }
  0xa9   :  { %1313 = vmatpush1.bf16.msra.mxu1 %v1973_v55 }
  0xaa   :  { %1699 = vmatprep.subr.bf16.mxu1 %v1976_v56 }
  0xab   :  { %1005 = vmatpush1.bf16.msra.mxu0 %v1895_v28  ;;  %v1978_v28 = vld [vmem:[%s2651_s5 + $0x48] sm:$0xff]  }
  0xac   :  { %1006 = vmatprep.subr.bf16.mxu0 %v1903_v29  ;;  %v1979_v29 = vld [vmem:[%s2651_s5 + $0x8] sm:$0xff]  }
  0xaf   :  { %1007 = vmatpush1.bf16.msra.mxu0 %v1901_v30  ;;  %v1980_v30 = vld [vmem:[%s2651_s5 + $0x50] sm:$0xff]  }
  0xb0   :  { %1008 = vmatprep.subr.bf16.mxu0 %v1909_v31  ;;  %v1981_v31 = vld [vmem:[%s2651_s5 + $0x10] sm:$0xff]  }
  0xb3   :  { %1009 = vmatpush1.bf16.msra.mxu0 %v1907_v32  ;;  %v1982_v32 = vld [vmem:[%s2651_s5 + $0x58] sm:$0xff]  }
  0xb4   :  { %1010 = vmatprep.subr.bf16.mxu0 %v1915_v33  ;;  %v1983_v33 = vld [vmem:[%s2651_s5 + $0x18] sm:$0xff]  }
  0xb7   :  { %1011 = vmatpush1.bf16.msra.mxu0 %v1913_v34  ;;  %v1984_v34 = vld [vmem:[%s2651_s5 + $0x60] sm:$0xff]  }
  0xb8   :  { %1012 = vmatprep.subr.bf16.mxu0 %v1921_v35  ;;  %v1985_v35 = vld [vmem:[%s2651_s5 + $0x20] sm:$0xff]  }
  0xbb   :  { %1013 = vmatpush1.bf16.msra.mxu0 %v1919_v36  ;;  %v1986_v36 = vld [vmem:[%s2651_s5 + $0x68] sm:$0xff]  }
  0xbc   :  { %1014 = vmatprep.subr.bf16.mxu0 %v1927_v37  ;;  %v1987_v37 = vld [vmem:[%s2651_s5 + $0x28] sm:$0xff]  }
  0xbf   :  { %1015 = vmatpush1.bf16.msra.mxu0 %v1925_v38  ;;  %v1988_v38 = vld [vmem:[%s2651_s5 + $0x70] sm:$0xff]  }
  0xc2   :  { %1017 = vmatmul.mubr.bf16.vlgmr.msra.gmra.mrb[0].mxu0 %v210_v39  ;;  %v1989_v39 = vld [vmem:[%s2651_s5 + $0x30] sm:$0xff]  }
 0x11f   :  { %v895_v57 = vpop.f32.mrb[0].mxu1 }
 0x120   :  { %v897_v58 = vpop.f32.mrb[1].mxu1 }
 0x121   :  { %v899_v59 = vpop.f32.mrb[2].mxu1 }
 0x122   :  { %v900_v60 = vpop.f32.mrb[3].mxu1 }
 0x195   :  { %v1018_v1 = vpop.f32.mrb[0].mxu0 }
 0x196   :  { %v1721_v2 = vadd.f32 %v1018_v1, %v895_v57  ;;  %v1020_v3 = vpop.f32.mrb[1].mxu0  ;;  %v1682_v57 = vld [vmem:[%s2652_s6] ss:$0 sm:$0xff] }
 0x197   :  { %v1722_v4 = vadd.f32 %v1020_v3, %v897_v58  ;;  %v1022_v7 = vpop.f32.mrb[2].mxu0 }
 0x198   :  { %v1023_v9 = vpop.f32.mrb[3].mxu0 }
 0x199   :  { %v1027_v10 = vcombine.low %v1721_v2, %v1722_v4 }
 0x19b   :  { %v1034_v12 = vrot.slane %v1027_v10, %v1033_v5 }
 0x19d   :  { %v1036_v16 = vadd.f32 %v1034_v12, %v33_v11 }
 0x19f   :  { %1037 = vst [vmem:[#allocation2] sm:$0xf] %v1036_v16 }
 0x1a6   :  { %v1041_v19 = vld [vmem:[#allocation2] sm:$0xf] }
 0x1a7   :  { %v1061_v20 = vadd.f32 %v1059_v18, %v1041_v19 }
 0x1a9   :  { %vm1062_vm0 = vcmp.gt.f32.partialorder %v1061_v20, 0.0  ;;  %v1063_v21 = vmul.f32 0.01, %v1061_v20 }
 0x1ab   :  { %v1064_v13 = vsel %vm1062_vm0, %v1061_v20, %v1063_v21 }
 0x1ac   :  { %v1072_v22 = vrot.slane %v1064_v13, %v1033_v5 }
 0x1ae   :  { %v1073_v23 = vcombine.high %v1072_v22, %v1072_v22  ;;  %v1076_v26 = vpack.c.bf16 %v1072_v22, %v1072_v22 }
 0x1b0   :  { %v1077_v24 = vpack.c.bf16 %v1073_v23, %v1073_v23 }
 0x1b2   :  { %1314 = vmatprep.mubr.bf16.mxu1 %v1077_v24 }
 0x1b3   :  { %1315 = vmatmul.mubr.bf16.vlgmr.msra.gmra.mrb[4].mxu1 %v1076_v26 }
 0x1b4   :  { %1700 = vmatpush3.bf16.msra.mxu1 %v1977_v25 }
 0x1b5   :  { %1701 = vmatprep.subr.bf16.mxu1 %v1978_v28 }
 0x1b8   :  { %1702 = vmatpush3.bf16.msra.mxu1 %v1979_v29 }
 0x1b9   :  { %1703 = vmatprep.subr.bf16.mxu1 %v1980_v30 }
 0x1bc   :  { %1704 = vmatpush3.bf16.msra.mxu1 %v1981_v31 }
 0x1bd   :  { %1705 = vmatprep.subr.bf16.mxu1 %v1982_v32 }
 0x1c0   :  { %1706 = vmatpush3.bf16.msra.mxu1 %v1983_v33 }
 0x1c1   :  { %1707 = vmatprep.subr.bf16.mxu1 %v1984_v34 }
 0x1c4   :  { %1708 = vmatpush3.bf16.msra.mxu1 %v1985_v35 }
 0x1c5   :  { %1709 = vmatprep.subr.bf16.mxu1 %v1986_v36 }
 0x1c8   :  { %1710 = vmatpush3.bf16.msra.mxu1 %v1987_v37 }
 0x1c9   :  { %1711 = vmatprep.subr.bf16.mxu1 %v1988_v38 }
 0x1cc   :  { %1712 = vmatpush3.bf16.msra.mxu1 %v1989_v39 }
 0x1cd   :  { %1713 = vmatprep.subr.bf16.mxu1 %v1990_v40 }
 0x1d0   :  { %1714 = vmatpush3.bf16.msra.mxu1 %v1991_v41 }
 0x286   :  { %v1316_v44 = vpop.f32.mrb[4].mxu1 }
 0x287   :  { %v1317_v45 = vadd.f32 %v1316_v44, %v1115_v43  ;;  %v1318_v46 = vpop.f32.mrb[5].mxu1 }
 0x288   :  { %v1319_v47 = vadd.f32 %v1318_v46, %v1119_v27  ;;  %v1320_v48 = vpop.f32.mrb[6].mxu1 }
 0x289   :  { %vm1323_vm1 = vcmp.gt.f32.partialorder %v1317_v45, 0.0  ;;  %v1325_v49 = vmul.f32 0.01, %v1317_v45  ;;  %v1321_v50 = vpop.f32.mrb[7].mxu1 }
 0x28a   :  { %vm1324_vm2 = vcmp.gt.f32.partialorder %v1319_v47, 0.0  ;;  %v1326_v51 = vmul.f32 0.01, %v1319_v47 }
 0x28b   :  { %v1327_v52 = vsel %vm1323_vm1, %v1317_v45, %v1325_v49 }
 0x28c   :  { %v1328_v53 = vsel %vm1324_vm2, %v1319_v47, %v1326_v51  ;;  %v1329_v55 = vpack.c.bf16 %v1327_v52, %v1327_v52 }
 0x28d   :  { %v1330_v54 = vpack.c.bf16 %v1328_v53, %v1328_v53 }
 0x28f   :  { %1498 = vmatprep.mubr.bf16.mxu1 %v1330_v54 }
 0x290   :  { %1499 = vmatmul.mubr.bf16.vlgmr.msra.gmra.mrb[8].mxu1 %v1329_v55 }
 0x363   :  { %v1715_v56 = vpop.f32.mrb[8].mxu1 }
 0x364   :  { %v1716_v58 = vpop.f32.mrb[9].mxu1 }
 0x365   :  { %v1717_v59 = vadd.f32 %v1716_v58, %v1715_v56  ;;  %v1718_v60 = vpop.f32.mrb[10].mxu1 }
 0x366   :  { %v1719_v61 = vpop.f32.mrb[11].mxu1 }
 0x367   :  { %v1501_v62 = vadd.f32 %v1717_v59, %v1682_v57 }
 0x369   :  { %1507 = vst.msk [vmem:[#allocation3] sm:$0x3] %vm1506_vm3, %v1501_v62 }
 0x36a   :  { %2003 = shalt.err (!%p2000_p4)
}
 0x36b   :  { %s2004_s6 = scalar_lea.hbm %s2653_s7, 32 }
 0x36c   :  { %p2005_p5 = scmp.ne.s32.totalorder %s2653_s7, %s2004_s6  ;;  %p2008_p6 = scmp.lt.u32.totalorder %s2004_s6, %s2653_s7 }
 0x36e   :  { %p2010_p7 = pnand %p2008_p6, %p2005_p5 }
 0x370   :  { %2013 = shalt.err (!%p2010_p7)
}
 0x371   :  { %1517 = dma.vmem_to_hbm [thread:$0]  %s1515_s17, 32, %s2653_s7, [#allocation4]  }
 0x372   :  { %2014 = dma.done.wait [#allocation4], 32  }
 0x373   :  { %2015 = vsyncadd [#allocation4], 4294967264 }
 0x374   :  { %1521 = vsyncpa [#allocation4], 1 }

// kernel: bc_image_only_forward.6
= control target key start
LH: loop header
LB: loop body
LE: loop exit
PB: predicated region body
PF: predicated region fallthrough
CT: control target
= control target key end

     0   :  { %s3522_s12 = smov 0   ;;  %s4352_s0 = inlined_call_operand.vmem [shape: bf16[2,8,6,128], index: 0, kind: input, shape index: {}]   ;;  %s4353_s1 = inlined_call_operand.vmem [shape: bf16[16,128,256], index: 1, kind: input, shape index: {}]   ;;  %s4354_s2 = inlined_call_operand.vmem [shape: f32[1,256], index: 2, kind: input, shape index: {}]   ;;  %s4355_s3 = inlined_call_operand.vmem [shape: bf16[2,4,256], index: 3, kind: output, shape index: {}]  }
   0x1 LB: > { %s2559_s13 = sadd.s32 4294967295, %s3499_s12   ;;  %p2563_p0 = scmp.ge.s32.totalorder %s3499_s12, 1  ;;  %s3499_s12 = sphi %s3522_s12, %s13_s12  }
   0x2   : > { %p137_p1 = scmp.lt.s32.totalorder %s3499_s12, 3 }
   0x4   : > { %p138_p2 = pnand %p2563_p0, %p137_p1 }
   0x5   : > { %v3101_v0 = vld [vmem:[%s4353_s1 + $0x84] ss:$8 sps:$4 sm:$0xff] (!%p138_p2)   ;;  %v3501_v2 = vmov (!%p138_p2), 0   ;;  %v3105_v3 = vld [vmem:[%s4353_s1 + $0x80] ss:$8 sps:$4 sm:$0xff] (!%p138_p2)   ;;  %p161_p3 = scmp.lt.s32.totalorder (!%p138_p2), %s2559_s13, 1 }
   0x6   : > { %141 = sbr.rel (%p138_p2) target bundleno = 488 (0x1e8), region = 32  ;;  %v3103_v1 = vld [vmem:[%s4353_s1 + $0x4] ss:$8 sps:$4 sm:$0xff] (!%p138_p2)   ;;  %320 = vmatprep.mubr.bf16.mxu0 (!%p138_p2), %v3501_v2  ;;  %441 = vmatprep.mubr.bf16.mxu1 (!%p138_p2), %v3501_v2  ;;  %v3106_v4 = vld [vmem:[%s4353_s1] ss:$8 sps:$4 sm:$0xff] (!%p138_p2)  }
   0x7   : > { %288 = vmatprep.subr.bf16.mxu0 (!%p138_p2), %v3101_v0  ;;  %409 = vmatprep.subr.bf16.mxu1 (!%p138_p2), %v3103_v1  ;;  %v3107_v5 = vld [vmem:[%s4353_s1 + $0x94] ss:$8 sps:$4 sm:$0xff] (!%p138_p2)   ;;  %v3111_v7 = vld [vmem:[%s4353_s1 + $0x90] ss:$8 sps:$4 sm:$0xff] (!%p138_p2)   ;;  %v3113_v9 = vld [vmem:[%s4353_s1 + $0xa4] ss:$8 sps:$4 sm:$0xff] (!%p138_p2)  }
   0x8   : > { %289 = vmatpush1.bf16.msra.mxu0 (!%p138_p2), %v3105_v3  ;;  %410 = vmatpush1.bf16.msra.mxu1 (!%p138_p2), %v3106_v4  ;;  %v3109_v6 = vld [vmem:[%s4353_s1 + $0x14] ss:$8 sps:$4 sm:$0xff] (!%p138_p2)   ;;  %v3112_v8 = vld [vmem:[%s4353_s1 + $0x10] ss:$8 sps:$4 sm:$0xff] (!%p138_p2)   ;;  %v3115_v10 = vld [vmem:[%s4353_s1 + $0x24] ss:$8 sps:$4 sm:$0xff] (!%p138_p2)  }
   0x9   : > { %290 = vmatprep.subr.bf16.mxu0 (!%p138_p2), %v3107_v5  ;;  %411 = vmatprep.subr.bf16.mxu1 (!%p138_p2), %v3109_v6  ;;  %v3117_v11 = vld [vmem:[%s4353_s1 + $0xa0] ss:$8 sps:$4 sm:$0xff] (!%p138_p2)   ;;  %v3119_v13 = vld [vmem:[%s4353_s1 + $0xb4] ss:$8 sps:$4 sm:$0xff] (!%p138_p2)   ;;  %v3123_v15 = vld [vmem:[%s4353_s1 + $0xb0] ss:$8 sps:$4 sm:$0xff] (!%p138_p2)  }
   0xa   : > { %v3118_v12 = vld [vmem:[%s4353_s1 + $0x20] ss:$8 sps:$4 sm:$0xff] (!%p138_p2)   ;;  %v3121_v14 = vld [vmem:[%s4353_s1 + $0x34] ss:$8 sps:$4 sm:$0xff] (!%p138_p2)   ;;  %v3124_v16 = vld [vmem:[%s4353_s1 + $0x30] ss:$8 sps:$4 sm:$0xff] (!%p138_p2)  }
   0xb   : > { %v3125_v17 = vld [vmem:[%s4353_s1 + $0xc4] ss:$8 sps:$4 sm:$0xff] (!%p138_p2)   ;;  %v3129_v19 = vld [vmem:[%s4353_s1 + $0xc0] ss:$8 sps:$4 sm:$0xff] (!%p138_p2)   ;;  %v3131_v21 = vld [vmem:[%s4353_s1 + $0xd4] ss:$8 sps:$4 sm:$0xff] (!%p138_p2)  }
   0xc   : > { %291 = vmatpush1.bf16.msra.mxu0 (!%p138_p2), %v3111_v7  ;;  %412 = vmatpush1.bf16.msra.mxu1 (!%p138_p2), %v3112_v8  ;;  %v3127_v18 = vld [vmem:[%s4353_s1 + $0x44] ss:$8 sps:$4 sm:$0xff] (!%p138_p2)   ;;  %v3130_v20 = vld [vmem:[%s4353_s1 + $0x40] ss:$8 sps:$4 sm:$0xff] (!%p138_p2)   ;;  %v3133_v22 = vld [vmem:[%s4353_s1 + $0x54] ss:$8 sps:$4 sm:$0xff] (!%p138_p2)  }
   0xd   : > { %292 = vmatprep.subr.bf16.mxu0 %v3113_v9  ;;  %413 = vmatprep.subr.bf16.mxu1 %v3115_v10  ;;  %v3135_v23 = vld [vmem:[%s4353_s1 + $0xd0] ss:$8 sps:$4 sm:$0xff]   ;;  %s4357_s13 = smov (!%p161_p3, %s2559_s13), 1  ;;  %v3137_v25 = vld [vmem:[%s4353_s1 + $0xe4] ss:$8 sps:$4 sm:$0xff]  }
   0xe   : > { %v3136_v24 = vld [vmem:[%s4353_s1 + $0x50] ss:$8 sps:$4 sm:$0xff]   ;;  %v3139_v26 = vld [vmem:[%s4353_s1 + $0x64] ss:$8 sps:$4 sm:$0xff]   ;;  %v3141_v27 = vld [vmem:[%s4353_s1 + $0xe0] ss:$8 sps:$4 sm:$0xff]  }
   0xf   : > { %v3142_v28 = vld [vmem:[%s4353_s1 + $0x60] ss:$8 sps:$4 sm:$0xff]   ;;  %s3090_s20 = sshll.u32 %s4357_s13, 5  ;;  %v3143_v29 = vld [vmem:[%s4353_s1 + $0xf4] ss:$8 sps:$4 sm:$0xff]   ;;  %s3091_s24 = sshll.u32 %s4357_s13, 2 }
  0x10   : > { %293 = vmatpush1.bf16.msra.mxu0 %v3117_v11  ;;  %414 = vmatpush1.bf16.msra.mxu1 %v3118_v12  ;;  %v3145_v30 = vld [vmem:[%s4353_s1 + $0x74] ss:$8 sps:$4 sm:$0xff]   ;;  %s3632_s27 = scalar_lea.vmem %s4352_s0, %s3090_s20  ;;  %v3147_v31 = vld [vmem:[%s4353_s1 + $0xf0] ss:$8 sps:$4 sm:$0xff]   ;;  %v3151_v33 = vld [vmem:[%s4353_s1 + $0x104] ss:$8 sps:$4 sm:$0xff]   ;;  %s170_s28 = scalar_lea.vmem %s4355_s3, %s3091_s24 }
  0x11   : > { %294 = vmatprep.subr.bf16.mxu0 %v3119_v13  ;;  %415 = vmatprep.subr.bf16.mxu1 %v3121_v14  ;;  %v3148_v32 = vld [vmem:[%s4353_s1 + $0x70] ss:$8 sps:$4 sm:$0xff]   ;;  %v3154_v34 = vld [vmem:[%s4353_s1 + $0x184] ss:$8 sps:$4 sm:$0xff]   ;;  %v2568_v35 = vld [vmem:[%s3632_s27 + $0x8] sm:$0x3] }
  0x12   : > { %v172_v36 = vld [vmem:[%s3632_s27] sm:$0x3]  ;;  %v3157_v39 = vld [vmem:[%s4353_s1 + $0x114] ss:$8 sps:$4 sm:$0xff]   ;;  %v3155_v41 = vld [vmem:[%s4353_s1 + $0x110] ss:$8 sps:$4 sm:$0xff]  }
  0x13   : > { %v3149_v37 = vld [vmem:[%s4353_s1 + $0x100] ss:$8 sps:$4 sm:$0xff]   ;;  %v3160_v40 = vld [vmem:[%s4353_s1 + $0x194] ss:$8 sps:$4 sm:$0xff]   ;;  %v3158_v42 = vld [vmem:[%s4353_s1 + $0x190] ss:$8 sps:$4 sm:$0xff]  }
  0x14   : > { %295 = vmatpush1.bf16.msra.mxu0 %v3123_v15  ;;  %416 = vmatpush1.bf16.msra.mxu1 %v3124_v16  ;;  %v3152_v38 = vld [vmem:[%s4353_s1 + $0x180] ss:$8 sps:$4 sm:$0xff]   ;;  %v3163_v43 = vld [vmem:[%s4353_s1 + $0x124] ss:$8 sps:$4 sm:$0xff]   ;;  %v3169_v47 = vld [vmem:[%s4353_s1 + $0x134] ss:$8 sps:$4 sm:$0xff]  }
  0x15   : > { %296 = vmatprep.subr.bf16.mxu0 %v3125_v17  ;;  %417 = vmatprep.subr.bf16.mxu1 %v3127_v18  ;;  %v3166_v44 = vld [vmem:[%s4353_s1 + $0x1a4] ss:$8 sps:$4 sm:$0xff]   ;;  %v3161_v45 = vld [vmem:[%s4353_s1 + $0x120] ss:$8 sps:$4 sm:$0xff]   ;;  %v3172_v48 = vld [vmem:[%s4353_s1 + $0x1b4] ss:$8 sps:$4 sm:$0xff]  }
  0x16   : > { %v3164_v46 = vld [vmem:[%s4353_s1 + $0x1a0] ss:$8 sps:$4 sm:$0xff]   ;;  %v3167_v49 = vld [vmem:[%s4353_s1 + $0x130] ss:$8 sps:$4 sm:$0xff]   ;;  %v3175_v51 = vld [vmem:[%s4353_s1 + $0x144] ss:$8 sps:$4 sm:$0xff]  }
  0x17   : > { %v3170_v50 = vld [vmem:[%s4353_s1 + $0x1b0] ss:$8 sps:$4 sm:$0xff]   ;;  %v3178_v52 = vld [vmem:[%s4353_s1 + $0x1c4] ss:$8 sps:$4 sm:$0xff]   ;;  %v3173_v53 = vld [vmem:[%s4353_s1 + $0x140] ss:$8 sps:$4 sm:$0xff]  }
  0x18   : > { %297 = vmatpush1.bf16.msra.mxu0 %v3129_v19  ;;  %418 = vmatpush1.bf16.msra.mxu1 %v3130_v20  ;;  %v3176_v54 = vld [vmem:[%s4353_s1 + $0x1c0] ss:$8 sps:$4 sm:$0xff]   ;;  %v3181_v55 = vld [vmem:[%s4353_s1 + $0x154] ss:$8 sps:$4 sm:$0xff]   ;;  %v3179_v57 = vld [vmem:[%s4353_s1 + $0x150] ss:$8 sps:$4 sm:$0xff]  }
  0x19   : > { %298 = vmatprep.subr.bf16.mxu0 %v3131_v21  ;;  %419 = vmatprep.subr.bf16.mxu1 %v3133_v22  ;;  %v3184_v56 = vld [vmem:[%s4353_s1 + $0x1d4] ss:$8 sps:$4 sm:$0xff]   ;;  %v3182_v58 = vld [vmem:[%s4353_s1 + $0x1d0] ss:$8 sps:$4 sm:$0xff]   ;;  %v3187_v59 = vld [vmem:[%s4353_s1 + $0x164] ss:$8 sps:$4 sm:$0xff]  }
  0x1a   : > { %v3190_v60 = vld [vmem:[%s4353_s1 + $0x1e4] ss:$8 sps:$4 sm:$0xff]   ;;  %v3185_v61 = vld [vmem:[%s4353_s1 + $0x160] ss:$8 sps:$4 sm:$0xff]   ;;  %v3193_v63 = vld [vmem:[%s4353_s1 + $0x174] ss:$8 sps:$4 sm:$0xff]  }
  0x1b   : > { %v3188_v62 = vld [vmem:[%s4353_s1 + $0x1e0] ss:$8 sps:$4 sm:$0xff]   ;;  %v3196_v0 = vld [vmem:[%s4353_s1 + $0x1f4] ss:$8 sps:$4 sm:$0xff]   ;;  %v3191_v1 = vld [vmem:[%s4353_s1 + $0x170] ss:$8 sps:$4 sm:$0xff]  }
  0x1c   : > { %299 = vmatpush1.bf16.msra.mxu0 %v3135_v23  ;;  %420 = vmatpush1.bf16.msra.mxu1 %v3136_v24  ;;  %v3194_v3 = vld [vmem:[%s4353_s1 + $0x1f0] ss:$8 sps:$4 sm:$0xff]   ;;  %v3199_v4 = vld [vmem:[%s4353_s1 + $0x204] ss:$8 sps:$4 sm:$0xff]   ;;  %v3197_v8 = vld [vmem:[%s4353_s1 + $0x200] ss:$8 sps:$4 sm:$0xff]  }
  0x1d   : > { %300 = vmatprep.subr.bf16.mxu0 %v3137_v25  ;;  %421 = vmatprep.subr.bf16.mxu1 %v3139_v26  ;;  %v3202_v5 = vld [vmem:[%s4353_s1 + $0x284] ss:$8 sps:$4 sm:$0xff]   ;;  %v3200_v9 = vld [vmem:[%s4353_s1 + $0x280] ss:$8 sps:$4 sm:$0xff]   ;;  %v3205_v10 = vld [vmem:[%s4353_s1 + $0x214] ss:$8 sps:$4 sm:$0xff]  }
  0x1e   : > { %v2617_v6 = vld [vmem:[%s3632_s27 + $0x4] sm:$0x3]  ;;  %v2650_v7 = vld [vmem:[%s3632_s27 + $0xc] sm:$0x3]  ;;  %v3208_v11 = vld [vmem:[%s4353_s1 + $0x294] ss:$8 sps:$4 sm:$0xff]  }
  0x1f   : > { %v3203_v12 = vld [vmem:[%s4353_s1 + $0x210] ss:$8 sps:$4 sm:$0xff]   ;;  %v3211_v14 = vld [vmem:[%s4353_s1 + $0x224] ss:$8 sps:$4 sm:$0xff]   ;;  %v3209_v16 = vld [vmem:[%s4353_s1 + $0x220] ss:$8 sps:$4 sm:$0xff]  }
  0x20   : > { %301 = vmatpush1.bf16.msra.mxu0 %v3141_v27  ;;  %422 = vmatpush1.bf16.msra.mxu1 %v3142_v28  ;;  %v3206_v13 = vld [vmem:[%s4353_s1 + $0x290] ss:$8 sps:$4 sm:$0xff]   ;;  %v3214_v15 = vld [vmem:[%s4353_s1 + $0x2a4] ss:$8 sps:$4 sm:$0xff]   ;;  %v3212_v17 = vld [vmem:[%s4353_s1 + $0x2a0] ss:$8 sps:$4 sm:$0xff]  }
  0x21   : > { %302 = vmatprep.subr.bf16.mxu0 %v3143_v29  ;;  %423 = vmatprep.subr.bf16.mxu1 %v3145_v30  ;;  %v3217_v18 = vld [vmem:[%s4353_s1 + $0x234] ss:$8 sps:$4 sm:$0xff]   ;;  %v3215_v20 = vld [vmem:[%s4353_s1 + $0x230] ss:$8 sps:$4 sm:$0xff]   ;;  %v3223_v22 = vld [vmem:[%s4353_s1 + $0x244] ss:$8 sps:$4 sm:$0xff]  }
  0x22   : > { %v3220_v19 = vld [vmem:[%s4353_s1 + $0x2b4] ss:$8 sps:$4 sm:$0xff]   ;;  %v3218_v21 = vld [vmem:[%s4353_s1 + $0x2b0] ss:$8 sps:$4 sm:$0xff]   ;;  %v3226_v23 = vld [vmem:[%s4353_s1 + $0x2c4] ss:$8 sps:$4 sm:$0xff]  }
  0x23   : > { %v3221_v24 = vld [vmem:[%s4353_s1 + $0x240] ss:$8 sps:$4 sm:$0xff]   ;;  %v3229_v26 = vld [vmem:[%s4353_s1 + $0x254] ss:$8 sps:$4 sm:$0xff]   ;;  %v3227_v28 = vld [vmem:[%s4353_s1 + $0x250] ss:$8 sps:$4 sm:$0xff]  }
  0x24   : > { %303 = vmatpush1.bf16.msra.mxu0 %v3147_v31  ;;  %424 = vmatpush1.bf16.msra.mxu1 %v3148_v32  ;;  %v3224_v25 = vld [vmem:[%s4353_s1 + $0x2c0] ss:$8 sps:$4 sm:$0xff]   ;;  %v3232_v27 = vld [vmem:[%s4353_s1 + $0x2d4] ss:$8 sps:$4 sm:$0xff]   ;;  %v3230_v29 = vld [vmem:[%s4353_s1 + $0x2d0] ss:$8 sps:$4 sm:$0xff]  }
  0x25   : > { %549 = vmatprep.subr.bf16.mxu0 %v3151_v33  ;;  %691 = vmatprep.subr.bf16.mxu1 %v3154_v34  ;;  %v3235_v30 = vld [vmem:[%s4353_s1 + $0x264] ss:$8 sps:$4 sm:$0xff]   ;;  %v3233_v32 = vld [vmem:[%s4353_s1 + $0x260] ss:$8 sps:$4 sm:$0xff]   ;;  %v3241_v34 = vld [vmem:[%s4353_s1 + $0x274] ss:$8 sps:$4 sm:$0xff]  }
  0x26   : > { %v3238_v31 = vld [vmem:[%s4353_s1 + $0x2e4] ss:$8 sps:$4 sm:$0xff]   ;;  %v3236_v33 = vld [vmem:[%s4353_s1 + $0x2e0] ss:$8 sps:$4 sm:$0xff]  }
  0x27   : > { %321 = vmatmul.mubr.bf16.vlgmr.msra.gmra.mrb[0].mxu0 %v2568_v35  ;;  %442 = vmatmul.mubr.bf16.vlgmr.msra.gmra.mrb[0].mxu1 %v172_v36  ;;  %v3244_v35 = vld [vmem:[%s4353_s1 + $0x2f4] ss:$8 sps:$4 sm:$0xff]   ;;  %v3239_v36 = vld [vmem:[%s4353_s1 + $0x270] ss:$8 sps:$4 sm:$0xff]  }
  0x28   : > { %550 = vmatpush1.bf16.msra.mxu0 %v3149_v37  ;;  %692 = vmatpush1.bf16.msra.mxu1 %v3152_v38  ;;  %v3242_v37 = vld [vmem:[%s4353_s1 + $0x2f0] ss:$8 sps:$4 sm:$0xff]   ;;  %v3247_v38 = vld [vmem:[%s4353_s1 + $0x304] ss:$8 sps:$4 sm:$0xff]  }
  0x29   : > { %551 = vmatprep.subr.bf16.mxu0 %v3157_v39  ;;  %693 = vmatprep.subr.bf16.mxu1 %v3160_v40  ;;  %v3250_v39 = vld [vmem:[%s4353_s1 + $0x384] ss:$8 sps:$4 sm:$0xff]   ;;  %v2683_v40 = vld [vmem:[%s3632_s27 + $0x10] sm:$0x3] }
  0x2a   : > { %581 = vmatprep.mubr.bf16.mxu0 %v3501_v2  ;;  %723 = vmatprep.mubr.bf16.mxu1 %v3501_v2 }
  0x2c   : > { %552 = vmatpush1.bf16.msra.mxu0 %v3155_v41  ;;  %694 = vmatpush1.bf16.msra.mxu1 %v3158_v42  ;;  %v2716_v41 = vld [vmem:[%s3632_s27 + $0x18] sm:$0x3]  ;;  %v3245_v42 = vld [vmem:[%s4353_s1 + $0x300] ss:$8 sps:$4 sm:$0xff]  }
  0x2d   : > { %553 = vmatprep.subr.bf16.mxu0 %v3163_v43  ;;  %695 = vmatprep.subr.bf16.mxu1 %v3166_v44  ;;  %v3248_v43 = vld [vmem:[%s4353_s1 + $0x380] ss:$8 sps:$4 sm:$0xff]   ;;  %v3253_v44 = vld [vmem:[%s4353_s1 + $0x314] ss:$8 sps:$4 sm:$0xff]  }
  0x30   : > { %554 = vmatpush1.bf16.msra.mxu0 %v3161_v45  ;;  %696 = vmatpush1.bf16.msra.mxu1 %v3164_v46  ;;  %v3256_v45 = vld [vmem:[%s4353_s1 + $0x394] ss:$8 sps:$4 sm:$0xff]   ;;  %v3251_v46 = vld [vmem:[%s4353_s1 + $0x310] ss:$8 sps:$4 sm:$0xff]  }
  0x31   : > { %555 = vmatprep.subr.bf16.mxu0 %v3169_v47  ;;  %697 = vmatprep.subr.bf16.mxu1 %v3172_v48  ;;  %v3254_v47 = vld [vmem:[%s4353_s1 + $0x390] ss:$8 sps:$4 sm:$0xff]   ;;  %v3259_v48 = vld [vmem:[%s4353_s1 + $0x324] ss:$8 sps:$4 sm:$0xff]  }
  0x34   : > { %556 = vmatpush1.bf16.msra.mxu0 %v3167_v49  ;;  %698 = vmatpush1.bf16.msra.mxu1 %v3170_v50  ;;  %v3262_v49 = vld [vmem:[%s4353_s1 + $0x3a4] ss:$8 sps:$4 sm:$0xff]   ;;  %v3257_v50 = vld [vmem:[%s4353_s1 + $0x320] ss:$8 sps:$4 sm:$0xff]  }
  0x35   : > { %557 = vmatprep.subr.bf16.mxu0 %v3175_v51  ;;  %699 = vmatprep.subr.bf16.mxu1 %v3178_v52  ;;  %v3260_v51 = vld [vmem:[%s4353_s1 + $0x3a0] ss:$8 sps:$4 sm:$0xff]   ;;  %v3265_v52 = vld [vmem:[%s4353_s1 + $0x334] ss:$8 sps:$4 sm:$0xff]  }
  0x38   : > { %558 = vmatpush1.bf16.msra.mxu0 %v3173_v53  ;;  %700 = vmatpush1.bf16.msra.mxu1 %v3176_v54  ;;  %v3268_v53 = vld [vmem:[%s4353_s1 + $0x3b4] ss:$8 sps:$4 sm:$0xff]   ;;  %v3263_v54 = vld [vmem:[%s4353_s1 + $0x330] ss:$8 sps:$4 sm:$0xff]  }
  0x39   : > { %559 = vmatprep.subr.bf16.mxu0 %v3181_v55  ;;  %701 = vmatprep.subr.bf16.mxu1 %v3184_v56  ;;  %v3266_v55 = vld [vmem:[%s4353_s1 + $0x3b0] ss:$8 sps:$4 sm:$0xff]   ;;  %v3271_v56 = vld [vmem:[%s4353_s1 + $0x344] ss:$8 sps:$4 sm:$0xff]  }
  0x3c   : > { %560 = vmatpush1.bf16.msra.mxu0 %v3179_v57  ;;  %702 = vmatpush1.bf16.msra.mxu1 %v3182_v58  ;;  %v3274_v57 = vld [vmem:[%s4353_s1 + $0x3c4] ss:$8 sps:$4 sm:$0xff]   ;;  %v3269_v58 = vld [vmem:[%s4353_s1 + $0x340] ss:$8 sps:$4 sm:$0xff]  }
  0x3d   : > { %561 = vmatprep.subr.bf16.mxu0 %v3187_v59  ;;  %703 = vmatprep.subr.bf16.mxu1 %v3190_v60  ;;  %v3272_v59 = vld [vmem:[%s4353_s1 + $0x3c0] ss:$8 sps:$4 sm:$0xff]   ;;  %v3277_v60 = vld [vmem:[%s4353_s1 + $0x354] ss:$8 sps:$4 sm:$0xff]  }
  0x40   : > { %562 = vmatpush1.bf16.msra.mxu0 %v3185_v61  ;;  %704 = vmatpush1.bf16.msra.mxu1 %v3188_v62  ;;  %v3280_v61 = vld [vmem:[%s4353_s1 + $0x3d4] ss:$8 sps:$4 sm:$0xff]   ;;  %v3275_v62 = vld [vmem:[%s4353_s1 + $0x350] ss:$8 sps:$4 sm:$0xff]  }
  0x41   : > { %563 = vmatprep.subr.bf16.mxu0 %v3193_v63  ;;  %705 = vmatprep.subr.bf16.mxu1 %v3196_v0  ;;  %v3278_v63 = vld [vmem:[%s4353_s1 + $0x3d0] ss:$8 sps:$4 sm:$0xff]   ;;  %v3283_v0 = vld [vmem:[%s4353_s1 + $0x364] ss:$8 sps:$4 sm:$0xff]  }
  0x44   : > { %564 = vmatpush1.bf16.msra.mxu0 %v3191_v1  ;;  %706 = vmatpush1.bf16.msra.mxu1 %v3194_v3  ;;  %v3286_v1 = vld [vmem:[%s4353_s1 + $0x3e4] ss:$8 sps:$4 sm:$0xff]   ;;  %v3281_v3 = vld [vmem:[%s4353_s1 + $0x360] ss:$8 sps:$4 sm:$0xff]  }
  0x45   : > { %833 = vmatprep.subr.bf16.mxu0 %v3199_v4  ;;  %975 = vmatprep.subr.bf16.mxu1 %v3202_v5  ;;  %v3284_v4 = vld [vmem:[%s4353_s1 + $0x3e0] ss:$8 sps:$4 sm:$0xff]   ;;  %v3289_v5 = vld [vmem:[%s4353_s1 + $0x374] ss:$8 sps:$4 sm:$0xff]  }
  0x47   : > { %582 = vmatmul.mubr.bf16.vlgmr.msra.gmra.mrb[4].mxu0 %v2617_v6  ;;  %724 = vmatmul.mubr.bf16.vlgmr.msra.gmra.mrb[4].mxu1 %v2650_v7  ;;  %v3292_v6 = vld [vmem:[%s4353_s1 + $0x3f4] ss:$8 sps:$4 sm:$0xff]   ;;  %v3287_v7 = vld [vmem:[%s4353_s1 + $0x370] ss:$8 sps:$4 sm:$0xff]  }
  0x48   : > { %834 = vmatpush1.bf16.msra.mxu0 %v3197_v8  ;;  %976 = vmatpush1.bf16.msra.mxu1 %v3200_v9  ;;  %v3290_v8 = vld [vmem:[%s4353_s1 + $0x3f0] ss:$8 sps:$4 sm:$0xff]   ;;  %v3295_v9 = vld [vmem:[%s4353_s1 + $0x404] ss:$8 sps:$4 sm:$0xff]  }
  0x49   : > { %835 = vmatprep.subr.bf16.mxu0 %v3205_v10  ;;  %977 = vmatprep.subr.bf16.mxu1 %v3208_v11  ;;  %v3298_v10 = vld [vmem:[%s4353_s1 + $0x484] ss:$8 sps:$4 sm:$0xff]   ;;  %v2749_v11 = vld [vmem:[%s3632_s27 + $0x14] sm:$0x3] }
  0x4a   : > { %865 = vmatprep.mubr.bf16.mxu0 %v3501_v2  ;;  %1007 = vmatprep.mubr.bf16.mxu1 %v3501_v2 }
  0x4c   : > { %836 = vmatpush1.bf16.msra.mxu0 %v3203_v12  ;;  %978 = vmatpush1.bf16.msra.mxu1 %v3206_v13  ;;  %v2782_v12 = vld [vmem:[%s3632_s27 + $0x1c] sm:$0x3]  ;;  %v3293_v13 = vld [vmem:[%s4353_s1 + $0x400] ss:$8 sps:$4 sm:$0xff]  }
  0x4d   : > { %837 = vmatprep.subr.bf16.mxu0 %v3211_v14  ;;  %979 = vmatprep.subr.bf16.mxu1 %v3214_v15  ;;  %v3296_v14 = vld [vmem:[%s4353_s1 + $0x480] ss:$8 sps:$4 sm:$0xff]   ;;  %v3301_v15 = vld [vmem:[%s4353_s1 + $0x414] ss:$8 sps:$4 sm:$0xff]  }
  0x50   : > { %838 = vmatpush1.bf16.msra.mxu0 %v3209_v16  ;;  %980 = vmatpush1.bf16.msra.mxu1 %v3212_v17  ;;  %v3304_v16 = vld [vmem:[%s4353_s1 + $0x494] ss:$8 sps:$4 sm:$0xff]   ;;  %v3299_v17 = vld [vmem:[%s4353_s1 + $0x410] ss:$8 sps:$4 sm:$0xff]  }
  0x51   : > { %839 = vmatprep.subr.bf16.mxu0 %v3217_v18  ;;  %981 = vmatprep.subr.bf16.mxu1 %v3220_v19  ;;  %v3302_v18 = vld [vmem:[%s4353_s1 + $0x490] ss:$8 sps:$4 sm:$0xff]   ;;  %v3307_v19 = vld [vmem:[%s4353_s1 + $0x424] ss:$8 sps:$4 sm:$0xff]  }
  0x54   : > { %840 = vmatpush1.bf16.msra.mxu0 %v3215_v20  ;;  %982 = vmatpush1.bf16.msra.mxu1 %v3218_v21  ;;  %v3310_v20 = vld [vmem:[%s4353_s1 + $0x4a4] ss:$8 sps:$4 sm:$0xff]   ;;  %v3305_v21 = vld [vmem:[%s4353_s1 + $0x420] ss:$8 sps:$4 sm:$0xff]  }
  0x55   : > { %841 = vmatprep.subr.bf16.mxu0 %v3223_v22  ;;  %983 = vmatprep.subr.bf16.mxu1 %v3226_v23  ;;  %v3308_v22 = vld [vmem:[%s4353_s1 + $0x4a0] ss:$8 sps:$4 sm:$0xff]   ;;  %v3313_v23 = vld [vmem:[%s4353_s1 + $0x434] ss:$8 sps:$4 sm:$0xff]  }
  0x58   : > { %842 = vmatpush1.bf16.msra.mxu0 %v3221_v24  ;;  %984 = vmatpush1.bf16.msra.mxu1 %v3224_v25  ;;  %v3316_v24 = vld [vmem:[%s4353_s1 + $0x4b4] ss:$8 sps:$4 sm:$0xff]   ;;  %v3311_v25 = vld [vmem:[%s4353_s1 + $0x430] ss:$8 sps:$4 sm:$0xff]  }
  0x59   : > { %843 = vmatprep.subr.bf16.mxu0 %v3229_v26  ;;  %985 = vmatprep.subr.bf16.mxu1 %v3232_v27  ;;  %v3314_v26 = vld [vmem:[%s4353_s1 + $0x4b0] ss:$8 sps:$4 sm:$0xff]   ;;  %v3319_v27 = vld [vmem:[%s4353_s1 + $0x444] ss:$8 sps:$4 sm:$0xff]  }
  0x5c   : > { %844 = vmatpush1.bf16.msra.mxu0 %v3227_v28  ;;  %986 = vmatpush1.bf16.msra.mxu1 %v3230_v29  ;;  %v3322_v28 = vld [vmem:[%s4353_s1 + $0x4c4] ss:$8 sps:$4 sm:$0xff]   ;;  %v3317_v29 = vld [vmem:[%s4353_s1 + $0x440] ss:$8 sps:$4 sm:$0xff]  }
  0x5d   : > { %845 = vmatprep.subr.bf16.mxu0 %v3235_v30  ;;  %987 = vmatprep.subr.bf16.mxu1 %v3238_v31  ;;  %v3320_v30 = vld [vmem:[%s4353_s1 + $0x4c0] ss:$8 sps:$4 sm:$0xff]   ;;  %v3325_v31 = vld [vmem:[%s4353_s1 + $0x454] ss:$8 sps:$4 sm:$0xff]  }
  0x60   : > { %846 = vmatpush1.bf16.msra.mxu0 %v3233_v32  ;;  %988 = vmatpush1.bf16.msra.mxu1 %v3236_v33  ;;  %v3328_v32 = vld [vmem:[%s4353_s1 + $0x4d4] ss:$8 sps:$4 sm:$0xff]   ;;  %v3323_v33 = vld [vmem:[%s4353_s1 + $0x450] ss:$8 sps:$4 sm:$0xff]  }
  0x61   : > { %847 = vmatprep.subr.bf16.mxu0 %v3241_v34  ;;  %989 = vmatprep.subr.bf16.mxu1 %v3244_v35  ;;  %v3326_v34 = vld [vmem:[%s4353_s1 + $0x4d0] ss:$8 sps:$4 sm:$0xff]   ;;  %v3331_v35 = vld [vmem:[%s4353_s1 + $0x464] ss:$8 sps:$4 sm:$0xff]  }
  0x64   : > { %848 = vmatpush1.bf16.msra.mxu0 %v3239_v36  ;;  %990 = vmatpush1.bf16.msra.mxu1 %v3242_v37  ;;  %v3334_v36 = vld [vmem:[%s4353_s1 + $0x4e4] ss:$8 sps:$4 sm:$0xff]   ;;  %v3329_v37 = vld [vmem:[%s4353_s1 + $0x460] ss:$8 sps:$4 sm:$0xff]  }
  0x65   : > { %1117 = vmatprep.subr.bf16.mxu0 %v3247_v38  ;;  %1259 = vmatprep.subr.bf16.mxu1 %v3250_v39  ;;  %v3332_v38 = vld [vmem:[%s4353_s1 + $0x4e0] ss:$8 sps:$4 sm:$0xff]   ;;  %v3337_v39 = vld [vmem:[%s4353_s1 + $0x474] ss:$8 sps:$4 sm:$0xff]  }
  0x67   : > { %866 = vmatmul.mubr.bf16.vlgmr.msra.gmra.mrb[8].mxu0 %v2683_v40  ;;  %1008 = vmatmul.mubr.bf16.vlgmr.msra.gmra.mrb[8].mxu1 %v2716_v41  ;;  %v3340_v40 = vld [vmem:[%s4353_s1 + $0x4f4] ss:$8 sps:$4 sm:$0xff]   ;;  %v3341_v41 = vld [vmem:[%s3632_s27] ss:$0 sps:$4 sm:$0x66]  }
  0x68   : > { %1118 = vmatpush1.bf16.msra.mxu0 %v3245_v42  ;;  %1260 = vmatpush1.bf16.msra.mxu1 %v3248_v43  ;;  %v3342_v42 = vld [vmem:[%s3632_s27 + $0x8] ss:$0 sps:$4 sm:$0x66]   ;;  %v3335_v43 = vld [vmem:[%s4353_s1 + $0x470] ss:$8 sps:$4 sm:$0xff]  }
  0x69   : > { %1119 = vmatprep.subr.bf16.mxu0 %v3253_v44  ;;  %1261 = vmatprep.subr.bf16.mxu1 %v3256_v45  ;;  %v3338_v44 = vld [vmem:[%s4353_s1 + $0x4f0] ss:$8 sps:$4 sm:$0xff]   ;;  %v3345_v45 = vld [vmem:[%s4353_s1 + $0x504] ss:$8 sps:$4 sm:$0xff]  }
  0x6a   : > { %1149 = vmatprep.mubr.bf16.mxu0 %v3501_v2  ;;  %1291 = vmatprep.mubr.bf16.mxu1 %v3501_v2 }
  0x6c   : > { %1120 = vmatpush1.bf16.msra.mxu0 %v3251_v46  ;;  %1262 = vmatpush1.bf16.msra.mxu1 %v3254_v47  ;;  %v3348_v46 = vld [vmem:[%s4353_s1 + $0x584] ss:$8 sps:$4 sm:$0xff]   ;;  %v1323_v47 = vrot.slane %v3341_v41, 1  ;;  %v3428_v41 = vld [vmem:[%s4353_s1 + $0x6d4] ss:$8 sps:$4 sm:$0xff]  }
  0x6d   : > { %1121 = vmatprep.subr.bf16.mxu0 %v3259_v48  ;;  %1263 = vmatprep.subr.bf16.mxu1 %v3262_v49  ;;  %v1469_v48 = vrot.slane %v3342_v42, 1  ;;  %v3343_v49 = vld [vmem:[%s4353_s1 + $0x500] ss:$8 sps:$4 sm:$0xff]   ;;  %v3423_v42 = vld [vmem:[%s4353_s1 + $0x650] ss:$8 sps:$4 sm:$0xff]  }
  0x70   : > { %1122 = vmatpush1.bf16.msra.mxu0 %v3257_v50  ;;  %1264 = vmatpush1.bf16.msra.mxu1 %v3260_v51  ;;  %v3346_v50 = vld [vmem:[%s4353_s1 + $0x580] ss:$8 sps:$4 sm:$0xff]   ;;  %v3351_v51 = vld [vmem:[%s4353_s1 + $0x514] ss:$8 sps:$4 sm:$0xff]  }
  0x71   : > { %1123 = vmatprep.subr.bf16.mxu0 %v3265_v52  ;;  %1265 = vmatprep.subr.bf16.mxu1 %v3268_v53  ;;  %v3354_v52 = vld [vmem:[%s4353_s1 + $0x594] ss:$8 sps:$4 sm:$0xff]   ;;  %v3349_v53 = vld [vmem:[%s4353_s1 + $0x510] ss:$8 sps:$4 sm:$0xff]  }
  0x74   : > { %1124 = vmatpush1.bf16.msra.mxu0 %v3263_v54  ;;  %1266 = vmatpush1.bf16.msra.mxu1 %v3266_v55  ;;  %v3352_v54 = vld [vmem:[%s4353_s1 + $0x590] ss:$8 sps:$4 sm:$0xff]   ;;  %v3357_v55 = vld [vmem:[%s4353_s1 + $0x524] ss:$8 sps:$4 sm:$0xff]  }
  0x75   : > { %1125 = vmatprep.subr.bf16.mxu0 %v3271_v56  ;;  %1267 = vmatprep.subr.bf16.mxu1 %v3274_v57  ;;  %v3360_v56 = vld [vmem:[%s4353_s1 + $0x5a4] ss:$8 sps:$4 sm:$0xff]   ;;  %v3355_v57 = vld [vmem:[%s4353_s1 + $0x520] ss:$8 sps:$4 sm:$0xff]  }
  0x78   : > { %1126 = vmatpush1.bf16.msra.mxu0 %v3269_v58  ;;  %1268 = vmatpush1.bf16.msra.mxu1 %v3272_v59  ;;  %v3358_v58 = vld [vmem:[%s4353_s1 + $0x5a0] ss:$8 sps:$4 sm:$0xff]   ;;  %v3363_v59 = vld [vmem:[%s4353_s1 + $0x534] ss:$8 sps:$4 sm:$0xff]  }
  0x79   : > { %1127 = vmatprep.subr.bf16.mxu0 %v3277_v60  ;;  %1269 = vmatprep.subr.bf16.mxu1 %v3280_v61  ;;  %v3366_v60 = vld [vmem:[%s4353_s1 + $0x5b4] ss:$8 sps:$4 sm:$0xff]   ;;  %v3361_v61 = vld [vmem:[%s4353_s1 + $0x530] ss:$8 sps:$4 sm:$0xff]  }
  0x7c   : > { %1128 = vmatpush1.bf16.msra.mxu0 %v3275_v62  ;;  %1270 = vmatpush1.bf16.msra.mxu1 %v3278_v63  ;;  %v3364_v62 = vld [vmem:[%s4353_s1 + $0x5b0] ss:$8 sps:$4 sm:$0xff]   ;;  %v3369_v63 = vld [vmem:[%s4353_s1 + $0x544] ss:$8 sps:$4 sm:$0xff]  }
  0x7d   : > { %1129 = vmatprep.subr.bf16.mxu0 %v3283_v0  ;;  %1271 = vmatprep.subr.bf16.mxu1 %v3286_v1  ;;  %v3372_v0 = vld [vmem:[%s4353_s1 + $0x5c4] ss:$8 sps:$4 sm:$0xff]   ;;  %v3367_v1 = vld [vmem:[%s4353_s1 + $0x540] ss:$8 sps:$4 sm:$0xff]  }
  0x80   : > { %1130 = vmatpush1.bf16.msra.mxu0 %v3281_v3  ;;  %1272 = vmatpush1.bf16.msra.mxu1 %v3284_v4  ;;  %v3370_v3 = vld [vmem:[%s4353_s1 + $0x5c0] ss:$8 sps:$4 sm:$0xff]   ;;  %v3375_v4 = vld [vmem:[%s4353_s1 + $0x554] ss:$8 sps:$4 sm:$0xff]  }
  0x81   : > { %1131 = vmatprep.subr.bf16.mxu0 %v3289_v5  ;;  %1273 = vmatprep.subr.bf16.mxu1 %v3292_v6  ;;  %v3378_v5 = vld [vmem:[%s4353_s1 + $0x5d4] ss:$8 sps:$4 sm:$0xff]   ;;  %v3373_v6 = vld [vmem:[%s4353_s1 + $0x550] ss:$8 sps:$4 sm:$0xff]  }
  0x84   : > { %1132 = vmatpush1.bf16.msra.mxu0 %v3287_v7  ;;  %1274 = vmatpush1.bf16.msra.mxu1 %v3290_v8  ;;  %v3376_v7 = vld [vmem:[%s4353_s1 + $0x5d0] ss:$8 sps:$4 sm:$0xff]   ;;  %v3381_v8 = vld [vmem:[%s4353_s1 + $0x564] ss:$8 sps:$4 sm:$0xff]  }
  0x85   : > { %1405 = vmatprep.subr.bf16.mxu0 %v3295_v9  ;;  %1551 = vmatprep.subr.bf16.mxu1 %v3298_v10  ;;  %v3384_v9 = vld [vmem:[%s4353_s1 + $0x5e4] ss:$8 sps:$4 sm:$0xff]   ;;  %v3379_v10 = vld [vmem:[%s4353_s1 + $0x560] ss:$8 sps:$4 sm:$0xff]  }
  0x87   : > { %1150 = vmatmul.mubr.bf16.vlgmr.msra.gmra.mrb[12].mxu0 %v2749_v11  ;;  %1292 = vmatmul.mubr.bf16.vlgmr.msra.gmra.mrb[12].mxu1 %v2782_v12  ;;  %v3382_v11 = vld [vmem:[%s4353_s1 + $0x5e0] ss:$8 sps:$4 sm:$0xff]   ;;  %v3387_v12 = vld [vmem:[%s4353_s1 + $0x574] ss:$8 sps:$4 sm:$0xff]  }
  0x88   : > { %1406 = vmatpush1.bf16.msra.mxu0 %v3293_v13  ;;  %1552 = vmatpush1.bf16.msra.mxu1 %v3296_v14  ;;  %v3390_v13 = vld [vmem:[%s4353_s1 + $0x5f4] ss:$8 sps:$4 sm:$0xff]   ;;  %v3391_v14 = vld [vmem:[%s3632_s27 + $0x4] ss:$0 sps:$4 sm:$0x66]  }
  0x89   : > { %1407 = vmatprep.subr.bf16.mxu0 %v3301_v15  ;;  %1553 = vmatprep.subr.bf16.mxu1 %v3304_v16  ;;  %v3392_v15 = vld [vmem:[%s3632_s27 + $0xc] ss:$0 sps:$4 sm:$0x66]   ;;  %v3385_v16 = vld [vmem:[%s4353_s1 + $0x570] ss:$8 sps:$4 sm:$0xff]  }
  0x8a   : > { %1437 = vmatprep.mubr.bf16.mxu0 %v3501_v2  ;;  %1583 = vmatprep.mubr.bf16.mxu1 %v3501_v2 }
  0x8c   : > { %1408 = vmatpush1.bf16.msra.mxu0 %v3299_v17  ;;  %1554 = vmatpush1.bf16.msra.mxu1 %v3302_v18  ;;  %v3388_v17 = vld [vmem:[%s4353_s1 + $0x5f0] ss:$8 sps:$4 sm:$0xff]   ;;  %v3395_v18 = vld [vmem:[%s4353_s1 + $0x604] ss:$8 sps:$4 sm:$0xff]  }
  0x8d   : > { %1409 = vmatprep.subr.bf16.mxu0 %v3307_v19  ;;  %1555 = vmatprep.subr.bf16.mxu1 %v3310_v20  ;;  %v3398_v19 = vld [vmem:[%s4353_s1 + $0x684] ss:$8 sps:$4 sm:$0xff]   ;;  %v1615_v20 = vrot.slane %v3391_v14, 1  ;;  %v3473_v14 = vld [vmem:[%s4353_s1 + $0x750] ss:$8 sps:$4 sm:$0xff]  }
  0x90   : > { %1410 = vmatpush1.bf16.msra.mxu0 %v3305_v21  ;;  %1556 = vmatpush1.bf16.msra.mxu1 %v3308_v22  ;;  %v1761_v21 = vrot.slane %v3392_v15, 1  ;;  %v3393_v22 = vld [vmem:[%s4353_s1 + $0x600] ss:$8 sps:$4 sm:$0xff]   ;;  %v3476_v15 = vld [vmem:[%s4353_s1 + $0x7d0] ss:$8 sps:$4 sm:$0xff]  }
  0x91   : > { %1411 = vmatprep.subr.bf16.mxu0 %v3313_v23  ;;  %1557 = vmatprep.subr.bf16.mxu1 %v3316_v24  ;;  %v3396_v23 = vld [vmem:[%s4353_s1 + $0x680] ss:$8 sps:$4 sm:$0xff]   ;;  %v3401_v24 = vld [vmem:[%s4353_s1 + $0x614] ss:$8 sps:$4 sm:$0xff]  }
  0x94   : > { %1412 = vmatpush1.bf16.msra.mxu0 %v3311_v25  ;;  %1558 = vmatpush1.bf16.msra.mxu1 %v3314_v26  ;;  %v3404_v25 = vld [vmem:[%s4353_s1 + $0x694] ss:$8 sps:$4 sm:$0xff]   ;;  %v3399_v26 = vld [vmem:[%s4353_s1 + $0x610] ss:$8 sps:$4 sm:$0xff]  }
  0x95   : > { %1413 = vmatprep.subr.bf16.mxu0 %v3319_v27  ;;  %1559 = vmatprep.subr.bf16.mxu1 %v3322_v28  ;;  %v3402_v27 = vld [vmem:[%s4353_s1 + $0x690] ss:$8 sps:$4 sm:$0xff]   ;;  %v3407_v28 = vld [vmem:[%s4353_s1 + $0x624] ss:$8 sps:$4 sm:$0xff]  }
  0x98   : > { %1414 = vmatpush1.bf16.msra.mxu0 %v3317_v29  ;;  %1560 = vmatpush1.bf16.msra.mxu1 %v3320_v30  ;;  %v3410_v29 = vld [vmem:[%s4353_s1 + $0x6a4] ss:$8 sps:$4 sm:$0xff]   ;;  %v3405_v30 = vld [vmem:[%s4353_s1 + $0x620] ss:$8 sps:$4 sm:$0xff]  }
  0x99   : > { %1415 = vmatprep.subr.bf16.mxu0 %v3325_v31  ;;  %1561 = vmatprep.subr.bf16.mxu1 %v3328_v32  ;;  %v3408_v31 = vld [vmem:[%s4353_s1 + $0x6a0] ss:$8 sps:$4 sm:$0xff]   ;;  %v3413_v32 = vld [vmem:[%s4353_s1 + $0x634] ss:$8 sps:$4 sm:$0xff]  }
  0x9c   : > { %1416 = vmatpush1.bf16.msra.mxu0 %v3323_v33  ;;  %1562 = vmatpush1.bf16.msra.mxu1 %v3326_v34  ;;  %v3416_v33 = vld [vmem:[%s4353_s1 + $0x6b4] ss:$8 sps:$4 sm:$0xff]   ;;  %v3411_v34 = vld [vmem:[%s4353_s1 + $0x630] ss:$8 sps:$4 sm:$0xff]  }
  0x9d   : > { %1417 = vmatprep.subr.bf16.mxu0 %v3331_v35  ;;  %1563 = vmatprep.subr.bf16.mxu1 %v3334_v36  ;;  %v3414_v35 = vld [vmem:[%s4353_s1 + $0x6b0] ss:$8 sps:$4 sm:$0xff]   ;;  %v3419_v36 = vld [vmem:[%s4353_s1 + $0x644] ss:$8 sps:$4 sm:$0xff]  }
  0xa0   : > { %1418 = vmatpush1.bf16.msra.mxu0 %v3329_v37  ;;  %1564 = vmatpush1.bf16.msra.mxu1 %v3332_v38  ;;  %v3422_v37 = vld [vmem:[%s4353_s1 + $0x6c4] ss:$8 sps:$4 sm:$0xff]   ;;  %v3417_v38 = vld [vmem:[%s4353_s1 + $0x640] ss:$8 sps:$4 sm:$0xff]  }
  0xa1   : > { %1419 = vmatprep.subr.bf16.mxu0 %v3337_v39  ;;  %1565 = vmatprep.subr.bf16.mxu1 %v3340_v40  ;;  %v3420_v39 = vld [vmem:[%s4353_s1 + $0x6c0] ss:$8 sps:$4 sm:$0xff]   ;;  %v3425_v40 = vld [vmem:[%s4353_s1 + $0x654] ss:$8 sps:$4 sm:$0xff]  }
  0xa4   : > { %1420 = vmatpush1.bf16.msra.mxu0 %v3335_v43  ;;  %1566 = vmatpush1.bf16.msra.mxu1 %v3338_v44  ;;  %v3426_v43 = vld [vmem:[%s4353_s1 + $0x6d0] ss:$8 sps:$4 sm:$0xff]   ;;  %v3431_v44 = vld [vmem:[%s4353_s1 + $0x664] ss:$8 sps:$4 sm:$0xff]  }
  0xa5   : > { %1697 = vmatprep.subr.bf16.mxu0 %v3345_v45  ;;  %1843 = vmatprep.subr.bf16.mxu1 %v3348_v46  ;;  %v3434_v45 = vld [vmem:[%s4353_s1 + $0x6e4] ss:$8 sps:$4 sm:$0xff]   ;;  %v3429_v46 = vld [vmem:[%s4353_s1 + $0x660] ss:$8 sps:$4 sm:$0xff]  }
  0xa7   : > { %1438 = vmatmul.mubr.bf16.vlgmr.msra.gmra.mrb[16].mxu0 %v1323_v47  ;;  %1584 = vmatmul.mubr.bf16.vlgmr.msra.gmra.mrb[16].mxu1 %v1469_v48  ;;  %v3432_v47 = vld [vmem:[%s4353_s1 + $0x6e0] ss:$8 sps:$4 sm:$0xff]   ;;  %v3437_v48 = vld [vmem:[%s4353_s1 + $0x674] ss:$8 sps:$4 sm:$0xff]  }
  0xa8   : > { %1698 = vmatpush1.bf16.msra.mxu0 %v3343_v49  ;;  %1844 = vmatpush1.bf16.msra.mxu1 %v3346_v50  ;;  %v3440_v49 = vld [vmem:[%s4353_s1 + $0x6f4] ss:$8 sps:$4 sm:$0xff]   ;;  %v3441_v50 = vld [vmem:[%s3632_s27 + $0x10] ss:$0 sps:$4 sm:$0x66]  }
  0xa9   : > { %1699 = vmatprep.subr.bf16.mxu0 %v3351_v51  ;;  %1845 = vmatprep.subr.bf16.mxu1 %v3354_v52  ;;  %v3442_v51 = vld [vmem:[%s3632_s27 + $0x18] ss:$0 sps:$4 sm:$0x66]  }
  0xaa   : > { %1729 = vmatprep.mubr.bf16.mxu0 %v3501_v2  ;;  %1875 = vmatprep.mubr.bf16.mxu1 %v3501_v2  ;;  %v3435_v52 = vld [vmem:[%s4353_s1 + $0x670] ss:$8 sps:$4 sm:$0xff]  }
  0xac   : > { %1700 = vmatpush1.bf16.msra.mxu0 %v3349_v53  ;;  %1846 = vmatpush1.bf16.msra.mxu1 %v3352_v54  ;;  %v3438_v53 = vld [vmem:[%s4353_s1 + $0x6f0] ss:$8 sps:$4 sm:$0xff]   ;;  %v3445_v54 = vld [vmem:[%s4353_s1 + $0x704] ss:$8 sps:$4 sm:$0xff]  }
  0xad   : > { %1701 = vmatprep.subr.bf16.mxu0 %v3357_v55  ;;  %1847 = vmatprep.subr.bf16.mxu1 %v3360_v56  ;;  %v3448_v55 = vld [vmem:[%s4353_s1 + $0x784] ss:$8 sps:$4 sm:$0xff]   ;;  %v1907_v56 = vrot.slane %v3441_v50, 1 }
  0xb0   : > { %1702 = vmatpush1.bf16.msra.mxu0 %v3355_v57  ;;  %1848 = vmatpush1.bf16.msra.mxu1 %v3358_v58  ;;  %v2053_v57 = vrot.slane %v3442_v51, 1  ;;  %v3443_v58 = vld [vmem:[%s4353_s1 + $0x700] ss:$8 sps:$4 sm:$0xff]  }
  0xb1   : > { %1703 = vmatprep.subr.bf16.mxu0 %v3363_v59  ;;  %1849 = vmatprep.subr.bf16.mxu1 %v3366_v60  ;;  %v3446_v59 = vld [vmem:[%s4353_s1 + $0x780] ss:$8 sps:$4 sm:$0xff]   ;;  %v3451_v60 = vld [vmem:[%s4353_s1 + $0x714] ss:$8 sps:$4 sm:$0xff]  }
  0xb4   : > { %1704 = vmatpush1.bf16.msra.mxu0 %v3361_v61  ;;  %1850 = vmatpush1.bf16.msra.mxu1 %v3364_v62  ;;  %v3454_v61 = vld [vmem:[%s4353_s1 + $0x794] ss:$8 sps:$4 sm:$0xff]   ;;  %v3449_v62 = vld [vmem:[%s4353_s1 + $0x710] ss:$8 sps:$4 sm:$0xff]  }
  0xb5   : > { %1705 = vmatprep.subr.bf16.mxu0 %v3369_v63  ;;  %1851 = vmatprep.subr.bf16.mxu1 %v3372_v0  ;;  %v3452_v63 = vld [vmem:[%s4353_s1 + $0x790] ss:$8 sps:$4 sm:$0xff]   ;;  %v3457_v0 = vld [vmem:[%s4353_s1 + $0x724] ss:$8 sps:$4 sm:$0xff]  }
  0xb8   : > { %1706 = vmatpush1.bf16.msra.mxu0 %v3367_v1  ;;  %1852 = vmatpush1.bf16.msra.mxu1 %v3370_v3  ;;  %v3460_v1 = vld [vmem:[%s4353_s1 + $0x7a4] ss:$8 sps:$4 sm:$0xff]   ;;  %v3455_v3 = vld [vmem:[%s4353_s1 + $0x720] ss:$8 sps:$4 sm:$0xff]  }
  0xb9   : > { %1707 = vmatprep.subr.bf16.mxu0 %v3375_v4  ;;  %1853 = vmatprep.subr.bf16.mxu1 %v3378_v5  ;;  %v3458_v4 = vld [vmem:[%s4353_s1 + $0x7a0] ss:$8 sps:$4 sm:$0xff]   ;;  %v3463_v5 = vld [vmem:[%s4353_s1 + $0x734] ss:$8 sps:$4 sm:$0xff]  }
  0xbc   : > { %1708 = vmatpush1.bf16.msra.mxu0 %v3373_v6  ;;  %1854 = vmatpush1.bf16.msra.mxu1 %v3376_v7  ;;  %v3461_v6 = vld [vmem:[%s4353_s1 + $0x730] ss:$8 sps:$4 sm:$0xff]  }
  0xbd   : > { %1709 = vmatprep.subr.bf16.mxu0 %v3381_v8  ;;  %1855 = vmatprep.subr.bf16.mxu1 %v3384_v9  ;;  %v3464_v7 = vld [vmem:[%s4353_s1 + $0x7b0] ss:$8 sps:$4 sm:$0xff]   ;;  %v3469_v8 = vld [vmem:[%s4353_s1 + $0x744] ss:$8 sps:$4 sm:$0xff]  }
  0xbe   : > { %v3472_v9 = vld [vmem:[%s4353_s1 + $0x7c4] ss:$8 sps:$4 sm:$0xff]  }
  0xc0   : > { %1710 = vmatpush1.bf16.msra.mxu0 %v3379_v10  ;;  %1856 = vmatpush1.bf16.msra.mxu1 %v3382_v11  ;;  %v3467_v10 = vld [vmem:[%s4353_s1 + $0x740] ss:$8 sps:$4 sm:$0xff]  }
  0xc1   : > { %1711 = vmatprep.subr.bf16.mxu0 %v3387_v12  ;;  %1857 = vmatprep.subr.bf16.mxu1 %v3390_v13  ;;  %v3470_v11 = vld [vmem:[%s4353_s1 + $0x7c0] ss:$8 sps:$4 sm:$0xff]   ;;  %v3475_v12 = vld [vmem:[%s4353_s1 + $0x754] ss:$8 sps:$4 sm:$0xff]  }
  0xc2   : > { %v3478_v13 = vld [vmem:[%s4353_s1 + $0x7d4] ss:$8 sps:$4 sm:$0xff]  }
  0xc4   : > { %1712 = vmatpush1.bf16.msra.mxu0 %v3385_v16  ;;  %1858 = vmatpush1.bf16.msra.mxu1 %v3388_v17  ;;  %v3481_v16 = vld [vmem:[%s4353_s1 + $0x764] ss:$8 sps:$4 sm:$0xff]  }
  0xc5   : > { %1989 = vmatprep.subr.bf16.mxu0 %v3395_v18  ;;  %2135 = vmatprep.subr.bf16.mxu1 %v3398_v19  ;;  %v3484_v17 = vld [vmem:[%s4353_s1 + $0x7e4] ss:$8 sps:$4 sm:$0xff]  }
  0xc7   : > { %1730 = vmatmul.mubr.bf16.vlgmr.msra.gmra.mrb[20].mxu0 %v1615_v20  ;;  %1876 = vmatmul.mubr.bf16.vlgmr.msra.gmra.mrb[20].mxu1 %v1761_v21 }
  0xc8   : > { %1990 = vmatpush1.bf16.msra.mxu0 %v3393_v22  ;;  %2136 = vmatpush1.bf16.msra.mxu1 %v3396_v23 }
  0xc9   : > { %1991 = vmatprep.subr.bf16.mxu0 %v3401_v24  ;;  %2137 = vmatprep.subr.bf16.mxu1 %v3404_v25 }
  0xca   : > { %2021 = vmatprep.mubr.bf16.mxu0 %v3501_v2  ;;  %2167 = vmatprep.mubr.bf16.mxu1 %v3501_v2 }
  0xcc   : > { %1992 = vmatpush1.bf16.msra.mxu0 %v3399_v26  ;;  %2138 = vmatpush1.bf16.msra.mxu1 %v3402_v27  ;;  %v3479_v26 = vld [vmem:[%s4353_s1 + $0x760] ss:$8 sps:$4 sm:$0xff]  }
  0xcd   : > { %1993 = vmatprep.subr.bf16.mxu0 %v3407_v28  ;;  %2139 = vmatprep.subr.bf16.mxu1 %v3410_v29  ;;  %v3482_v27 = vld [vmem:[%s4353_s1 + $0x7e0] ss:$8 sps:$4 sm:$0xff]  }
  0xd0   : > { %1994 = vmatpush1.bf16.msra.mxu0 %v3405_v30  ;;  %2140 = vmatpush1.bf16.msra.mxu1 %v3408_v31  ;;  %v3487_v30 = vld [vmem:[%s4353_s1 + $0x774] ss:$8 sps:$4 sm:$0xff]  }
  0xd1   : > { %1995 = vmatprep.subr.bf16.mxu0 %v3413_v32  ;;  %2141 = vmatprep.subr.bf16.mxu1 %v3416_v33  ;;  %v3490_v31 = vld [vmem:[%s4353_s1 + $0x7f4] ss:$8 sps:$4 sm:$0xff]  }
  0xd2   : > { %v3491_v32 = vld [vmem:[%s3632_s27 + $0x14] ss:$0 sps:$4 sm:$0x66]   ;;  %v3492_v33 = vld [vmem:[%s3632_s27 + $0x1c] ss:$0 sps:$4 sm:$0x66]  }
  0xd4   : > { %1996 = vmatpush1.bf16.msra.mxu0 %v3411_v34  ;;  %2142 = vmatpush1.bf16.msra.mxu1 %v3414_v35  ;;  %v3485_v34 = vld [vmem:[%s4353_s1 + $0x770] ss:$8 sps:$4 sm:$0xff]  }
  0xd5   : > { %1997 = vmatprep.subr.bf16.mxu0 %v3419_v36  ;;  %2143 = vmatprep.subr.bf16.mxu1 %v3422_v37  ;;  %v3488_v35 = vld [vmem:[%s4353_s1 + $0x7f0] ss:$8 sps:$4 sm:$0xff]   ;;  %v2199_v36 = vrot.slane %v3491_v32, 1  ;;  %v2345_v37 = vrot.slane %v3492_v33, 1 }
  0xd8   : > { %1998 = vmatpush1.bf16.msra.mxu0 %v3417_v38  ;;  %2144 = vmatpush1.bf16.msra.mxu1 %v3420_v39 }
  0xd9   : > { %1999 = vmatprep.subr.bf16.mxu0 %v3425_v40  ;;  %2145 = vmatprep.subr.bf16.mxu1 %v3428_v41 }
  0xdc   : > { %2000 = vmatpush1.bf16.msra.mxu0 %v3423_v42  ;;  %2146 = vmatpush1.bf16.msra.mxu1 %v3426_v43 }
  0xdd   : > { %2001 = vmatprep.subr.bf16.mxu0 %v3431_v44  ;;  %2147 = vmatprep.subr.bf16.mxu1 %v3434_v45 }
  0xe0   : > { %2002 = vmatpush1.bf16.msra.mxu0 %v3429_v46  ;;  %2148 = vmatpush1.bf16.msra.mxu1 %v3432_v47 }
  0xe1   : > { %2003 = vmatprep.subr.bf16.mxu0 %v3437_v48  ;;  %2149 = vmatprep.subr.bf16.mxu1 %v3440_v49 }
  0xe4   : > { %2004 = vmatpush1.bf16.msra.mxu0 %v3435_v52  ;;  %2150 = vmatpush1.bf16.msra.mxu1 %v3438_v53 }
  0xe5   : > { %2281 = vmatprep.subr.bf16.mxu0 %v3445_v54  ;;  %2427 = vmatprep.subr.bf16.mxu1 %v3448_v55 }
  0xe7   : > { %2022 = vmatmul.mubr.bf16.vlgmr.msra.gmra.mrb[24].mxu0 %v1907_v56  ;;  %2168 = vmatmul.mubr.bf16.vlgmr.msra.gmra.mrb[24].mxu1 %v2053_v57 }
  0xe8   : > { %2282 = vmatpush1.bf16.msra.mxu0 %v3443_v58  ;;  %2428 = vmatpush1.bf16.msra.mxu1 %v3446_v59 }
  0xe9   : > { %2283 = vmatprep.subr.bf16.mxu0 %v3451_v60  ;;  %2429 = vmatprep.subr.bf16.mxu1 %v3454_v61 }
  0xea   : > { %2313 = vmatprep.mubr.bf16.mxu0 %v3501_v2  ;;  %2459 = vmatprep.mubr.bf16.mxu1 %v3501_v2  ;;  %v3466_v2 = vld [vmem:[%s4353_s1 + $0x7b4] ss:$8 sps:$4 sm:$0xff]  }
  0xec   : > { %2284 = vmatpush1.bf16.msra.mxu0 %v3449_v62  ;;  %2430 = vmatpush1.bf16.msra.mxu1 %v3452_v63 }
  0xed   : > { %2285 = vmatprep.subr.bf16.mxu0 %v3457_v0  ;;  %2431 = vmatprep.subr.bf16.mxu1 %v3460_v1 }
  0xf0   : > { %2286 = vmatpush1.bf16.msra.mxu0 %v3455_v3  ;;  %2432 = vmatpush1.bf16.msra.mxu1 %v3458_v4 }
  0xf1   : > { %2287 = vmatprep.subr.bf16.mxu0 %v3463_v5  ;;  %2433 = vmatprep.subr.bf16.mxu1 %v3466_v2 }
  0xf4   : > { %2288 = vmatpush1.bf16.msra.mxu0 %v3461_v6  ;;  %2434 = vmatpush1.bf16.msra.mxu1 %v3464_v7 }
  0xf5   : > { %2289 = vmatprep.subr.bf16.mxu0 %v3469_v8  ;;  %2435 = vmatprep.subr.bf16.mxu1 %v3472_v9 }
  0xf8   : > { %2290 = vmatpush1.bf16.msra.mxu0 %v3467_v10  ;;  %2436 = vmatpush1.bf16.msra.mxu1 %v3470_v11 }
  0xf9   : > { %2291 = vmatprep.subr.bf16.mxu0 %v3475_v12  ;;  %2437 = vmatprep.subr.bf16.mxu1 %v3478_v13 }
  0xfa   : > { %v322_v18 = vpop.f32.mrb[0].mxu0  ;;  %v443_v19 = vpop.f32.mrb[0].mxu1 }
  0xfb   : > { %v444_v20 = vadd.f32 %v443_v19, %v322_v18  ;;  %v324_v21 = vpop.f32.mrb[1].mxu0  ;;  %v445_v22 = vpop.f32.mrb[1].mxu1 }
  0xfc   : > { %v446_v23 = vadd.f32 %v445_v22, %v324_v21  ;;  %v326_v24 = vpop.f32.mrb[2].mxu0  ;;  %v447_v25 = vpop.f32.mrb[2].mxu1  ;;  %2292 = vmatpush1.bf16.msra.mxu0 %v3473_v14  ;;  %2438 = vmatpush1.bf16.msra.mxu1 %v3476_v15 }
  0xfd   : > { %v327_v28 = vpop.f32.mrb[3].mxu0  ;;  %v448_v29 = vpop.f32.mrb[3].mxu1  ;;  %2293 = vmatprep.subr.bf16.mxu0 %v3481_v16  ;;  %2439 = vmatprep.subr.bf16.mxu1 %v3484_v17 }
 0x100   : > { %2294 = vmatpush1.bf16.msra.mxu0 %v3479_v26  ;;  %2440 = vmatpush1.bf16.msra.mxu1 %v3482_v27 }
 0x101   : > { %2295 = vmatprep.subr.bf16.mxu0 %v3487_v30  ;;  %2441 = vmatprep.subr.bf16.mxu1 %v3490_v31 }
 0x104   : > { %2296 = vmatpush1.bf16.msra.mxu0 %v3485_v34  ;;  %2442 = vmatpush1.bf16.msra.mxu1 %v3488_v35 }
 0x107   : > { %2314 = vmatmul.mubr.bf16.vlgmr.msra.gmra.mrb[28].mxu0 %v2199_v36  ;;  %2460 = vmatmul.mubr.bf16.vlgmr.msra.gmra.mrb[28].mxu1 %v2345_v37 }
 0x11a   : > { %v583_v38 = vpop.f32.mrb[4].mxu0  ;;  %v725_v39 = vpop.f32.mrb[4].mxu1 }
 0x11b   : > { %v590_v40 = vadd.f32 %v583_v38, %v444_v20  ;;  %v585_v41 = vpop.f32.mrb[5].mxu0  ;;  %v727_v42 = vpop.f32.mrb[5].mxu1 }
 0x11c   : > { %v591_v43 = vadd.f32 %v585_v41, %v446_v23  ;;  %v587_v44 = vpop.f32.mrb[6].mxu0  ;;  %v729_v45 = vpop.f32.mrb[6].mxu1 }
 0x11d   : > { %v732_v46 = vadd.f32 %v725_v39, %v590_v40  ;;  %v588_v47 = vpop.f32.mrb[7].mxu0  ;;  %v730_v48 = vpop.f32.mrb[7].mxu1 }
 0x11e   : > { %v733_v49 = vadd.f32 %v727_v42, %v591_v43 }
 0x13a   : > { %v867_v50 = vpop.f32.mrb[8].mxu0  ;;  %v1009_v51 = vpop.f32.mrb[8].mxu1 }
 0x13b   : > { %v874_v52 = vadd.f32 %v867_v50, %v732_v46  ;;  %v869_v53 = vpop.f32.mrb[9].mxu0  ;;  %v1011_v54 = vpop.f32.mrb[9].mxu1  ;;  %v2472_v46 = vlaneseq }
 0x13c   : > { %v875_v55 = vadd.f32 %v869_v53, %v733_v49  ;;  %v871_v56 = vpop.f32.mrb[10].mxu0  ;;  %v1013_v57 = vpop.f32.mrb[10].mxu1  ;;  %v2470_v49 = vld [vmem:[%s4354_s2] sm:$0x3] }
 0x13d   : > { %v1016_v58 = vadd.f32 %v1009_v51, %v874_v52  ;;  %v872_v59 = vpop.f32.mrb[11].mxu0  ;;  %v1014_v60 = vpop.f32.mrb[11].mxu1  ;;  %v2473_v47 = vshrl.u32 %v2472_v46, 7 }
 0x13e   : > { %v1017_v61 = vadd.f32 %v1011_v54, %v875_v55 }
 0x13f   : > { %v2474_v48 = vsub.s32 0, %v2473_v47  ;;  %v2478_v50 = vsub.s32 1, %v2473_v47 }
 0x141   : > { %v2475_v54 = vrot.slane %v2470_v49, %v2474_v48 }
 0x15a   : > { %v1151_v62 = vpop.f32.mrb[12].mxu0  ;;  %v1293_v63 = vpop.f32.mrb[12].mxu1 }
 0x15b   : > { %v1158_v0 = vadd.f32 %v1151_v62, %v1016_v58  ;;  %v1153_v1 = vpop.f32.mrb[13].mxu0  ;;  %v1295_v3 = vpop.f32.mrb[13].mxu1  ;;  %v2479_v58 = vrot.slane %v2470_v49, %v2478_v50 }
 0x15c   : > { %v1159_v4 = vadd.f32 %v1153_v1, %v1017_v61  ;;  %v1155_v5 = vpop.f32.mrb[14].mxu0  ;;  %v1297_v2 = vpop.f32.mrb[14].mxu1 }
 0x15d   : > { %v1300_v6 = vadd.f32 %v1293_v63, %v1158_v0  ;;  %v1156_v7 = vpop.f32.mrb[15].mxu0  ;;  %v1298_v8 = vpop.f32.mrb[15].mxu1 }
 0x15e   : > { %v1301_v9 = vadd.f32 %v1295_v3, %v1159_v4 }
 0x17a   : > { %v1439_v10 = vpop.f32.mrb[16].mxu0  ;;  %v1585_v11 = vpop.f32.mrb[16].mxu1 }
 0x17b   : > { %v1446_v12 = vadd.f32 %v1439_v10, %v1300_v6  ;;  %v1441_v13 = vpop.f32.mrb[17].mxu0  ;;  %v1587_v14 = vpop.f32.mrb[17].mxu1 }
 0x17c   : > { %v1447_v15 = vadd.f32 %v1441_v13, %v1301_v9  ;;  %v1443_v16 = vpop.f32.mrb[18].mxu0  ;;  %v1589_v17 = vpop.f32.mrb[18].mxu1 }
 0x17d   : > { %v1592_v18 = vadd.f32 %v1585_v11, %v1446_v12  ;;  %v1444_v19 = vpop.f32.mrb[19].mxu0  ;;  %v1590_v20 = vpop.f32.mrb[19].mxu1 }
 0x17e   : > { %v1593_v21 = vadd.f32 %v1587_v14, %v1447_v15 }
 0x19a   : > { %v1731_v22 = vpop.f32.mrb[20].mxu0  ;;  %v1877_v23 = vpop.f32.mrb[20].mxu1 }
 0x19b   : > { %v1738_v24 = vadd.f32 %v1731_v22, %v1592_v18  ;;  %v1733_v25 = vpop.f32.mrb[21].mxu0  ;;  %v1879_v26 = vpop.f32.mrb[21].mxu1 }
 0x19c   : > { %v1739_v27 = vadd.f32 %v1733_v25, %v1593_v21  ;;  %v1735_v28 = vpop.f32.mrb[22].mxu0  ;;  %v1881_v29 = vpop.f32.mrb[22].mxu1 }
 0x19d   : > { %v1884_v30 = vadd.f32 %v1877_v23, %v1738_v24  ;;  %v1736_v31 = vpop.f32.mrb[23].mxu0  ;;  %v1882_v32 = vpop.f32.mrb[23].mxu1 }
 0x19e   : > { %v1885_v33 = vadd.f32 %v1879_v26, %v1739_v27 }
 0x1ba   : > { %v2023_v34 = vpop.f32.mrb[24].mxu0  ;;  %v2169_v35 = vpop.f32.mrb[24].mxu1 }
 0x1bb   : > { %v2030_v36 = vadd.f32 %v2023_v34, %v1884_v30  ;;  %v2025_v37 = vpop.f32.mrb[25].mxu0  ;;  %v2171_v38 = vpop.f32.mrb[25].mxu1 }
 0x1bc   : > { %v2031_v39 = vadd.f32 %v2025_v37, %v1885_v33  ;;  %v2027_v40 = vpop.f32.mrb[26].mxu0  ;;  %v2173_v41 = vpop.f32.mrb[26].mxu1 }
 0x1bd   : > { %v2176_v42 = vadd.f32 %v2169_v35, %v2030_v36  ;;  %v2028_v43 = vpop.f32.mrb[27].mxu0  ;;  %v2174_v44 = vpop.f32.mrb[27].mxu1 }
 0x1be   : > { %v2177_v45 = vadd.f32 %v2171_v38, %v2031_v39 }
 0x1da   : > { %v2315_v51 = vpop.f32.mrb[28].mxu0  ;;  %v2461_v52 = vpop.f32.mrb[28].mxu1 }
 0x1db   : > { %v2322_v53 = vadd.f32 %v2315_v51, %v2176_v42  ;;  %v2317_v55 = vpop.f32.mrb[29].mxu0  ;;  %v2463_v56 = vpop.f32.mrb[29].mxu1 }
 0x1dc   : > { %v2323_v57 = vadd.f32 %v2317_v55, %v2177_v45  ;;  %v2319_v59 = vpop.f32.mrb[30].mxu0  ;;  %v2465_v60 = vpop.f32.mrb[30].mxu1 }
 0x1dd   : > { %v2468_v61 = vadd.f32 %v2461_v52, %v2322_v53  ;;  %v2320_v62 = vpop.f32.mrb[31].mxu0  ;;  %v2466_v63 = vpop.f32.mrb[31].mxu1 }
 0x1de   : > { %v2469_v0 = vadd.f32 %v2463_v56, %v2323_v57 }
 0x1df   : > { %v2482_v1 = vadd.f32 %v2475_v54, %v2468_v61 }
 0x1e0   : > { %v2483_v3 = vadd.f32 %v2479_v58, %v2469_v0 }
 0x1e1   : > { %vm2484_vm0 = vcmp.gt.f32.partialorder %v2482_v1, 0.0  ;;  %v2486_v4 = vmul.f32 0.01, %v2482_v1 }
 0x1e2   : > { %vm2485_vm1 = vcmp.gt.f32.partialorder %v2483_v3, 0.0  ;;  %v2487_v5 = vmul.f32 0.01, %v2483_v3 }
 0x1e3   : > { %v2488_v2 = vsel %vm2484_vm0, %v2482_v1, %v2486_v4 }
 0x1e4   : > { %v2489_v6 = vsel %vm2485_vm1, %v2483_v3, %v2487_v5 }
 0x1e5   : > { %v3086_v7 = vpack.c.bf16 %v2489_v6, %v2488_v2 }
 0x1e7   : > { %3087 = vst.sshfl [vmem:[%s170_s28] sm:$0x33 pattern:$0x76325410] %v3086_v7 }
 0x1e8 PF: > { %s13_s12 = sadd.s32 1, %s3499_s12  }
 0x1e9   : > { %p10_p4 = scmp.ge.s32.totalorder %s13_s12, 4  }
 0x1eb   :  { %12 = sbr.rel (!%p10_p4) target bundleno = 1 (0x1), region = 84 }

</bundles_post_ra>
